<compile_context>
chip_gen: v6e
topology: v6e:2x2x1
jax: 0.10.0
libtpu: 0.0.40
codegen_flags: <defaults>
</compile_context>

<pallas_src>
import math
from dataclasses import dataclass

import jax
import jax.numpy as jnp
import numpy as np
from jax.experimental import pallas as pl
from jax.experimental.pallas import tpu as pltpu

_LANE = 128
_SUBLANE = 8


def _round_up(x, m):
    return (x + m - 1) // m * m


def _vmem_limit_bytes():
    """Generation-aware scoped-VMEM limit (v5e/v6e: 128 MiB phys, v7x: 64 MiB)."""
    try:
        cap = int(pltpu.get_tpu_info().vmem_capacity_bytes)
    except Exception:
        cap = 64 * 1024 * 1024
    return min(cap * 3 // 4, 100 * 1024 * 1024)


def _pick_row_tile(h_out, w_out, cin, c_total, target_rows=512,
                   vmem_budget=8 * 1024 * 1024):
    """Row-tile height THo so M = THo*Wo lands near `target_rows` MXU rows.

    No divisor constraint (grid uses cdiv + ragged last tile). Prefers a
    sublane(8)-aligned flattened M and keeps im2col + double-buffered f32
    output inside a conservative per-tile VMEM budget.
    """
    def fits(t):
        m = t * w_out
        return (m * 9 * cin * 2) + (2 * m * c_total * 4) <= vmem_budget

    tho = max(1, min(h_out, max(1, target_rows // max(w_out, 1))))
    while tho > 1 and not fits(tho):
        tho -= 1
    for t in range(tho, 0, -1):          # prefer sublane-aligned flattened M
        if (t * w_out) % _SUBLANE == 0 and fits(t):
            return t
    return tho


# --------------------------------------------------------------------------- #
# Pallas kernel: fused loc+conf 3x3 conv, one (batch, row-tile) per grid step  #
# --------------------------------------------------------------------------- #
def _make_conv_kernel(*, H, W, Cin, Ho, Wo, THo, stride, Ct, in_dtype):
    TH_in = (THo - 1) * stride + 3      # input rows feeding one output row tile
    n_int = TH_in - 2                   # interior (non-halo) rows of the window
    M = THo * Wo                        # MXU M = flattened spatial rows per tile

    def kernel(x_ref, w_ref, b_ref, out_ref, pad_ref, col_ref):
        # x_ref   : (1, H, W, Cin)    bf16  whole image (resident across row tiles)
        # w_ref   : (9*Cin, Ct)       bf16  fused loc+conf filters, lane-dense
        # b_ref   : (1, Ct)           f32   fused bias
        # out_ref : (1, M, Ct)        f32   flattened-spatial output tile
        # pad_ref : (TH_in, W+2, Cin) bf16  VMEM scratch: zero-halo'd window
        # col_ref : (M, 9*Cin)        bf16  VMEM scratch: im2col slab
        rt = pl.program_id(1)
        r_mid = rt * (THo * stride)     # image row of first interior window row

        zero_row = jnp.zeros((1, W, Cin), in_dtype)
        zero_col = jnp.zeros((TH_in, 1, Cin), in_dtype)

        # ---- build the zero-padded window; zero ONLY the halo --------------
        pad_ref[:, 0:1, :] = zero_col                     # left "same" padding
        pad_ref[:, W + 1:W + 2, :] = zero_col             # right "same" padding

        @pl.when(rt == 0)                                  # top halo row
        def _():
            pad_ref[0:1, 1:W + 1, :] = zero_row

        @pl.when(rt > 0)
        def _():
            pad_ref[0:1, 1:W + 1, :] = x_ref[0, pl.ds(r_mid - 1, 1), :, :]

        # interior rows: bulk copy for full tiles; guarded per-row copy/zero
        # for the ragged last tile so every needed window row is well-defined.
        @pl.when(r_mid + n_int <= H)
        def _():
            pad_ref[1:1 + n_int, 1:W + 1, :] = x_ref[0, pl.ds(r_mid, n_int), :, :]

        @pl.when(r_mid + n_int > H)
        def _():
            for i in range(n_int):
                @pl.when(r_mid + i < H)
                def _():
                    pad_ref[1 + i:2 + i, 1:W + 1, :] = (
                        x_ref[0, pl.ds(r_mid + i, 1), :, :])

                @pl.when(r_mid + i >= H)
                def _():
                    pad_ref[1 + i:2 + i, 1:W + 1, :] = zero_row

        r_bot = r_mid + n_int                              # bottom halo row
        @pl.when(r_bot < H)
        def _():
            pad_ref[TH_in - 1:TH_in, 1:W + 1, :] = x_ref[0, pl.ds(r_bot, 1), :, :]

        @pl.when(r_bot >= H)
        def _():
            pad_ref[TH_in - 1:TH_in, 1:W + 1, :] = zero_row

        # ---- im2col into VMEM, then ONE big-K MXU matmul --------------------
        for kh in range(3):
            for kw in range(3):
                t = kh * 3 + kw
                if stride == 1:
                    patch = pad_ref[kh:kh + THo, kw:kw + Wo, :]
                else:
                    # TODO(synk): for stride>1, compact the strided columns once
                    # per (kh, phase) instead of 9 strided window gathers.
                    patch = pad_ref[pl.ds(kh, THo, stride),
                                    pl.ds(kw, Wo, stride), :]
                col_ref[:, t * Cin:(t + 1) * Cin] = patch.reshape(M, Cin)

        acc = jnp.dot(col_ref[...], w_ref[...],
                      preferred_element_type=jnp.float32)
        # TODO(synk): bf16 output option to halve HBM writeback if downstream allows.
        out_ref[0] = (acc + b_ref[...]).astype(out_ref.dtype)

    return kernel, TH_in, M


def fused_detector_conv(x_nhwc, w_fused, b_fused, *, stride, Ct):
    """x_nhwc (N,H,W,Cin) bf16; w_fused (9*Cin, Ct) bf16; b_fused (1, Ct) f32.

    Returns the fused conv output (N, Ho, Wo, Ct) f32 (loc || conf || pad lanes).
    """
    N, H, W, Cin = x_nhwc.shape
    assert w_fused.shape == (9 * Cin, Ct)

    Ho = (H - 1) // stride + 1
    Wo = (W - 1) // stride + 1
    THo = _pick_row_tile(Ho, Wo, Cin, Ct)
    n_row_tiles = pl.cdiv(Ho, THo)

    kernel, TH_in, M = _make_conv_kernel(H=H, W=W, Cin=Cin, Ho=Ho, Wo=Wo,
                                         THo=THo, stride=stride, Ct=Ct,
                                         in_dtype=x_nhwc.dtype)

    flops = 2 * N * Ho * Wo * 9 * Cin * Ct
    bytes_accessed = (N * H * W * Cin * 2            # bf16 input
                      + 9 * Cin * Ct * 2             # bf16 weights
                      + Ct * 4                       # bias
                      + N * Ho * Wo * Ct * 4)        # f32 output

    grid_spec = pltpu.PrefetchScalarGridSpec(
        num_scalar_prefetch=0,
        grid=(N, n_row_tiles),
        in_specs=[
            # whole image per batch element; same block for every row tile ->
            # fetched once per n.
            # TODO(synk): for very large feature maps, switch to
            # memory_space=pl.ANY + make_async_copy of only the TH_in-row
            # window (v7x 64 MiB VMEM budget).
            pl.BlockSpec((1, H, W, Cin), lambda n, rt: (n, 0, 0, 0)),
            # TODO(synk): pipeline_mode=pl.Buffered(1) for these grid-invariant
            # blocks once validated on the deployed jax version.
            pl.BlockSpec((9 * Cin, Ct), lambda n, rt: (0, 0)),
            pl.BlockSpec((1, Ct), lambda n, rt: (0, 0)),
        ],
        out_specs=pl.BlockSpec((1, M, Ct), lambda n, rt: (n, rt, 0)),
        scratch_shapes=[
            pltpu.VMEM((TH_in, W + 2, Cin), x_nhwc.dtype),   # padded window
            pltpu.VMEM((M, 9 * Cin), x_nhwc.dtype),          # im2col slab
        ],
    )

    out_flat = pl.pallas_call(
        kernel,
        out_shape=jax.ShapeDtypeStruct((N, Ho * Wo, Ct), jnp.float32),
        grid_spec=grid_spec,
        compiler_params=pltpu.CompilerParams(
            dimension_semantics=("parallel", "parallel"),
            vmem_limit_bytes=_vmem_limit_bytes()),
        cost_estimate=pl.CostEstimate(flops=flops, transcendentals=0,
                                      bytes_accessed=bytes_accessed),
    )(x_nhwc, w_fused, b_fused)

    return out_flat.reshape(N, Ho, Wo, Ct)


# --------------------------------------------------------------------------- #
# Detector module in JAX                                                      #
# --------------------------------------------------------------------------- #
@dataclass
class DetectorParams:
    size: tuple
    in_chan: int
    stride: int
    ratios: list
    minmax_size: tuple
    step: tuple


class Detector:
    def __init__(self, params: DetectorParams, num_classes: int, key):
        self.params = params
        self.num_classes = num_classes
        h, w = params.size
        step_h, step_w = params.step
        min_size, max_size = params.minmax_size

        gm_size = math.sqrt(min_size * max_size)
        self.box_sizes = (
            [(min_size, min_size), (gm_size, gm_size)]
            + [(min_size * math.sqrt(r), min_size / math.sqrt(r))
               for r in params.ratios]
            + [(min_size / math.sqrt(r), min_size * math.sqrt(r))
               for r in params.ratios]
        )
        # default boxes buffer (not used by forward, kept for fidelity)
        self.dboxes = jnp.array(
            [((x + 0.5) * step_w / w, (y + 0.5) * step_h / h, bw, bh)
             for bw, bh in self.box_sizes
             for y in range(h) for x in range(w)],
            dtype=jnp.float32)

        nboxes = len(self.box_sizes)
        loc_out = nboxes * 4
        conf_out = nboxes * num_classes
        cin = params.in_chan
        self.loc_out, self.conf_out = loc_out, conf_out

        # Deterministic Conv2d-like init, stored HWIO (3,3,Cin,Cout) in f32.
        k_wl, k_bl, k_wc, k_bc = jax.random.split(key, 4)
        fan_in = cin * 9
        bound = 1.0 / math.sqrt(fan_in)
        self.w_loc = jax.random.uniform(
            k_wl, (3, 3, cin, loc_out), jnp.float32, -bound, bound)
        self.b_loc = jax.random.uniform(
            k_bl, (loc_out,), jnp.float32, -bound, bound)
        self.w_conf = jax.random.uniform(
            k_wc, (3, 3, cin, conf_out), jnp.float32, -bound, bound)
        self.b_conf = jax.random.uniform(
            k_bc, (conf_out,), jnp.float32, -bound, bound)

        # ---- ONE fused lane-dense output block (loc || conf, padded to 128) ----
        total_out = loc_out + conf_out
        self.Ct = _round_up(total_out, _LANE)
        w_all = jnp.concatenate([self.w_loc, self.w_conf], axis=-1)   # (3,3,Cin,total)
        w_all = jnp.pad(w_all, ((0, 0), (0, 0), (0, 0), (0, self.Ct - total_out)))
        # dense 2D slab: row (kh*3+kw)*Cin + ci  <->  kernel's col layout
        self.w_fused = w_all.reshape(9 * cin, self.Ct).astype(jnp.bfloat16)
        b_all = jnp.concatenate([self.b_loc, self.b_conf])
        self.b_fused = jnp.pad(b_all, (0, self.Ct - total_out)).reshape(
            1, self.Ct).astype(jnp.float32)

    def forward(self, x_nchw):
        """x_nchw: (N, Cin, H, W) float32 -> (loc, conf) both NCHW float32."""
        # TODO(synk): keep activations NHWC end-to-end across heads to drop these transposes.
        x_nhwc = jnp.transpose(x_nchw, (0, 2, 3, 1)).astype(jnp.bfloat16)
        fused = fused_detector_conv(x_nhwc, self.w_fused, self.b_fused,
                                    stride=self.params.stride, Ct=self.Ct)
        # Slice the fused lane block (drops bias-only pad lanes); fuses with the
        # NCHW transpose in XLA.
        loc = jnp.transpose(fused[..., :self.loc_out], (0, 3, 1, 2))
        conf = jnp.transpose(
            fused[..., self.loc_out:self.loc_out + self.conf_out], (0, 3, 1, 2))
        return loc, conf

    # TODO(synk): detect() raises NotImplementedError in the reference module; not ported.


# --------------------------------------------------------------------------- #
# Reference check (pure-JAX conv with identical bf16 operand rounding) + demo #
# --------------------------------------------------------------------------- #
def _ref_conv_nchw(x_nchw, w_hwio, b, stride):
    w_oihw = jnp.transpose(w_hwio, (3, 2, 0, 1)).astype(jnp.bfloat16)
    x = x_nchw.astype(jnp.bfloat16)
    y = jax.lax.conv_general_dilated(
        x, w_oihw, window_strides=(stride, stride),
        padding=((1, 1), (1, 1)),
        dimension_numbers=("NCHW", "OIHW", "NCHW"),
        preferred_element_type=jnp.float32)
    return y + b[None, :, None, None]


if __name__ == "__main__":
    key = jax.random.PRNGKey(0)
    k_param, k_x = jax.random.split(key)

    params = DetectorParams(
        size=(16, 16), in_chan=4, stride=1,
        ratios=[2, 3], minmax_size=(0.1, 0.2), step=(8, 8))
    num_classes = 3

    det = Detector(params, num_classes, k_param)

    # PyTorch conv input layout is NCHW
    x = jax.random.normal(k_x, (2, 4, 16, 16), jnp.float32)

    loc, conf = det.forward(x)
    loc = jax.block_until_ready(loc)
    conf = jax.block_until_ready(conf)

    # sanity-check against pure-JAX reference conv (same bf16 operand rounding)
    # TODO(synk): bf16 operand rounding means error vs a true f32 PyTorch conv is
    # larger than 1e-4 for big Cin; accepted precision documented here.
    loc_ref = _ref_conv_nchw(x, det.w_loc, det.b_loc, params.stride)
    conf_ref = _ref_conv_nchw(x, det.w_conf, det.b_conf, params.stride)
    assert loc.shape == (2, len(det.box_sizes) * 4, 16, 16)
    assert conf.shape == (2, len(det.box_sizes) * num_classes, 16, 16)
    np.testing.assert_allclose(np.asarray(loc), np.asarray(loc_ref),
                               rtol=1e-4, atol=1e-4)
    np.testing.assert_allclose(np.asarray(conf), np.asarray(conf_ref),
                               rtol=1e-4, atol=1e-4)

    print("KERNEL_OK")
</pallas_src>

<mosaic_0001>
module attributes {stable_mosaic.version = 11 : i64} {
  func.func @kernel(%arg0: i32, %arg1: i32, %arg2: memref<1x16x16x4xbf16, #tpu.memory_space<vmem>>, %arg3: memref<36x128xbf16, #tpu.memory_space<vmem>>, %arg4: memref<1x128xf32, #tpu.memory_space<vmem>>, %arg5: memref<1x256x128xf32, #tpu.memory_space<vmem>>, %arg6: memref<18x18x4xbf16, #tpu.memory_space<vmem>>, %arg7: memref<256x36xbf16, #tpu.memory_space<vmem>>) attributes {dimension_semantics = [#tpu.dimension_semantics<parallel>, #tpu.dimension_semantics<parallel>], iteration_bounds = array<i64: 2, 1>, scalar_prefetch = 0 : i64, scratch_operands = 2 : i64, tpu.core_type = #tpu.core_type<tc>, window_params = [{transform_indices = @transform_0, window_bounds = array<i64: 1, 16, 16, 4>}, {pipeline_mode = #tpu.pipeline_mode<synchronous>, transform_indices = @transform_1, window_bounds = array<i64: 36, 128>}, {pipeline_mode = #tpu.pipeline_mode<synchronous>, transform_indices = @transform_2, window_bounds = array<i64: 1, 128>}, {transform_indices = @transform_3, window_bounds = array<i64: 1, 256, 128>}]} {
    %c16_i32 = arith.constant 16 : i32
    %0 = arith.muli %arg1, %c16_i32 : i32
    %cst = arith.constant 0.000000e+00 : bf16
    %1 = vector.broadcast %cst : bf16 to vector<1x16x4xbf16>
    %cst_0 = arith.constant 0.000000e+00 : bf16
    %2 = vector.broadcast %cst_0 : bf16 to vector<18x1x4xbf16>
    %c0 = arith.constant 0 : index
    %c0_1 = arith.constant 0 : index
    %c0_2 = arith.constant 0 : index
    %3 = vector.load %arg6[%c0, %c0_1, %c0_2] : memref<18x18x4xbf16, #tpu.memory_space<vmem>>, vector<18x1x4xbf16>
    tpu.vector_store %arg6[%c0, %c0_1, %c0_2], %2 {strides = array<i32>} : memref<18x18x4xbf16, #tpu.memory_space<vmem>>, vector<18x1x4xbf16>,
    %c0_3 = arith.constant 0 : index
    %c17 = arith.constant 17 : index
    %c0_4 = arith.constant 0 : index
    %4 = vector.load %arg6[%c0_3, %c17, %c0_4] : memref<18x18x4xbf16, #tpu.memory_space<vmem>>, vector<18x1x4xbf16>
    tpu.vector_store %arg6[%c0_3, %c17, %c0_4], %2 {strides = array<i32>} : memref<18x18x4xbf16, #tpu.memory_space<vmem>>, vector<18x1x4xbf16>,
    %c0_i32 = arith.constant 0 : i32
    %5 = arith.cmpi eq, %arg1, %c0_i32 : i32
    %6 = arith.extui %5 : i1 to i32
    %c0_i32_5 = arith.constant 0 : i32
    %7 = arith.cmpi ne, %6, %c0_i32_5 : i32
    scf.if %7 {
      %c0_64 = arith.constant 0 : index
      %c1_65 = arith.constant 1 : index
      %c0_66 = arith.constant 0 : index
      %62 = vector.load %arg6[%c0_64, %c1_65, %c0_66] : memref<18x18x4xbf16, #tpu.memory_space<vmem>>, vector<1x16x4xbf16>
      tpu.vector_store %arg6[%c0_64, %c1_65, %c0_66], %1 {strides = array<i32>} : memref<18x18x4xbf16, #tpu.memory_space<vmem>>, vector<1x16x4xbf16>,
    } else {
    }
    %c0_i32_6 = arith.constant 0 : i32
    %8 = arith.cmpi sgt, %arg1, %c0_i32_6 : i32
    %9 = arith.extui %8 : i1 to i32
    %c0_i32_7 = arith.constant 0 : i32
    %10 = arith.cmpi ne, %9, %c0_i32_7 : i32
    scf.if %10 {
      %c1_i32 = arith.constant 1 : i32
      %62 = arith.subi %0, %c1_i32 : i32
      %c0_64 = arith.constant 0 : index
      %63 = arith.index_cast %62 : i32 to index
      %c0_65 = arith.constant 0 : index
      %c0_66 = arith.constant 0 : index
      %64 = vector.load %arg2[%c0_64, %63, %c0_65, %c0_66] : memref<1x16x16x4xbf16, #tpu.memory_space<vmem>>, vector<1x1x16x4xbf16>
      %65 = vector.shape_cast %64 : vector<1x1x16x4xbf16> to vector<1x16x4xbf16>
      %c0_67 = arith.constant 0 : index
      %c1_68 = arith.constant 1 : index
      %c0_69 = arith.constant 0 : index
      %66 = vector.load %arg6[%c0_67, %c1_68, %c0_69] : memref<18x18x4xbf16, #tpu.memory_space<vmem>>, vector<1x16x4xbf16>
      tpu.vector_store %arg6[%c0_67, %c1_68, %c0_69], %65 {strides = array<i32>} : memref<18x18x4xbf16, #tpu.memory_space<vmem>>, vector<1x16x4xbf16>,
    } else {
    }
    %c16_i32_8 = arith.constant 16 : i32
    %11 = arith.addi %0, %c16_i32_8 : i32
    %c16_i32_9 = arith.constant 16 : i32
    %12 = arith.cmpi sle, %11, %c16_i32_9 : i32
    %13 = arith.extui %12 : i1 to i32
    %c0_i32_10 = arith.constant 0 : i32
    %14 = arith.cmpi ne, %13, %c0_i32_10 : i32
    scf.if %14 {
      %c0_64 = arith.constant 0 : index
      %62 = arith.index_cast %0 : i32 to index
      %c0_65 = arith.constant 0 : index
      %c0_66 = arith.constant 0 : index
      %63 = vector.load %arg2[%c0_64, %62, %c0_65, %c0_66] : memref<1x16x16x4xbf16, #tpu.memory_space<vmem>>, vector<1x16x16x4xbf16>
      %64 = vector.shape_cast %63 : vector<1x16x16x4xbf16> to vector<16x16x4xbf16>
      %c1_67 = arith.constant 1 : index
      %c1_68 = arith.constant 1 : index
      %c0_69 = arith.constant 0 : index
      %65 = vector.load %arg6[%c1_67, %c1_68, %c0_69] : memref<18x18x4xbf16, #tpu.memory_space<vmem>>, vector<16x16x4xbf16>
      tpu.vector_store %arg6[%c1_67, %c1_68, %c0_69], %64 {strides = array<i32>} : memref<18x18x4xbf16, #tpu.memory_space<vmem>>, vector<16x16x4xbf16>,
    } else {
    }
    %c16_i32_11 = arith.constant 16 : i32
    %15 = arith.addi %0, %c16_i32_11 : i32
    %c16_i32_12 = arith.constant 16 : i32
    %16 = arith.cmpi sgt, %15, %c16_i32_12 : i32
    %17 = arith.extui %16 : i1 to i32
    %c0_i32_13 = arith.constant 0 : i32
    %18 = arith.cmpi ne, %17, %c0_i32_13 : i32
    scf.if %18 {
      %c0_i32_64 = arith.constant 0 : i32
      %62 = arith.addi %0, %c0_i32_64 : i32
      %c16_i32_65 = arith.constant 16 : i32
      %63 = arith.cmpi slt, %62, %c16_i32_65 : i32
      %64 = arith.extui %63 : i1 to i32
      %c0_i32_66 = arith.constant 0 : i32
      %65 = arith.cmpi ne, %64, %c0_i32_66 : i32
      scf.if %65 {
        %c0_i32_145 = arith.constant 0 : i32
        %190 = arith.addi %0, %c0_i32_145 : i32
        %c0_146 = arith.constant 0 : index
        %191 = arith.index_cast %190 : i32 to index
        %c0_147 = arith.constant 0 : index
        %c0_148 = arith.constant 0 : index
        %192 = vector.load %arg2[%c0_146, %191, %c0_147, %c0_148] : memref<1x16x16x4xbf16, #tpu.memory_space<vmem>>, vector<1x1x16x4xbf16>
        %193 = vector.shape_cast %192 : vector<1x1x16x4xbf16> to vector<1x16x4xbf16>
        %c1_149 = arith.constant 1 : index
        %c1_150 = arith.constant 1 : index
        %c0_151 = arith.constant 0 : index
        %194 = vector.load %arg6[%c1_149, %c1_150, %c0_151] : memref<18x18x4xbf16, #tpu.memory_space<vmem>>, vector<1x16x4xbf16>
        tpu.vector_store %arg6[%c1_149, %c1_150, %c0_151], %193 {strides = array<i32>} : memref<18x18x4xbf16, #tpu.memory_space<vmem>>, vector<1x16x4xbf16>,
      } else {
      }
      %c0_i32_67 = arith.constant 0 : i32
      %66 = arith.addi %0, %c0_i32_67 : i32
      %c16_i32_68 = arith.constant 16 : i32
      %67 = arith.cmpi sge, %66, %c16_i32_68 : i32
      %68 = arith.extui %67 : i1 to i32
      %c0_i32_69 = arith.constant 0 : i32
      %69 = arith.cmpi ne, %68, %c0_i32_69 : i32
      scf.if %69 {
        %c1_145 = arith.constant 1 : index
        %c1_146 = arith.constant 1 : index
        %c0_147 = arith.constant 0 : index
        %190 = vector.load %arg6[%c1_145, %c1_146, %c0_147] : memref<18x18x4xbf16, #tpu.memory_space<vmem>>, vector<1x16x4xbf16>
        tpu.vector_store %arg6[%c1_145, %c1_146, %c0_147], %1 {strides = array<i32>} : memref<18x18x4xbf16, #tpu.memory_space<vmem>>, vector<1x16x4xbf16>,
      } else {
      }
      %c1_i32 = arith.constant 1 : i32
      %70 = arith.addi %0, %c1_i32 : i32
      %c16_i32_70 = arith.constant 16 : i32
      %71 = arith.cmpi slt, %70, %c16_i32_70 : i32
      %72 = arith.extui %71 : i1 to i32
      %c0_i32_71 = arith.constant 0 : i32
      %73 = arith.cmpi ne, %72, %c0_i32_71 : i32
      scf.if %73 {
        %c1_i32_145 = arith.constant 1 : i32
        %190 = arith.addi %0, %c1_i32_145 : i32
        %c0_146 = arith.constant 0 : index
        %191 = arith.index_cast %190 : i32 to index
        %c0_147 = arith.constant 0 : index
        %c0_148 = arith.constant 0 : index
        %192 = vector.load %arg2[%c0_146, %191, %c0_147, %c0_148] : memref<1x16x16x4xbf16, #tpu.memory_space<vmem>>, vector<1x1x16x4xbf16>
        %193 = vector.shape_cast %192 : vector<1x1x16x4xbf16> to vector<1x16x4xbf16>
        %c2_149 = arith.constant 2 : index
        %c1_150 = arith.constant 1 : index
        %c0_151 = arith.constant 0 : index
        %194 = vector.load %arg6[%c2_149, %c1_150, %c0_151] : memref<18x18x4xbf16, #tpu.memory_space<vmem>>, vector<1x16x4xbf16>
        tpu.vector_store %arg6[%c2_149, %c1_150, %c0_151], %193 {strides = array<i32>} : memref<18x18x4xbf16, #tpu.memory_space<vmem>>, vector<1x16x4xbf16>,
      } else {
      }
      %c1_i32_72 = arith.constant 1 : i32
      %74 = arith.addi %0, %c1_i32_72 : i32
      %c16_i32_73 = arith.constant 16 : i32
      %75 = arith.cmpi sge, %74, %c16_i32_73 : i32
      %76 = arith.extui %75 : i1 to i32
      %c0_i32_74 = arith.constant 0 : i32
      %77 = arith.cmpi ne, %76, %c0_i32_74 : i32
      scf.if %77 {
        %c2_145 = arith.constant 2 : index
        %c1_146 = arith.constant 1 : index
        %c0_147 = arith.constant 0 : index
        %190 = vector.load %arg6[%c2_145, %c1_146, %c0_147] : memref<18x18x4xbf16, #tpu.memory_space<vmem>>, vector<1x16x4xbf16>
        tpu.vector_store %arg6[%c2_145, %c1_146, %c0_147], %1 {strides = array<i32>} : memref<18x18x4xbf16, #tpu.memory_space<vmem>>, vector<1x16x4xbf16>,
      } else {
      }
      %c2_i32 = arith.constant 2 : i32
      %78 = arith.addi %0, %c2_i32 : i32
      %c16_i32_75 = arith.constant 16 : i32
      %79 = arith.cmpi slt, %78, %c16_i32_75 : i32
      %80 = arith.extui %79 : i1 to i32
      %c0_i32_76 = arith.constant 0 : i32
      %81 = arith.cmpi ne, %80, %c0_i32_76 : i32
      scf.if %81 {
        %c2_i32_145 = arith.constant 2 : i32
        %190 = arith.addi %0, %c2_i32_145 : i32
        %c0_146 = arith.constant 0 : index
        %191 = arith.index_cast %190 : i32 to index
        %c0_147 = arith.constant 0 : index
        %c0_148 = arith.constant 0 : index
        %192 = vector.load %arg2[%c0_146, %191, %c0_147, %c0_148] : memref<1x16x16x4xbf16, #tpu.memory_space<vmem>>, vector<1x1x16x4xbf16>
        %193 = vector.shape_cast %192 : vector<1x1x16x4xbf16> to vector<1x16x4xbf16>
        %c3 = arith.constant 3 : index
        %c1_149 = arith.constant 1 : index
        %c0_150 = arith.constant 0 : index
        %194 = vector.load %arg6[%c3, %c1_149, %c0_150] : memref<18x18x4xbf16, #tpu.memory_space<vmem>>, vector<1x16x4xbf16>
        tpu.vector_store %arg6[%c3, %c1_149, %c0_150], %193 {strides = array<i32>} : memref<18x18x4xbf16, #tpu.memory_space<vmem>>, vector<1x16x4xbf16>,
      } else {
      }
      %c2_i32_77 = arith.constant 2 : i32
      %82 = arith.addi %0, %c2_i32_77 : i32
      %c16_i32_78 = arith.constant 16 : i32
      %83 = arith.cmpi sge, %82, %c16_i32_78 : i32
      %84 = arith.extui %83 : i1 to i32
      %c0_i32_79 = arith.constant 0 : i32
      %85 = arith.cmpi ne, %84, %c0_i32_79 : i32
      scf.if %85 {
        %c3 = arith.constant 3 : index
        %c1_145 = arith.constant 1 : index
        %c0_146 = arith.constant 0 : index
        %190 = vector.load %arg6[%c3, %c1_145, %c0_146] : memref<18x18x4xbf16, #tpu.memory_space<vmem>>, vector<1x16x4xbf16>
        tpu.vector_store %arg6[%c3, %c1_145, %c0_146], %1 {strides = array<i32>} : memref<18x18x4xbf16, #tpu.memory_space<vmem>>, vector<1x16x4xbf16>,
      } else {
      }
      %c3_i32 = arith.constant 3 : i32
      %86 = arith.addi %0, %c3_i32 : i32
      %c16_i32_80 = arith.constant 16 : i32
      %87 = arith.cmpi slt, %86, %c16_i32_80 : i32
      %88 = arith.extui %87 : i1 to i32
      %c0_i32_81 = arith.constant 0 : i32
      %89 = arith.cmpi ne, %88, %c0_i32_81 : i32
      scf.if %89 {
        %c3_i32_145 = arith.constant 3 : i32
        %190 = arith.addi %0, %c3_i32_145 : i32
        %c0_146 = arith.constant 0 : index
        %191 = arith.index_cast %190 : i32 to index
        %c0_147 = arith.constant 0 : index
        %c0_148 = arith.constant 0 : index
        %192 = vector.load %arg2[%c0_146, %191, %c0_147, %c0_148] : memref<1x16x16x4xbf16, #tpu.memory_space<vmem>>, vector<1x1x16x4xbf16>
        %193 = vector.shape_cast %192 : vector<1x1x16x4xbf16> to vector<1x16x4xbf16>
        %c4_149 = arith.constant 4 : index
        %c1_150 = arith.constant 1 : index
        %c0_151 = arith.constant 0 : index
        %194 = vector.load %arg6[%c4_149, %c1_150, %c0_151] : memref<18x18x4xbf16, #tpu.memory_space<vmem>>, vector<1x16x4xbf16>
        tpu.vector_store %arg6[%c4_149, %c1_150, %c0_151], %193 {strides = array<i32>} : memref<18x18x4xbf16, #tpu.memory_space<vmem>>, vector<1x16x4xbf16>,
      } else {
      }
      %c3_i32_82 = arith.constant 3 : i32
      %90 = arith.addi %0, %c3_i32_82 : i32
      %c16_i32_83 = arith.constant 16 : i32
      %91 = arith.cmpi sge, %90, %c16_i32_83 : i32
      %92 = arith.extui %91 : i1 to i32
      %c0_i32_84 = arith.constant 0 : i32
      %93 = arith.cmpi ne, %92, %c0_i32_84 : i32
      scf.if %93 {
        %c4_145 = arith.constant 4 : index
        %c1_146 = arith.constant 1 : index
        %c0_147 = arith.constant 0 : index
        %190 = vector.load %arg6[%c4_145, %c1_146, %c0_147] : memref<18x18x4xbf16, #tpu.memory_space<vmem>>, vector<1x16x4xbf16>
        tpu.vector_store %arg6[%c4_145, %c1_146, %c0_147], %1 {strides = array<i32>} : memref<18x18x4xbf16, #tpu.memory_space<vmem>>, vector<1x16x4xbf16>,
      } else {
      }
      %c4_i32 = arith.constant 4 : i32
      %94 = arith.addi %0, %c4_i32 : i32
      %c16_i32_85 = arith.constant 16 : i32
      %95 = arith.cmpi slt, %94, %c16_i32_85 : i32
      %96 = arith.extui %95 : i1 to i32
      %c0_i32_86 = arith.constant 0 : i32
      %97 = arith.cmpi ne, %96, %c0_i32_86 : i32
      scf.if %97 {
        %c4_i32_145 = arith.constant 4 : i32
        %190 = arith.addi %0, %c4_i32_145 : i32
        %c0_146 = arith.constant 0 : index
        %191 = arith.index_cast %190 : i32 to index
        %c0_147 = arith.constant 0 : index
        %c0_148 = arith.constant 0 : index
        %192 = vector.load %arg2[%c0_146, %191, %c0_147, %c0_148] : memref<1x16x16x4xbf16, #tpu.memory_space<vmem>>, vector<1x1x16x4xbf16>
        %193 = vector.shape_cast %192 : vector<1x1x16x4xbf16> to vector<1x16x4xbf16>
        %c5 = arith.constant 5 : index
        %c1_149 = arith.constant 1 : index
        %c0_150 = arith.constant 0 : index
        %194 = vector.load %arg6[%c5, %c1_149, %c0_150] : memref<18x18x4xbf16, #tpu.memory_space<vmem>>, vector<1x16x4xbf16>
        tpu.vector_store %arg6[%c5, %c1_149, %c0_150], %193 {strides = array<i32>} : memref<18x18x4xbf16, #tpu.memory_space<vmem>>, vector<1x16x4xbf16>,
      } else {
      }
      %c4_i32_87 = arith.constant 4 : i32
      %98 = arith.addi %0, %c4_i32_87 : i32
      %c16_i32_88 = arith.constant 16 : i32
      %99 = arith.cmpi sge, %98, %c16_i32_88 : i32
      %100 = arith.extui %99 : i1 to i32
      %c0_i32_89 = arith.constant 0 : i32
      %101 = arith.cmpi ne, %100, %c0_i32_89 : i32
      scf.if %101 {
        %c5 = arith.constant 5 : index
        %c1_145 = arith.constant 1 : index
        %c0_146 = arith.constant 0 : index
        %190 = vector.load %arg6[%c5, %c1_145, %c0_146] : memref<18x18x4xbf16, #tpu.memory_space<vmem>>, vector<1x16x4xbf16>
        tpu.vector_store %arg6[%c5, %c1_145, %c0_146], %1 {strides = array<i32>} : memref<18x18x4xbf16, #tpu.memory_space<vmem>>, vector<1x16x4xbf16>,
      } else {
      }
      %c5_i32 = arith.constant 5 : i32
      %102 = arith.addi %0, %c5_i32 : i32
      %c16_i32_90 = arith.constant 16 : i32
      %103 = arith.cmpi slt, %102, %c16_i32_90 : i32
      %104 = arith.extui %103 : i1 to i32
      %c0_i32_91 = arith.constant 0 : i32
      %105 = arith.cmpi ne, %104, %c0_i32_91 : i32
      scf.if %105 {
        %c5_i32_145 = arith.constant 5 : i32
        %190 = arith.addi %0, %c5_i32_145 : i32
        %c0_146 = arith.constant 0 : index
        %191 = arith.index_cast %190 : i32 to index
        %c0_147 = arith.constant 0 : index
        %c0_148 = arith.constant 0 : index
        %192 = vector.load %arg2[%c0_146, %191, %c0_147, %c0_148] : memref<1x16x16x4xbf16, #tpu.memory_space<vmem>>, vector<1x1x16x4xbf16>
        %193 = vector.shape_cast %192 : vector<1x1x16x4xbf16> to vector<1x16x4xbf16>
        %c6 = arith.constant 6 : index
        %c1_149 = arith.constant 1 : index
        %c0_150 = arith.constant 0 : index
        %194 = vector.load %arg6[%c6, %c1_149, %c0_150] : memref<18x18x4xbf16, #tpu.memory_space<vmem>>, vector<1x16x4xbf16>
        tpu.vector_store %arg6[%c6, %c1_149, %c0_150], %193 {strides = array<i32>} : memref<18x18x4xbf16, #tpu.memory_space<vmem>>, vector<1x16x4xbf16>,
      } else {
      }
      %c5_i32_92 = arith.constant 5 : i32
      %106 = arith.addi %0, %c5_i32_92 : i32
      %c16_i32_93 = arith.constant 16 : i32
      %107 = arith.cmpi sge, %106, %c16_i32_93 : i32
      %108 = arith.extui %107 : i1 to i32
      %c0_i32_94 = arith.constant 0 : i32
      %109 = arith.cmpi ne, %108, %c0_i32_94 : i32
      scf.if %109 {
        %c6 = arith.constant 6 : index
        %c1_145 = arith.constant 1 : index
        %c0_146 = arith.constant 0 : index
        %190 = vector.load %arg6[%c6, %c1_145, %c0_146] : memref<18x18x4xbf16, #tpu.memory_space<vmem>>, vector<1x16x4xbf16>
        tpu.vector_store %arg6[%c6, %c1_145, %c0_146], %1 {strides = array<i32>} : memref<18x18x4xbf16, #tpu.memory_space<vmem>>, vector<1x16x4xbf16>,
      } else {
      }
      %c6_i32 = arith.constant 6 : i32
      %110 = arith.addi %0, %c6_i32 : i32
      %c16_i32_95 = arith.constant 16 : i32
      %111 = arith.cmpi slt, %110, %c16_i32_95 : i32
      %112 = arith.extui %111 : i1 to i32
      %c0_i32_96 = arith.constant 0 : i32
      %113 = arith.cmpi ne, %112, %c0_i32_96 : i32
      scf.if %113 {
        %c6_i32_145 = arith.constant 6 : i32
        %190 = arith.addi %0, %c6_i32_145 : i32
        %c0_146 = arith.constant 0 : index
        %191 = arith.index_cast %190 : i32 to index
        %c0_147 = arith.constant 0 : index
        %c0_148 = arith.constant 0 : index
        %192 = vector.load %arg2[%c0_146, %191, %c0_147, %c0_148] : memref<1x16x16x4xbf16, #tpu.memory_space<vmem>>, vector<1x1x16x4xbf16>
        %193 = vector.shape_cast %192 : vector<1x1x16x4xbf16> to vector<1x16x4xbf16>
        %c7 = arith.constant 7 : index
        %c1_149 = arith.constant 1 : index
        %c0_150 = arith.constant 0 : index
        %194 = vector.load %arg6[%c7, %c1_149, %c0_150] : memref<18x18x4xbf16, #tpu.memory_space<vmem>>, vector<1x16x4xbf16>
        tpu.vector_store %arg6[%c7, %c1_149, %c0_150], %193 {strides = array<i32>} : memref<18x18x4xbf16, #tpu.memory_space<vmem>>, vector<1x16x4xbf16>,
      } else {
      }
      %c6_i32_97 = arith.constant 6 : i32
      %114 = arith.addi %0, %c6_i32_97 : i32
      %c16_i32_98 = arith.constant 16 : i32
      %115 = arith.cmpi sge, %114, %c16_i32_98 : i32
      %116 = arith.extui %115 : i1 to i32
      %c0_i32_99 = arith.constant 0 : i32
      %117 = arith.cmpi ne, %116, %c0_i32_99 : i32
      scf.if %117 {
        %c7 = arith.constant 7 : index
        %c1_145 = arith.constant 1 : index
        %c0_146 = arith.constant 0 : index
        %190 = vector.load %arg6[%c7, %c1_145, %c0_146] : memref<18x18x4xbf16, #tpu.memory_space<vmem>>, vector<1x16x4xbf16>
        tpu.vector_store %arg6[%c7, %c1_145, %c0_146], %1 {strides = array<i32>} : memref<18x18x4xbf16, #tpu.memory_space<vmem>>, vector<1x16x4xbf16>,
      } else {
      }
      %c7_i32 = arith.constant 7 : i32
      %118 = arith.addi %0, %c7_i32 : i32
      %c16_i32_100 = arith.constant 16 : i32
      %119 = arith.cmpi slt, %118, %c16_i32_100 : i32
      %120 = arith.extui %119 : i1 to i32
      %c0_i32_101 = arith.constant 0 : i32
      %121 = arith.cmpi ne, %120, %c0_i32_101 : i32
      scf.if %121 {
        %c7_i32_145 = arith.constant 7 : i32
        %190 = arith.addi %0, %c7_i32_145 : i32
        %c0_146 = arith.constant 0 : index
        %191 = arith.index_cast %190 : i32 to index
        %c0_147 = arith.constant 0 : index
        %c0_148 = arith.constant 0 : index
        %192 = vector.load %arg2[%c0_146, %191, %c0_147, %c0_148] : memref<1x16x16x4xbf16, #tpu.memory_space<vmem>>, vector<1x1x16x4xbf16>
        %193 = vector.shape_cast %192 : vector<1x1x16x4xbf16> to vector<1x16x4xbf16>
        %c8_149 = arith.constant 8 : index
        %c1_150 = arith.constant 1 : index
        %c0_151 = arith.constant 0 : index
        %194 = vector.load %arg6[%c8_149, %c1_150, %c0_151] : memref<18x18x4xbf16, #tpu.memory_space<vmem>>, vector<1x16x4xbf16>
        tpu.vector_store %arg6[%c8_149, %c1_150, %c0_151], %193 {strides = array<i32>} : memref<18x18x4xbf16, #tpu.memory_space<vmem>>, vector<1x16x4xbf16>,
      } else {
      }
      %c7_i32_102 = arith.constant 7 : i32
      %122 = arith.addi %0, %c7_i32_102 : i32
      %c16_i32_103 = arith.constant 16 : i32
      %123 = arith.cmpi sge, %122, %c16_i32_103 : i32
      %124 = arith.extui %123 : i1 to i32
      %c0_i32_104 = arith.constant 0 : i32
      %125 = arith.cmpi ne, %124, %c0_i32_104 : i32
      scf.if %125 {
        %c8_145 = arith.constant 8 : index
        %c1_146 = arith.constant 1 : index
        %c0_147 = arith.constant 0 : index
        %190 = vector.load %arg6[%c8_145, %c1_146, %c0_147] : memref<18x18x4xbf16, #tpu.memory_space<vmem>>, vector<1x16x4xbf16>
        tpu.vector_store %arg6[%c8_145, %c1_146, %c0_147], %1 {strides = array<i32>} : memref<18x18x4xbf16, #tpu.memory_space<vmem>>, vector<1x16x4xbf16>,
      } else {
      }
      %c8_i32 = arith.constant 8 : i32
      %126 = arith.addi %0, %c8_i32 : i32
      %c16_i32_105 = arith.constant 16 : i32
      %127 = arith.cmpi slt, %126, %c16_i32_105 : i32
      %128 = arith.extui %127 : i1 to i32
      %c0_i32_106 = arith.constant 0 : i32
      %129 = arith.cmpi ne, %128, %c0_i32_106 : i32
      scf.if %129 {
        %c8_i32_145 = arith.constant 8 : i32
        %190 = arith.addi %0, %c8_i32_145 : i32
        %c0_146 = arith.constant 0 : index
        %191 = arith.index_cast %190 : i32 to index
        %c0_147 = arith.constant 0 : index
        %c0_148 = arith.constant 0 : index
        %192 = vector.load %arg2[%c0_146, %191, %c0_147, %c0_148] : memref<1x16x16x4xbf16, #tpu.memory_space<vmem>>, vector<1x1x16x4xbf16>
        %193 = vector.shape_cast %192 : vector<1x1x16x4xbf16> to vector<1x16x4xbf16>
        %c9 = arith.constant 9 : index
        %c1_149 = arith.constant 1 : index
        %c0_150 = arith.constant 0 : index
        %194 = vector.load %arg6[%c9, %c1_149, %c0_150] : memref<18x18x4xbf16, #tpu.memory_space<vmem>>, vector<1x16x4xbf16>
        tpu.vector_store %arg6[%c9, %c1_149, %c0_150], %193 {strides = array<i32>} : memref<18x18x4xbf16, #tpu.memory_space<vmem>>, vector<1x16x4xbf16>,
      } else {
      }
      %c8_i32_107 = arith.constant 8 : i32
      %130 = arith.addi %0, %c8_i32_107 : i32
      %c16_i32_108 = arith.constant 16 : i32
      %131 = arith.cmpi sge, %130, %c16_i32_108 : i32
      %132 = arith.extui %131 : i1 to i32
      %c0_i32_109 = arith.constant 0 : i32
      %133 = arith.cmpi ne, %132, %c0_i32_109 : i32
      scf.if %133 {
        %c9 = arith.constant 9 : index
        %c1_145 = arith.constant 1 : index
        %c0_146 = arith.constant 0 : index
        %190 = vector.load %arg6[%c9, %c1_145, %c0_146] : memref<18x18x4xbf16, #tpu.memory_space<vmem>>, vector<1x16x4xbf16>
        tpu.vector_store %arg6[%c9, %c1_145, %c0_146], %1 {strides = array<i32>} : memref<18x18x4xbf16, #tpu.memory_space<vmem>>, vector<1x16x4xbf16>,
      } else {
      }
      %c9_i32 = arith.constant 9 : i32
      %134 = arith.addi %0, %c9_i32 : i32
      %c16_i32_110 = arith.constant 16 : i32
      %135 = arith.cmpi slt, %134, %c16_i32_110 : i32
      %136 = arith.extui %135 : i1 to i32
      %c0_i32_111 = arith.constant 0 : i32
      %137 = arith.cmpi ne, %136, %c0_i32_111 : i32
      scf.if %137 {
        %c9_i32_145 = arith.constant 9 : i32
        %190 = arith.addi %0, %c9_i32_145 : i32
        %c0_146 = arith.constant 0 : index
        %191 = arith.index_cast %190 : i32 to index
        %c0_147 = arith.constant 0 : index
        %c0_148 = arith.constant 0 : index
        %192 = vector.load %arg2[%c0_146, %191, %c0_147, %c0_148] : memref<1x16x16x4xbf16, #tpu.memory_space<vmem>>, vector<1x1x16x4xbf16>
        %193 = vector.shape_cast %192 : vector<1x1x16x4xbf16> to vector<1x16x4xbf16>
        %c10 = arith.constant 10 : index
        %c1_149 = arith.constant 1 : index
        %c0_150 = arith.constant 0 : index
        %194 = vector.load %arg6[%c10, %c1_149, %c0_150] : memref<18x18x4xbf16, #tpu.memory_space<vmem>>, vector<1x16x4xbf16>
        tpu.vector_store %arg6[%c10, %c1_149, %c0_150], %193 {strides = array<i32>} : memref<18x18x4xbf16, #tpu.memory_space<vmem>>, vector<1x16x4xbf16>,
      } else {
      }
      %c9_i32_112 = arith.constant 9 : i32
      %138 = arith.addi %0, %c9_i32_112 : i32
      %c16_i32_113 = arith.constant 16 : i32
      %139 = arith.cmpi sge, %138, %c16_i32_113 : i32
      %140 = arith.extui %139 : i1 to i32
      %c0_i32_114 = arith.constant 0 : i32
      %141 = arith.cmpi ne, %140, %c0_i32_114 : i32
      scf.if %141 {
        %c10 = arith.constant 10 : index
        %c1_145 = arith.constant 1 : index
        %c0_146 = arith.constant 0 : index
        %190 = vector.load %arg6[%c10, %c1_145, %c0_146] : memref<18x18x4xbf16, #tpu.memory_space<vmem>>, vector<1x16x4xbf16>
        tpu.vector_store %arg6[%c10, %c1_145, %c0_146], %1 {strides = array<i32>} : memref<18x18x4xbf16, #tpu.memory_space<vmem>>, vector<1x16x4xbf16>,
      } else {
      }
      %c10_i32 = arith.constant 10 : i32
      %142 = arith.addi %0, %c10_i32 : i32
      %c16_i32_115 = arith.constant 16 : i32
      %143 = arith.cmpi slt, %142, %c16_i32_115 : i32
      %144 = arith.extui %143 : i1 to i32
      %c0_i32_116 = arith.constant 0 : i32
      %145 = arith.cmpi ne, %144, %c0_i32_116 : i32
      scf.if %145 {
        %c10_i32_145 = arith.constant 10 : i32
        %190 = arith.addi %0, %c10_i32_145 : i32
        %c0_146 = arith.constant 0 : index
        %191 = arith.index_cast %190 : i32 to index
        %c0_147 = arith.constant 0 : index
        %c0_148 = arith.constant 0 : index
        %192 = vector.load %arg2[%c0_146, %191, %c0_147, %c0_148] : memref<1x16x16x4xbf16, #tpu.memory_space<vmem>>, vector<1x1x16x4xbf16>
        %193 = vector.shape_cast %192 : vector<1x1x16x4xbf16> to vector<1x16x4xbf16>
        %c11 = arith.constant 11 : index
        %c1_149 = arith.constant 1 : index
        %c0_150 = arith.constant 0 : index
        %194 = vector.load %arg6[%c11, %c1_149, %c0_150] : memref<18x18x4xbf16, #tpu.memory_space<vmem>>, vector<1x16x4xbf16>
        tpu.vector_store %arg6[%c11, %c1_149, %c0_150], %193 {strides = array<i32>} : memref<18x18x4xbf16, #tpu.memory_space<vmem>>, vector<1x16x4xbf16>,
      } else {
      }
      %c10_i32_117 = arith.constant 10 : i32
      %146 = arith.addi %0, %c10_i32_117 : i32
      %c16_i32_118 = arith.constant 16 : i32
      %147 = arith.cmpi sge, %146, %c16_i32_118 : i32
      %148 = arith.extui %147 : i1 to i32
      %c0_i32_119 = arith.constant 0 : i32
      %149 = arith.cmpi ne, %148, %c0_i32_119 : i32
      scf.if %149 {
        %c11 = arith.constant 11 : index
        %c1_145 = arith.constant 1 : index
        %c0_146 = arith.constant 0 : index
        %190 = vector.load %arg6[%c11, %c1_145, %c0_146] : memref<18x18x4xbf16, #tpu.memory_space<vmem>>, vector<1x16x4xbf16>
        tpu.vector_store %arg6[%c11, %c1_145, %c0_146], %1 {strides = array<i32>} : memref<18x18x4xbf16, #tpu.memory_space<vmem>>, vector<1x16x4xbf16>,
      } else {
      }
      %c11_i32 = arith.constant 11 : i32
      %150 = arith.addi %0, %c11_i32 : i32
      %c16_i32_120 = arith.constant 16 : i32
      %151 = arith.cmpi slt, %150, %c16_i32_120 : i32
      %152 = arith.extui %151 : i1 to i32
      %c0_i32_121 = arith.constant 0 : i32
      %153 = arith.cmpi ne, %152, %c0_i32_121 : i32
      scf.if %153 {
        %c11_i32_145 = arith.constant 11 : i32
        %190 = arith.addi %0, %c11_i32_145 : i32
        %c0_146 = arith.constant 0 : index
        %191 = arith.index_cast %190 : i32 to index
        %c0_147 = arith.constant 0 : index
        %c0_148 = arith.constant 0 : index
        %192 = vector.load %arg2[%c0_146, %191, %c0_147, %c0_148] : memref<1x16x16x4xbf16, #tpu.memory_space<vmem>>, vector<1x1x16x4xbf16>
        %193 = vector.shape_cast %192 : vector<1x1x16x4xbf16> to vector<1x16x4xbf16>
        %c12_149 = arith.constant 12 : index
        %c1_150 = arith.constant 1 : index
        %c0_151 = arith.constant 0 : index
        %194 = vector.load %arg6[%c12_149, %c1_150, %c0_151] : memref<18x18x4xbf16, #tpu.memory_space<vmem>>, vector<1x16x4xbf16>
        tpu.vector_store %arg6[%c12_149, %c1_150, %c0_151], %193 {strides = array<i32>} : memref<18x18x4xbf16, #tpu.memory_space<vmem>>, vector<1x16x4xbf16>,
      } else {
      }
      %c11_i32_122 = arith.constant 11 : i32
      %154 = arith.addi %0, %c11_i32_122 : i32
      %c16_i32_123 = arith.constant 16 : i32
      %155 = arith.cmpi sge, %154, %c16_i32_123 : i32
      %156 = arith.extui %155 : i1 to i32
      %c0_i32_124 = arith.constant 0 : i32
      %157 = arith.cmpi ne, %156, %c0_i32_124 : i32
      scf.if %157 {
        %c12_145 = arith.constant 12 : index
        %c1_146 = arith.constant 1 : index
        %c0_147 = arith.constant 0 : index
        %190 = vector.load %arg6[%c12_145, %c1_146, %c0_147] : memref<18x18x4xbf16, #tpu.memory_space<vmem>>, vector<1x16x4xbf16>
        tpu.vector_store %arg6[%c12_145, %c1_146, %c0_147], %1 {strides = array<i32>} : memref<18x18x4xbf16, #tpu.memory_space<vmem>>, vector<1x16x4xbf16>,
      } else {
      }
      %c12_i32 = arith.constant 12 : i32
      %158 = arith.addi %0, %c12_i32 : i32
      %c16_i32_125 = arith.constant 16 : i32
      %159 = arith.cmpi slt, %158, %c16_i32_125 : i32
      %160 = arith.extui %159 : i1 to i32
      %c0_i32_126 = arith.constant 0 : i32
      %161 = arith.cmpi ne, %160, %c0_i32_126 : i32
      scf.if %161 {
        %c12_i32_145 = arith.constant 12 : i32
        %190 = arith.addi %0, %c12_i32_145 : i32
        %c0_146 = arith.constant 0 : index
        %191 = arith.index_cast %190 : i32 to index
        %c0_147 = arith.constant 0 : index
        %c0_148 = arith.constant 0 : index
        %192 = vector.load %arg2[%c0_146, %191, %c0_147, %c0_148] : memref<1x16x16x4xbf16, #tpu.memory_space<vmem>>, vector<1x1x16x4xbf16>
        %193 = vector.shape_cast %192 : vector<1x1x16x4xbf16> to vector<1x16x4xbf16>
        %c13 = arith.constant 13 : index
        %c1_149 = arith.constant 1 : index
        %c0_150 = arith.constant 0 : index
        %194 = vector.load %arg6[%c13, %c1_149, %c0_150] : memref<18x18x4xbf16, #tpu.memory_space<vmem>>, vector<1x16x4xbf16>
        tpu.vector_store %arg6[%c13, %c1_149, %c0_150], %193 {strides = array<i32>} : memref<18x18x4xbf16, #tpu.memory_space<vmem>>, vector<1x16x4xbf16>,
      } else {
      }
      %c12_i32_127 = arith.constant 12 : i32
      %162 = arith.addi %0, %c12_i32_127 : i32
      %c16_i32_128 = arith.constant 16 : i32
      %163 = arith.cmpi sge, %162, %c16_i32_128 : i32
      %164 = arith.extui %163 : i1 to i32
      %c0_i32_129 = arith.constant 0 : i32
      %165 = arith.cmpi ne, %164, %c0_i32_129 : i32
      scf.if %165 {
        %c13 = arith.constant 13 : index
        %c1_145 = arith.constant 1 : index
        %c0_146 = arith.constant 0 : index
        %190 = vector.load %arg6[%c13, %c1_145, %c0_146] : memref<18x18x4xbf16, #tpu.memory_space<vmem>>, vector<1x16x4xbf16>
        tpu.vector_store %arg6[%c13, %c1_145, %c0_146], %1 {strides = array<i32>} : memref<18x18x4xbf16, #tpu.memory_space<vmem>>, vector<1x16x4xbf16>,
      } else {
      }
      %c13_i32 = arith.constant 13 : i32
      %166 = arith.addi %0, %c13_i32 : i32
      %c16_i32_130 = arith.constant 16 : i32
      %167 = arith.cmpi slt, %166, %c16_i32_130 : i32
      %168 = arith.extui %167 : i1 to i32
      %c0_i32_131 = arith.constant 0 : i32
      %169 = arith.cmpi ne, %168, %c0_i32_131 : i32
      scf.if %169 {
        %c13_i32_145 = arith.constant 13 : i32
        %190 = arith.addi %0, %c13_i32_145 : i32
        %c0_146 = arith.constant 0 : index
        %191 = arith.index_cast %190 : i32 to index
        %c0_147 = arith.constant 0 : index
        %c0_148 = arith.constant 0 : index
        %192 = vector.load %arg2[%c0_146, %191, %c0_147, %c0_148] : memref<1x16x16x4xbf16, #tpu.memory_space<vmem>>, vector<1x1x16x4xbf16>
        %193 = vector.shape_cast %192 : vector<1x1x16x4xbf16> to vector<1x16x4xbf16>
        %c14 = arith.constant 14 : index
        %c1_149 = arith.constant 1 : index
        %c0_150 = arith.constant 0 : index
        %194 = vector.load %arg6[%c14, %c1_149, %c0_150] : memref<18x18x4xbf16, #tpu.memory_space<vmem>>, vector<1x16x4xbf16>
        tpu.vector_store %arg6[%c14, %c1_149, %c0_150], %193 {strides = array<i32>} : memref<18x18x4xbf16, #tpu.memory_space<vmem>>, vector<1x16x4xbf16>,
      } else {
      }
      %c13_i32_132 = arith.constant 13 : i32
      %170 = arith.addi %0, %c13_i32_132 : i32
      %c16_i32_133 = arith.constant 16 : i32
      %171 = arith.cmpi sge, %170, %c16_i32_133 : i32
      %172 = arith.extui %171 : i1 to i32
      %c0_i32_134 = arith.constant 0 : i32
      %173 = arith.cmpi ne, %172, %c0_i32_134 : i32
      scf.if %173 {
        %c14 = arith.constant 14 : index
        %c1_145 = arith.constant 1 : index
        %c0_146 = arith.constant 0 : index
        %190 = vector.load %arg6[%c14, %c1_145, %c0_146] : memref<18x18x4xbf16, #tpu.memory_space<vmem>>, vector<1x16x4xbf16>
        tpu.vector_store %arg6[%c14, %c1_145, %c0_146], %1 {strides = array<i32>} : memref<18x18x4xbf16, #tpu.memory_space<vmem>>, vector<1x16x4xbf16>,
      } else {
      }
      %c14_i32 = arith.constant 14 : i32
      %174 = arith.addi %0, %c14_i32 : i32
      %c16_i32_135 = arith.constant 16 : i32
      %175 = arith.cmpi slt, %174, %c16_i32_135 : i32
      %176 = arith.extui %175 : i1 to i32
      %c0_i32_136 = arith.constant 0 : i32
      %177 = arith.cmpi ne, %176, %c0_i32_136 : i32
      scf.if %177 {
        %c14_i32_145 = arith.constant 14 : i32
        %190 = arith.addi %0, %c14_i32_145 : i32
        %c0_146 = arith.constant 0 : index
        %191 = arith.index_cast %190 : i32 to index
        %c0_147 = arith.constant 0 : index
        %c0_148 = arith.constant 0 : index
        %192 = vector.load %arg2[%c0_146, %191, %c0_147, %c0_148] : memref<1x16x16x4xbf16, #tpu.memory_space<vmem>>, vector<1x1x16x4xbf16>
        %193 = vector.shape_cast %192 : vector<1x1x16x4xbf16> to vector<1x16x4xbf16>
        %c15 = arith.constant 15 : index
        %c1_149 = arith.constant 1 : index
        %c0_150 = arith.constant 0 : index
        %194 = vector.load %arg6[%c15, %c1_149, %c0_150] : memref<18x18x4xbf16, #tpu.memory_space<vmem>>, vector<1x16x4xbf16>
        tpu.vector_store %arg6[%c15, %c1_149, %c0_150], %193 {strides = array<i32>} : memref<18x18x4xbf16, #tpu.memory_space<vmem>>, vector<1x16x4xbf16>,
      } else {
      }
      %c14_i32_137 = arith.constant 14 : i32
      %178 = arith.addi %0, %c14_i32_137 : i32
      %c16_i32_138 = arith.constant 16 : i32
      %179 = arith.cmpi sge, %178, %c16_i32_138 : i32
      %180 = arith.extui %179 : i1 to i32
      %c0_i32_139 = arith.constant 0 : i32
      %181 = arith.cmpi ne, %180, %c0_i32_139 : i32
      scf.if %181 {
        %c15 = arith.constant 15 : index
        %c1_145 = arith.constant 1 : index
        %c0_146 = arith.constant 0 : index
        %190 = vector.load %arg6[%c15, %c1_145, %c0_146] : memref<18x18x4xbf16, #tpu.memory_space<vmem>>, vector<1x16x4xbf16>
        tpu.vector_store %arg6[%c15, %c1_145, %c0_146], %1 {strides = array<i32>} : memref<18x18x4xbf16, #tpu.memory_space<vmem>>, vector<1x16x4xbf16>,
      } else {
      }
      %c15_i32 = arith.constant 15 : i32
      %182 = arith.addi %0, %c15_i32 : i32
      %c16_i32_140 = arith.constant 16 : i32
      %183 = arith.cmpi slt, %182, %c16_i32_140 : i32
      %184 = arith.extui %183 : i1 to i32
      %c0_i32_141 = arith.constant 0 : i32
      %185 = arith.cmpi ne, %184, %c0_i32_141 : i32
      scf.if %185 {
        %c15_i32_145 = arith.constant 15 : i32
        %190 = arith.addi %0, %c15_i32_145 : i32
        %c0_146 = arith.constant 0 : index
        %191 = arith.index_cast %190 : i32 to index
        %c0_147 = arith.constant 0 : index
        %c0_148 = arith.constant 0 : index
        %192 = vector.load %arg2[%c0_146, %191, %c0_147, %c0_148] : memref<1x16x16x4xbf16, #tpu.memory_space<vmem>>, vector<1x1x16x4xbf16>
        %193 = vector.shape_cast %192 : vector<1x1x16x4xbf16> to vector<1x16x4xbf16>
        %c16_149 = arith.constant 16 : index
        %c1_150 = arith.constant 1 : index
        %c0_151 = arith.constant 0 : index
        %194 = vector.load %arg6[%c16_149, %c1_150, %c0_151] : memref<18x18x4xbf16, #tpu.memory_space<vmem>>, vector<1x16x4xbf16>
        tpu.vector_store %arg6[%c16_149, %c1_150, %c0_151], %193 {strides = array<i32>} : memref<18x18x4xbf16, #tpu.memory_space<vmem>>, vector<1x16x4xbf16>,
      } else {
      }
      %c15_i32_142 = arith.constant 15 : i32
      %186 = arith.addi %0, %c15_i32_142 : i32
      %c16_i32_143 = arith.constant 16 : i32
      %187 = arith.cmpi sge, %186, %c16_i32_143 : i32
      %188 = arith.extui %187 : i1 to i32
      %c0_i32_144 = arith.constant 0 : i32
      %189 = arith.cmpi ne, %188, %c0_i32_144 : i32
      scf.if %189 {
        %c16_145 = arith.constant 16 : index
        %c1_146 = arith.constant 1 : index
        %c0_147 = arith.constant 0 : index
        %190 = vector.load %arg6[%c16_145, %c1_146, %c0_147] : memref<18x18x4xbf16, #tpu.memory_space<vmem>>, vector<1x16x4xbf16>
        tpu.vector_store %arg6[%c16_145, %c1_146, %c0_147], %1 {strides = array<i32>} : memref<18x18x4xbf16, #tpu.memory_space<vmem>>, vector<1x16x4xbf16>,
      } else {
      }
    } else {
    }
    %c16_i32_14 = arith.constant 16 : i32
    %19 = arith.addi %0, %c16_i32_14 : i32
    %c16_i32_15 = arith.constant 16 : i32
    %20 = arith.cmpi slt, %19, %c16_i32_15 : i32
    %21 = arith.extui %20 : i1 to i32
    %c0_i32_16 = arith.constant 0 : i32
    %22 = arith.cmpi ne, %21, %c0_i32_16 : i32
    scf.if %22 {
      %c0_64 = arith.constant 0 : index
      %62 = arith.index_cast %19 : i32 to index
      %c0_65 = arith.constant 0 : index
      %c0_66 = arith.constant 0 : index
      %63 = vector.load %arg2[%c0_64, %62, %c0_65, %c0_66] : memref<1x16x16x4xbf16, #tpu.memory_space<vmem>>, vector<1x1x16x4xbf16>
      %64 = vector.shape_cast %63 : vector<1x1x16x4xbf16> to vector<1x16x4xbf16>
      %c17_67 = arith.constant 17 : index
      %c1_68 = arith.constant 1 : index
      %c0_69 = arith.constant 0 : index
      %65 = vector.load %arg6[%c17_67, %c1_68, %c0_69] : memref<18x18x4xbf16, #tpu.memory_space<vmem>>, vector<1x16x4xbf16>
      tpu.vector_store %arg6[%c17_67, %c1_68, %c0_69], %64 {strides = array<i32>} : memref<18x18x4xbf16, #tpu.memory_space<vmem>>, vector<1x16x4xbf16>,
    } else {
    }
    %c16_i32_17 = arith.constant 16 : i32
    %23 = arith.cmpi sge, %19, %c16_i32_17 : i32
    %24 = arith.extui %23 : i1 to i32
    %c0_i32_18 = arith.constant 0 : i32
    %25 = arith.cmpi ne, %24, %c0_i32_18 : i32
    scf.if %25 {
      %c17_64 = arith.constant 17 : index
      %c1_65 = arith.constant 1 : index
      %c0_66 = arith.constant 0 : index
      %62 = vector.load %arg6[%c17_64, %c1_65, %c0_66] : memref<18x18x4xbf16, #tpu.memory_space<vmem>>, vector<1x16x4xbf16>
      tpu.vector_store %arg6[%c17_64, %c1_65, %c0_66], %1 {strides = array<i32>} : memref<18x18x4xbf16, #tpu.memory_space<vmem>>, vector<1x16x4xbf16>,
    } else {
    }
    %c0_19 = arith.constant 0 : index
    %c0_20 = arith.constant 0 : index
    %c0_21 = arith.constant 0 : index
    %26 = vector.load %arg6[%c0_19, %c0_20, %c0_21] : memref<18x18x4xbf16, #tpu.memory_space<vmem>>, vector<16x16x4xbf16>
    %27 = vector.shape_cast %26 : vector<16x16x4xbf16> to vector<256x4xbf16>
    %c0_22 = arith.constant 0 : index
    %c0_23 = arith.constant 0 : index
    %28 = vector.load %arg7[%c0_22, %c0_23] : memref<256x36xbf16, #tpu.memory_space<vmem>>, vector<256x4xbf16>
    tpu.vector_store %arg7[%c0_22, %c0_23], %27 {strides = array<i32>} : memref<256x36xbf16, #tpu.memory_space<vmem>>, vector<256x4xbf16>,
    %c0_24 = arith.constant 0 : index
    %c1 = arith.constant 1 : index
    %c0_25 = arith.constant 0 : index
    %29 = vector.load %arg6[%c0_24, %c1, %c0_25] : memref<18x18x4xbf16, #tpu.memory_space<vmem>>, vector<16x16x4xbf16>
    %30 = vector.shape_cast %29 : vector<16x16x4xbf16> to vector<256x4xbf16>
    %c0_26 = arith.constant 0 : index
    %c4 = arith.constant 4 : index
    %31 = vector.load %arg7[%c0_26, %c4] : memref<256x36xbf16, #tpu.memory_space<vmem>>, vector<256x4xbf16>
    tpu.vector_store %arg7[%c0_26, %c4], %30 {strides = array<i32>} : memref<256x36xbf16, #tpu.memory_space<vmem>>, vector<256x4xbf16>,
    %c0_27 = arith.constant 0 : index
    %c2 = arith.constant 2 : index
    %c0_28 = arith.constant 0 : index
    %32 = vector.load %arg6[%c0_27, %c2, %c0_28] : memref<18x18x4xbf16, #tpu.memory_space<vmem>>, vector<16x16x4xbf16>
    %33 = vector.shape_cast %32 : vector<16x16x4xbf16> to vector<256x4xbf16>
    %c0_29 = arith.constant 0 : index
    %c8 = arith.constant 8 : index
    %34 = vector.load %arg7[%c0_29, %c8] : memref<256x36xbf16, #tpu.memory_space<vmem>>, vector<256x4xbf16>
    tpu.vector_store %arg7[%c0_29, %c8], %33 {strides = array<i32>} : memref<256x36xbf16, #tpu.memory_space<vmem>>, vector<256x4xbf16>,
    %c1_30 = arith.constant 1 : index
    %c0_31 = arith.constant 0 : index
    %c0_32 = arith.constant 0 : index
    %35 = vector.load %arg6[%c1_30, %c0_31, %c0_32] : memref<18x18x4xbf16, #tpu.memory_space<vmem>>, vector<16x16x4xbf16>
    %36 = vector.shape_cast %35 : vector<16x16x4xbf16> to vector<256x4xbf16>
    %c0_33 = arith.constant 0 : index
    %c12 = arith.constant 12 : index
    %37 = vector.load %arg7[%c0_33, %c12] : memref<256x36xbf16, #tpu.memory_space<vmem>>, vector<256x4xbf16>
    tpu.vector_store %arg7[%c0_33, %c12], %36 {strides = array<i32>} : memref<256x36xbf16, #tpu.memory_space<vmem>>, vector<256x4xbf16>,
    %c1_34 = arith.constant 1 : index
    %c1_35 = arith.constant 1 : index
    %c0_36 = arith.constant 0 : index
    %38 = vector.load %arg6[%c1_34, %c1_35, %c0_36] : memref<18x18x4xbf16, #tpu.memory_space<vmem>>, vector<16x16x4xbf16>
    %39 = vector.shape_cast %38 : vector<16x16x4xbf16> to vector<256x4xbf16>
    %c0_37 = arith.constant 0 : index
    %c16 = arith.constant 16 : index
    %40 = vector.load %arg7[%c0_37, %c16] : memref<256x36xbf16, #tpu.memory_space<vmem>>, vector<256x4xbf16>
    tpu.vector_store %arg7[%c0_37, %c16], %39 {strides = array<i32>} : memref<256x36xbf16, #tpu.memory_space<vmem>>, vector<256x4xbf16>,
    %c1_38 = arith.constant 1 : index
    %c2_39 = arith.constant 2 : index
    %c0_40 = arith.constant 0 : index
    %41 = vector.load %arg6[%c1_38, %c2_39, %c0_40] : memref<18x18x4xbf16, #tpu.memory_space<vmem>>, vector<16x16x4xbf16>
    %42 = vector.shape_cast %41 : vector<16x16x4xbf16> to vector<256x4xbf16>
    %c0_41 = arith.constant 0 : index
    %c20 = arith.constant 20 : index
    %43 = vector.load %arg7[%c0_41, %c20] : memref<256x36xbf16, #tpu.memory_space<vmem>>, vector<256x4xbf16>
    tpu.vector_store %arg7[%c0_41, %c20], %42 {strides = array<i32>} : memref<256x36xbf16, #tpu.memory_space<vmem>>, vector<256x4xbf16>,
    %c2_42 = arith.constant 2 : index
    %c0_43 = arith.constant 0 : index
    %c0_44 = arith.constant 0 : index
    %44 = vector.load %arg6[%c2_42, %c0_43, %c0_44] : memref<18x18x4xbf16, #tpu.memory_space<vmem>>, vector<16x16x4xbf16>
    %45 = vector.shape_cast %44 : vector<16x16x4xbf16> to vector<256x4xbf16>
    %c0_45 = arith.constant 0 : index
    %c24 = arith.constant 24 : index
    %46 = vector.load %arg7[%c0_45, %c24] : memref<256x36xbf16, #tpu.memory_space<vmem>>, vector<256x4xbf16>
    tpu.vector_store %arg7[%c0_45, %c24], %45 {strides = array<i32>} : memref<256x36xbf16, #tpu.memory_space<vmem>>, vector<256x4xbf16>,
    %c2_46 = arith.constant 2 : index
    %c1_47 = arith.constant 1 : index
    %c0_48 = arith.constant 0 : index
    %47 = vector.load %arg6[%c2_46, %c1_47, %c0_48] : memref<18x18x4xbf16, #tpu.memory_space<vmem>>, vector<16x16x4xbf16>
    %48 = vector.shape_cast %47 : vector<16x16x4xbf16> to vector<256x4xbf16>
    %c0_49 = arith.constant 0 : index
    %c28 = arith.constant 28 : index
    %49 = vector.load %arg7[%c0_49, %c28] : memref<256x36xbf16, #tpu.memory_space<vmem>>, vector<256x4xbf16>
    tpu.vector_store %arg7[%c0_49, %c28], %48 {strides = array<i32>} : memref<256x36xbf16, #tpu.memory_space<vmem>>, vector<256x4xbf16>,
    %c2_50 = arith.constant 2 : index
    %c2_51 = arith.constant 2 : index
    %c0_52 = arith.constant 0 : index
    %50 = vector.load %arg6[%c2_50, %c2_51, %c0_52] : memref<18x18x4xbf16, #tpu.memory_space<vmem>>, vector<16x16x4xbf16>
    %51 = vector.shape_cast %50 : vector<16x16x4xbf16> to vector<256x4xbf16>
    %c0_53 = arith.constant 0 : index
    %c32 = arith.constant 32 : index
    %52 = vector.load %arg7[%c0_53, %c32] : memref<256x36xbf16, #tpu.memory_space<vmem>>, vector<256x4xbf16>
    tpu.vector_store %arg7[%c0_53, %c32], %51 {strides = array<i32>} : memref<256x36xbf16, #tpu.memory_space<vmem>>, vector<256x4xbf16>,
    %c0_54 = arith.constant 0 : index
    %c0_55 = arith.constant 0 : index
    %53 = vector.load %arg7[%c0_54, %c0_55] : memref<256x36xbf16, #tpu.memory_space<vmem>>, vector<256x36xbf16>
    %c0_56 = arith.constant 0 : index
    %c0_57 = arith.constant 0 : index
    %54 = vector.load %arg3[%c0_56, %c0_57] : memref<36x128xbf16, #tpu.memory_space<vmem>>, vector<36x128xbf16>
    %cst_58 = arith.constant dense<0.000000e+00> : vector<256x128xf32>
    %55 = tpu.matmul %53, %54, %cst_58 {dimension_numbers = #tpu.dot_dimension_numbers<[1], [0], [0], [1], [0, 0, 1, 1], [], []>} : vector<256x36xbf16>, vector<36x128xbf16>, vector<256x128xf32> -> vector<256x128xf32>
    %c0_59 = arith.constant 0 : index
    %c0_60 = arith.constant 0 : index
    %56 = vector.load %arg4[%c0_59, %c0_60] : memref<1x128xf32, #tpu.memory_space<vmem>>, vector<1x128xf32>
    %57 = vector.broadcast %56 : vector<1x128xf32> to vector<256x128xf32>
    %58 = arith.addf %55, %57 : vector<256x128xf32>
    %c0_61 = arith.constant 0 : index
    %c0_62 = arith.constant 0 : index
    %c0_63 = arith.constant 0 : index
    %59 = vector.load %arg5[%c0_61, %c0_62, %c0_63] : memref<1x256x128xf32, #tpu.memory_space<vmem>>, vector<1x256x128xf32>
    %60 = vector.shape_cast %59 : vector<1x256x128xf32> to vector<256x128xf32>
    %61 = vector.shape_cast %58 : vector<256x128xf32> to vector<1x256x128xf32>
    tpu.vector_store %arg5[%c0_61, %c0_62, %c0_63], %61 {strides = array<i32>} : memref<1x256x128xf32, #tpu.memory_space<vmem>>, vector<1x256x128xf32>,
    return
  }
  func.func @transform_0(%arg0: i32, %arg1: i32) -> (i32, i32, i32, i32) {
    %c0_i32 = arith.constant 0 : i32
    %c0_i32_0 = arith.constant 0 : i32
    %c0_i32_1 = arith.constant 0 : i32
    %c0_i32_2 = arith.constant 0 : i32
    return %arg0, %c0_i32, %c0_i32_0, %c0_i32_1 : i32, i32, i32, i32
  }
  func.func @transform_1(%arg0: i32, %arg1: i32) -> (i32, i32) {
    %c0_i32 = arith.constant 0 : i32
    %c0_i32_0 = arith.constant 0 : i32
    %c0_i32_1 = arith.constant 0 : i32
    return %c0_i32, %c0_i32_0 : i32, i32
  }
  func.func @transform_2(%arg0: i32, %arg1: i32) -> (i32, i32) {
    %c0_i32 = arith.constant 0 : i32
    %c0_i32_0 = arith.constant 0 : i32
    %c0_i32_1 = arith.constant 0 : i32
    return %c0_i32, %c0_i32_0 : i32, i32
  }
  func.func @transform_3(%arg0: i32, %arg1: i32) -> (i32, i32, i32) {
    %c0_i32 = arith.constant 0 : i32
    %c0_i32_0 = arith.constant 0 : i32
    return %arg0, %arg1, %c0_i32 : i32, i32, i32
  }
}

</mosaic_0001>

<bundles_post_ra>
// kernel: tpu_custom_call.1
= control target key start
LH: loop header
LB: loop body
LE: loop exit
PB: predicated region body
PF: predicated region fallthrough
CT: control target
= control target key end

     0   :  { %8 = vsyncpa [#allocation5], 0  ;;  %s7507_s0 = inlined_call_operand.vmem [shape: bf16[2,16,16,4], index: 0, kind: input, shape index: {}]   ;;  %s7508_s1 = inlined_call_operand.vmem [shape: bf16[36,128], index: 1, kind: input, shape index: {}]   ;;  %s7509_s2 = inlined_call_operand.vmem [shape: f32[1,128], index: 2, kind: input, shape index: {}]   ;;  %s7510_s3 = inlined_call_operand.hbm [shape: f32[2,256,128], index: 3, kind: output, shape index: {}]  }
   0x1   :  { %10 = vsyncpa [#allocation5 + $0x1], 0  ;;  %s5910_s12 = smov 0   ;;  %s5912_s13 = smov 0  }
   0x2   :  { %s5914_s14 = smov 0   ;;  %s5916_s15 = smov 0  }
   0x3   :  { %s5918_s16 = smov 0   ;;  %s5920_s17 = smov 0  }
   0x4 LB: > { %s5518_s18 = sadd.s32 4294967295, %s5877_s17   ;;  %s5519_s19 = sadd.s32 4294967294, %s5877_s17   ;;  %s5877_s17 = sphi %s5920_s17, %s16_s17   ;;  %s5873_s16 = sphi %s5918_s16, %s7529_s16   ;;  %s5869_s15 = sphi %s5916_s15, %s7528_s15   ;;  %s5865_s14 = sphi %s5914_s14, %s7527_s14   ;;  %s5861_s13 = sphi %s5912_s13, %s7526_s13   ;;  %s5857_s12 = sphi %s5910_s12, %s7525_s12  }
   0x5   : > { %s28_s20 = sadd.s32 1, %s5873_s16  ;;  %s105_s21 = sadd.s32 1, %s5865_s14 }
   0x6   : > { %p30_p0 = scmp.ge.s32.totalorder %s28_s20, 2  ;;  %p115_p1 = scmp.ne.s32.totalorder %s5865_s14, %s5861_s13 }
   0x7   : > { %p116_p2 = scmp.eq.s32.totalorder %s5518_s18, 1  ;;  %p121_p3 = scmp.ne.s32.totalorder %s5861_s13, %s5857_s12 }
   0x8   : > { %s7531_s20 = smov (%p30_p0, %s28_s20), 0  ;;  %p122_p5 = scmp.eq.s32.totalorder %s5519_s19, 1 }
   0x9   : > { %p5950_p4 = por %p116_p2, %p115_p1  ;;  %s100_s23 = ssub.s32 %s5873_s16, %s7531_s20 }
   0xa   : > { %p5522_p6 = scmp.ge.s32.totalorder %s5877_s17, 1  ;;  %p103_p7 = scmp.eq.s32.totalorder %s100_s23, 0 }
   0xb   : > { %p5957_p8 = por %p122_p5, %p121_p3  ;;  %p154_p9 = scmp.lt.s32.totalorder %s5877_s17, 3 }
   0xc   : > { %s5963_s25 = scalar_select %p103_p7, %s5865_s14, %s105_s21  }
   0xd   : > { %p155_p10 = pnand %p5522_p6, %p154_p9 }
   0xe   : > { %p178_p11 = scmp.lt.s32.totalorder (!%p155_p10), %s5869_s15, 1  ;;  %s5880_s4 = smov (!%p155_p10), 4  }
   0xf   : > { %158 = sbr.rel (%p155_p10) target bundleno = 960 (0x3c0), region = 32  ;;  %s5881_s5 = smov (!%p155_p10), 8  }
  0x10   : > { %s5882_s6 = smov (!%p155_p10), 12   ;;  %s5883_s7 = smov (!%p155_p10), 16  }
  0x11   : > { %s5884_s8 = smov (!%p155_p10), 20   ;;  %s5885_s9 = smov (!%p155_p10), 24  }
  0x12   : > { %s5886_s10 = smov (!%p155_p10), 28   ;;  %s175_s28 = sand.u32 (!%p155_p10), 1, %s5861_s13  }
  0x13   : > { %s5523_s29 = sshll.u32 (!%p155_p10), %s175_s28, 8  ;;  %s5888_s19 = smov (!%p155_p10), [#allocation4]  }
  0x14   : > { %vm186_vm0 = vcmask 24576   ;;  %vm187_vm1 = vsmask.f32 256  ;;  %vm243_vm2 = vsmask.f32 7938  ;;  %vm303_vm3 = vcmask 27648  }
  0x15   : > { %vm5966_vm4 = vmand %vm186_vm0, %vm187_vm1  ;;  %v245_v1 = vld [vmem:[#allocation2 + $0x8] sm:$0x1]  ;;  %v5879_v3 = vmov 0   ;;  %v189_v4 = vld [vmem:[#allocation2] sm:$0x1]  ;;  %s179_s26 = scalar_select %p178_p11, %s5869_s15, 1 }
  0x16   : > { %vm5971_vm5 = vmand %vm186_vm0, %vm243_vm2  ;;  %309 = vst.msk [vmem:[#allocation2 + $0x4] sm:$0xf] %vm303_vm3, %v5879_v3  ;;  %v190_v6 = vsel %vm5966_vm4, 0, %v189_v4  ;;  %v192_v7 = vld [vmem:[#allocation2 + $0xc] sm:$0x1]  ;;  %vm2546_vm12 = vcmask 1042432  }
  0x17   : > { %1817 = vst.msk [vmem:[#allocation2 + $0xd0] sm:$0xf] %vm303_vm3, %v5879_v3  ;;  %v246_v5 = vsel %vm5971_vm5, 0, %v245_v1  ;;  %191 = vst [vmem:[#allocation2] sm:$0x1] %v190_v6  ;;  %v193_v8 = vsel %vm5966_vm4, 0, %v192_v7 }
  0x18   : > { %247 = vst [vmem:[#allocation2 + $0x8] sm:$0x1] %v246_v5  ;;  %v195_v9 = vld [vmem:[#allocation2 + $0x18] sm:$0x1]  ;;  %v248_v10 = vld [vmem:[#allocation2 + $0x14] sm:$0x1]  ;;  %vm6005_vm7 = vmand %vm303_vm3, %vm243_vm2 }
  0x19   : > { %194 = vst [vmem:[#allocation2 + $0xc] sm:$0x1] %v193_v8  ;;  %v196_v11 = vsel %vm5966_vm4, 0, %v195_v9  ;;  %v249_v12 = vsel %vm5971_vm5, 0, %v248_v10  ;;  %v198_v13 = vld [vmem:[#allocation2 + $0x24] sm:$0x1] }
  0x1a   : > { %v251_v14 = vld [vmem:[#allocation2 + $0x20] sm:$0x1]  ;;  %s5649_s27 = sshll.u32 %s179_s26, 7  ;;  %197 = vst [vmem:[#allocation2 + $0x18] sm:$0x1] %v196_v11  ;;  %v199_v15 = vsel %vm5966_vm4, 0, %v198_v13 }
  0x1b   : > { %250 = vst [vmem:[#allocation2 + $0x14] sm:$0x1] %v249_v12  ;;  %v252_v16 = vsel %vm5971_vm5, 0, %v251_v14  ;;  %v201_v17 = vld [vmem:[#allocation2 + $0x30] sm:$0x1]  ;;  %s5996_s30 = scalar_lea.vmem %s7507_s0, %s5649_s27  ;;  %vm2547_vm13 = vcmask 1046532  }
  0x1c   : > { %vm395_vm6 = vsmask.f32 4368  ;;  %200 = vst [vmem:[#allocation2 + $0x24] sm:$0x1] %v199_v15  ;;  %253 = vst [vmem:[#allocation2 + $0x20] sm:$0x1] %v252_v16 }
  0x1d   : > { %v202_v18 = vsel %vm5966_vm4, 0, %v201_v17  ;;  %v363_v19 = vld [vmem:[%s5996_s30] sm:$0xf]  ;;  %v364_v20 = vld [vmem:[%s5996_s30 + $0x4] sm:$0xf]  ;;  %vm6018_vm10 = vmor %vm187_vm1, %vm395_vm6  ;;  %vm2417_vm15 = vcmask 60448  }
  0x1e   : > { %v365_v21 = vld [vmem:[%s5996_s30 + $0x8] sm:$0xf]  ;;  %203 = vst [vmem:[#allocation2 + $0x30] sm:$0x1] %v202_v18  ;;  %v1887_v23 = vld [vmem:[#allocation2 + $0x4] sm:$0xf]  ;;  %vm6389_vm14 = vmor %vm2546_vm12, %vm2547_vm13 }
  0x1f   : > { %v398_v24 = vshrl.u32 %v363_v19, 16  ;;  %v401_v25 = vshll.u32 %v363_v19, 16  ;;  %v406_v26 = vshrl.u32 %v364_v20, 16  ;;  %v409_v27 = vshll.u32 %v364_v20, 16  ;;  %v366_v30 = vld [vmem:[%s5996_s30 + $0xc] sm:$0xf] }
  0x20   : > { %v1947_v28 = vshll.u32 %v1887_v23, 16  ;;  %v1951_v29 = vshrl.u32 %v1887_v23, 16  ;;  %v415_v31 = vshrl.u32 %v365_v21, 16  ;;  %v418_v32 = vshll.u32 %v365_v21, 16  ;;  %v310_v33 = vld [vmem:[#allocation2 + $0x8] sm:$0x1] }
  0x21   : > { %vm1934_vm8 = vsmask.f32 3328  ;;  %vm1935_vm9 = vsmask.f32 7440  ;;  %v305_v34 = vld [vmem:[#allocation2] sm:$0xf] }
  0x22   : > { %v400_v35 = vrot.slane %v398_v24, 7  ;;  %v408_v36 = vrot.slane %v406_v26, 7  ;;  %v311_v37 = vsel %vm5966_vm4, 0, %v310_v33  ;;  %v6012_v38 = vrot.slane %v1947_v28, 5  ;;  %v720_v42 = vld [vmem:[#allocation2 + $0xc] sm:$0xf]  ;;  %vm6048_vm11 = vmor %vm1934_vm8, %vm1935_vm9 }
  0x23   : > { %v1953_v39 = vrot.slane %v1951_v29, 4  ;;  %v306_v40 = vsel %vm6005_vm7, 0, %v305_v34  ;;  %312 = vst [vmem:[#allocation2 + $0x8] sm:$0x1] %v311_v37  ;;  %v417_v46 = vrot.slane %v415_v31, 7  ;;  %v423_v50 = vshrl.u32 %v366_v30, 16 }
  0x24   : > { %307 = vst [vmem:[#allocation2] sm:$0xf] %v306_v40  ;;  %v403_v43 = vor.u32 %v401_v25, %v400_v35  ;;  %v404_v44 = vrot.slane %v400_v35, 4  ;;  %v411_v45 = vor.u32 %v409_v27, %v408_v36  ;;  %v728_v47 = vld [vmem:[#allocation2 + $0x18] sm:$0xf]  ;;  %v426_v51 = vshll.u32 %v366_v30, 16 }
  0x25   : > { %v725_v48 = vld [vmem:[#allocation2 + $0x14] sm:$0x1]  ;;  %v1954_v49 = vor.u32 %v1953_v39, %v6012_v38  ;;  %v413_v52 = vrot.slane %v408_v36, 4  ;;  %v367_v53 = vld [vmem:[%s5996_s30 + $0x10] sm:$0xf]  ;;  %v420_v56 = vor.u32 %v418_v32, %v417_v46  ;;  %v421_v57 = vrot.slane %v417_v46, 4 }
  0x26   : > { %v412_v54 = vsel %vm6018_vm10, %v404_v44, %v411_v45  ;;  %v721_v55 = vsel %vm6005_vm7, %v403_v43, %v720_v42  ;;  %v368_v58 = vld [vmem:[%s5996_s30 + $0x14] sm:$0xf]  ;;  %v425_v60 = vrot.slane %v423_v50, 7  ;;  %v432_v62 = vshrl.u32 %v367_v53, 16  ;;  %v732_v63 = vld [vmem:[#allocation2 + $0x20] sm:$0x1] }
  0x27   : > { %v6029_v59 = vrot.slane %v1954_v49, 4  ;;  %722 = vst [vmem:[#allocation2 + $0xc] sm:$0xf] %v721_v55  ;;  %724 = vst.msk [vmem:[#allocation2 + $0x10] sm:$0xf] %vm303_vm3, %v412_v54  ;;  %v726_v61 = vsel %vm5966_vm4, %v413_v52, %v725_v48  ;;  %v729_v1 = vsel %vm6005_vm7, %v420_v56, %v728_v47  ;;  %v435_v3 = vshll.u32 %v367_v53, 16 }
  0x28   : > { %727 = vst [vmem:[#allocation2 + $0x14] sm:$0x1] %v726_v61  ;;  %v440_v4 = vshrl.u32 %v368_v58, 16  ;;  %v443_v5 = vshll.u32 %v368_v58, 16  ;;  %v369_v6 = vld [vmem:[%s5996_s30 + $0x18] sm:$0xf]  ;;  %v428_v8 = vor.u32 %v426_v51, %v425_v60 }
  0x29   : > { %v254_v7 = vld [vmem:[#allocation2 + $0x2c] sm:$0x1]  ;;  %730 = vst [vmem:[#allocation2 + $0x18] sm:$0xf] %v729_v1  ;;  %v434_v9 = vrot.slane %v432_v62, 7  ;;  %v430_v10 = vrot.slane %v425_v60, 4 }
  0x2a   : > { %v370_v11 = vld [vmem:[%s5996_s30 + $0x1c] sm:$0xf]  ;;  %v449_v12 = vshrl.u32 %v369_v6, 16  ;;  %v6038_v13 = vrot.slane %v440_v4, 7  ;;  %v735_v14 = vld [vmem:[#allocation2 + $0x24] sm:$0xf]  ;;  %v429_v20 = vsel %vm6018_vm10, %v421_v57, %v428_v8 }
  0x2b   : > { %v452_v15 = vshll.u32 %v369_v6, 16  ;;  %v457_v16 = vshrl.u32 %v370_v11, 16  ;;  %v460_v17 = vshll.u32 %v370_v11, 16  ;;  %v1888_v18 = vld [vmem:[#allocation2 + $0x8] sm:$0x1]  ;;  %v437_v21 = vor.u32 %v435_v3, %v434_v9  ;;  %s5887_s27 = smov 32  }
  0x2c   : > { %v1886_v19 = vld [vmem:[#allocation2] sm:$0xf]  ;;  %v438_v23 = vrot.slane %v434_v9, 4  ;;  %v733_v24 = vsel %vm5966_vm4, %v430_v10, %v732_v63  ;;  %v1957_v25 = vshll.u32 %v1888_v18, 16  ;;  %731 = vst.msk [vmem:[#allocation2 + $0x1c] sm:$0xf] %vm303_vm3, %v429_v20  ;;  %v445_v28 = vor.u32 %v443_v5, %v6038_v13 }
  0x2d   : > { %v1938_v26 = vshrl.u32 %v1886_v19, 16  ;;  %v1941_v27 = vshll.u32 %v1886_v19, 16  ;;  %734 = vst [vmem:[#allocation2 + $0x20] sm:$0x1] %v733_v24  ;;  %v736_v30 = vsel %vm6005_vm7, %v437_v21, %v735_v14  ;;  %v6054_v31 = vrot.slane %v449_v12, 7  ;;  %s5805_s21 = sshll.u32 %s5888_s19, 4  ;;  %s5806_s21 = int_to_ptr.vmem [resolvable:$false] %s5805_s21 }
  0x2e   : > { %v6056_v32 = vrot.slane %v457_v16, 7  ;;  %v255_v33 = vsel %vm5971_vm5, 0, %v254_v7  ;;  %v1959_v34 = vrot.slane %v1957_v25, 5  ;;  %v1889_v37 = vld [vmem:[#allocation2 + $0xc] sm:$0xf]  ;;  %v446_v39 = vsel %vm6018_vm10, %v438_v23, %v445_v28  ;;  %s5807_s23 = scalar_lea.vmem %s5806_s21, 8192 }
  0x2f   : > { %v1940_v35 = vrot.slane %v1938_v26, 4  ;;  %v1943_v36 = vrot.slane %v1941_v27, 5  ;;  %737 = vst [vmem:[#allocation2 + $0x24] sm:$0xf] %v736_v30  ;;  %256 = vst [vmem:[#allocation2 + $0x2c] sm:$0x1] %v255_v33  ;;  %v454_v45 = vor.u32 %v452_v15, %v6054_v31 }
  0x30   : > { %v1890_v40 = vld [vmem:[#allocation2 + $0x10] sm:$0xf]  ;;  %v1962_v42 = vshrl.u32 %v1889_v37, 16  ;;  %v1965_v43 = vshll.u32 %v1889_v37, 16  ;;  %v1891_v44 = vld [vmem:[#allocation2 + $0x14] sm:$0x1]  ;;  %v462_v46 = vor.u32 %v460_v17, %v6056_v32  ;;  %v1960_v47 = vsel %vm6048_vm11, %v6029_v59, %v1959_v34 }
  0x31   : > { %738 = vst.msk [vmem:[#allocation2 + $0x28] sm:$0xf] %vm303_vm3, %v446_v39  ;;  %v1944_v48 = vor.u32 %v1943_v36, %v1940_v35  ;;  %v1971_v49 = vshll.u32 %v1890_v40, 16  ;;  %v1975_v50 = vshrl.u32 %v1890_v40, 16  ;;  %v1892_v51 = vld [vmem:[#allocation2 + $0x18] sm:$0xf]  ;;  %2323 = vrot.lane.b32.xlu0 %v1960_v47, %s5880_s4 }
  0x32   : > { %v742_v52 = vld [vmem:[#allocation2 + $0x30] sm:$0xf]  ;;  %v1964_v53 = vrot.slane %v1962_v42, 4  ;;  %v1967_v54 = vrot.slane %v1965_v43, 5  ;;  %v1986_v55 = vshrl.u32 %v1892_v51, 16  ;;  %v1989_v56 = vshll.u32 %v1892_v51, 16 }
  0x33   : > { %v1945_v57 = vrot.slane %v1944_v48, 4  ;;  %v1973_v58 = vrot.slane %v1971_v49, 5  ;;  %v1977_v60 = vrot.slane %v1975_v50, 4  ;;  %v1981_v61 = vshll.u32 %v1891_v44, 16  ;;  %v1893_v63 = vld [vmem:[#allocation2 + $0x1c] sm:$0xf] }
  0x34   : > { %v1968_v62 = vor.u32 %v1967_v54, %v1964_v53  ;;  %v1988_v1 = vrot.slane %v1986_v55, 4  ;;  %v1991_v59 = vrot.slane %v1989_v56, 5  ;;  %v1894_v3 = vld [vmem:[#allocation2 + $0x20] sm:$0x1]  ;;  %v743_v4 = vsel %vm6005_vm7, %v454_v45, %v742_v52  ;;  %v204_v24 = vld [vmem:[#allocation2 + $0x3c] sm:$0x1] }
  0x35   : > { %v1950_v5 = vsel %vm6048_vm11, %v1945_v57, %v6012_v38  ;;  %v1995_v6 = vshll.u32 %v1893_v63, 16  ;;  %v1999_v7 = vshrl.u32 %v1893_v63, 16  ;;  %v1978_v8 = vor.u32 %v1977_v60, %v1973_v58  ;;  %744 = vst [vmem:[#allocation2 + $0x30] sm:$0xf] %v743_v4  ;;  %v371_v30 = vld [vmem:[%s5996_s30 + $0x20] sm:$0xf] }
  0x36   : > { %2321 = vrot.lane.b32.xlu0 %v1950_v5, %s5880_s4  ;;  %v1969_v9 = vrot.slane %v1968_v62, 4  ;;  %v1992_v10 = vor.u32 %v1991_v59, %v1988_v1  ;;  %v1983_v11 = vrot.slane %v1981_v61, 5  ;;  %v1895_v12 = vld [vmem:[#allocation2 + $0x24] sm:$0xf]  ;;  %v2005_v14 = vshll.u32 %v1894_v3, 16 }
  0x37   : > { %v1997_v15 = vrot.slane %v1995_v6, 5  ;;  %v1979_v16 = vrot.slane %v1978_v8, 4  ;;  %v2010_v18 = vshrl.u32 %v1895_v12, 16  ;;  %v2013_v19 = vshll.u32 %v1895_v12, 16  ;;  %v739_v42 = vld [vmem:[#allocation2 + $0x2c] sm:$0x1] }
  0x38   : > { %v1896_v17 = vld [vmem:[#allocation2 + $0x28] sm:$0xf]  ;;  %v1974_v38 = vsel %vm6048_vm11, %v1969_v9, %v1973_v58  ;;  %v1993_v20 = vrot.slane %v1992_v10, 4  ;;  %v2001_v28 = vrot.slane %v1999_v7, 4  ;;  %v2007_v35 = vrot.slane %v2005_v14, 5 }
  0x39   : > { %v2019_v21 = vshll.u32 %v1896_v17, 16  ;;  %v2023_v23 = vshrl.u32 %v1896_v17, 16  ;;  %2325 = vrot.lane.b32.xlu1 %v1974_v38, %s5880_s4  ;;  %v1984_v25 = vsel %vm6048_vm11, %v1979_v16, %v1983_v11  ;;  %v2012_v26 = vrot.slane %v2010_v18, 4  ;;  %v372_v44 = vld [vmem:[%s5996_s30 + $0x24] sm:$0xf] }
  0x3a   : > { %v2015_v27 = vrot.slane %v2013_v19, 5  ;;  %v1998_v33 = vsel %vm6048_vm11, %v1993_v20, %v1997_v15  ;;  %v455_v36 = vrot.slane %v6054_v31, 4  ;;  %v2002_v39 = vor.u32 %v2001_v28, %v1997_v15  ;;  %v257_v56 = vld [vmem:[#allocation2 + $0x38] sm:$0x1]  ;;  %v207_v57 = vld [vmem:[#allocation2 + $0x48] sm:$0x1] }
  0x3b   : > { %v2021_v34 = vrot.slane %v2019_v21, 5  ;;  %2329 = vrot.lane.b32.xlu0 %v1998_v33, %s5880_s4  ;;  %v447_v40 = vrot.slane %v6038_v13, 4  ;;  %v2025_v43 = vrot.slane %v2023_v23, 4  ;;  %v205_v48 = vsel %vm5966_vm4, 0, %v204_v24  ;;  %v373_v63 = vld [vmem:[%s5996_s30 + $0x28] sm:$0xf] }
  0x3c   : > { %v2016_v37 = vor.u32 %v2015_v27, %v2012_v26  ;;  %v463_v45 = vsel %vm6018_vm10, %v455_v36, %v462_v46  ;;  %v1898_v47 = vld [vmem:[#allocation2 + $0x30] sm:$0xf]  ;;  %v466_v49 = vshrl.u32 %v371_v30, 16  ;;  %v469_v50 = vshll.u32 %v371_v30, 16  ;;  %206 = vst [vmem:[#allocation2 + $0x3c] sm:$0x1] %v205_v48 }
  0x3d   : > { %2327 = vrot.lane.b32.xlu1 %v1984_v25, %s5880_s4  ;;  %v2003_v51 = vrot.slane %v2002_v39, 4  ;;  %745 = vst.msk [vmem:[#allocation2 + $0x34] sm:$0xf] %vm303_vm3, %v463_v45  ;;  %v2034_v13 = vshrl.u32 %v1898_v47, 16  ;;  %v2037_v52 = vshll.u32 %v1898_v47, 16  ;;  %v740_v46 = vsel %vm5966_vm4, %v447_v40, %v739_v42 }
  0x3e   : > { %v2017_v31 = vrot.slane %v2016_v37, 4  ;;  %v2026_v53 = vor.u32 %v2025_v43, %v2021_v34  ;;  %v468_v54 = vrot.slane %v466_v49, 7  ;;  %v474_v55 = vshrl.u32 %v372_v44, 16  ;;  %741 = vst [vmem:[#allocation2 + $0x2c] sm:$0x1] %v740_v46 }
  0x3f   : > { %v2008_v60 = vsel %vm6048_vm11, %v2003_v51, %v2007_v35  ;;  %v2036_v61 = vrot.slane %v2034_v13, 4  ;;  %v2039_v62 = vrot.slane %v2037_v52, 5  ;;  %v374_v1 = vld [vmem:[%s5996_s30 + $0x2c] sm:$0xf]  ;;  %v260_v6 = vld [vmem:[#allocation2 + $0x44] sm:$0x1] }
  0x40   : > { %v2022_v58 = vsel %vm6048_vm11, %v2017_v31, %v2021_v34  ;;  %v6102_v59 = vrot.slane %v2026_v53, 4  ;;  %v471_v3 = vor.u32 %v469_v50, %v468_v54  ;;  %v472_v4 = vrot.slane %v468_v54, 4  ;;  %v210_v38 = vld [vmem:[#allocation2 + $0x54] sm:$0x1]  ;;  %v375_v28 = vld [vmem:[%s5996_s30 + $0x30] sm:$0xf] }
  0x41   : > { %2333 = vrot.lane.b32.xlu0 %v2022_v58, %s5880_s4  ;;  %v6104_v5 = vrot.slane %v474_v55, 7  ;;  %2331 = vrot.lane.b32.xlu1 %v2008_v60, %s5880_s4  ;;  %v2040_v7 = vor.u32 %v2039_v62, %v2036_v61  ;;  %v477_v8 = vshll.u32 %v372_v44, 16  ;;  %v258_v9 = vsel %vm5971_vm5, 0, %v257_v56  ;;  %v376_v30 = vld [vmem:[%s5996_s30 + $0x34] sm:$0xf] }
  0x42   : > { %v464_v10 = vrot.slane %v6056_v32, 4  ;;  %259 = vst [vmem:[#allocation2 + $0x38] sm:$0x1] %v258_v9  ;;  %v208_v11 = vsel %vm5966_vm4, 0, %v207_v57  ;;  %v483_v12 = vshrl.u32 %v373_v63, 16  ;;  %v486_v14 = vshll.u32 %v373_v63, 16 }
  0x43   : > { %v491_v15 = vshrl.u32 %v374_v1, 16  ;;  %v2041_v16 = vrot.slane %v2040_v7, 4  ;;  %v479_v17 = vor.u32 %v477_v8, %v6104_v5  ;;  %209 = vst [vmem:[#allocation2 + $0x48] sm:$0x1] %v208_v11  ;;  %v494_v18 = vshll.u32 %v374_v1, 16 }
  0x44   : > { %v261_v19 = vsel %vm5971_vm5, 0, %v260_v6  ;;  %v1899_v20 = vld [vmem:[#allocation2 + $0x34] sm:$0xf]  ;;  %v749_v32 = vld [vmem:[#allocation2 + $0x3c] sm:$0xf]  ;;  %v485_v21 = vrot.slane %v483_v12, 7 }
  0x45   : > { %v6115_v23 = vrot.slane %v491_v15, 7  ;;  %262 = vst [vmem:[#allocation2 + $0x44] sm:$0x1] %v261_v19  ;;  %v2043_v24 = vshll.u32 %v1899_v20, 16  ;;  %v2047_v25 = vshrl.u32 %v1899_v20, 16  ;;  %v480_v26 = vsel %vm6018_vm10, %v472_v4, %v479_v17 }
  0x46   : > { %v750_v27 = vsel %vm6005_vm7, %v471_v3, %v749_v32  ;;  %v1897_v33 = vld [vmem:[#allocation2 + $0x2c] sm:$0x1]  ;;  %752 = vst.msk [vmem:[#allocation2 + $0x40] sm:$0xf] %vm303_vm3, %v480_v26  ;;  %v488_v34 = vor.u32 %v486_v14, %v485_v21  ;;  %v489_v35 = vrot.slane %v485_v21, 4  ;;  %v481_v37 = vrot.slane %v6104_v5, 4 }
  0x47   : > { %751 = vst [vmem:[#allocation2 + $0x3c] sm:$0xf] %v750_v27  ;;  %v496_v36 = vor.u32 %v494_v18, %v6115_v23  ;;  %v2045_v39 = vrot.slane %v2043_v24, 5  ;;  %v2029_v40 = vshll.u32 %v1897_v33, 16  ;;  %v2049_v42 = vrot.slane %v2047_v25, 4 }
  0x48   : > { %v211_v43 = vsel %vm5966_vm4, 0, %v210_v38  ;;  %v263_v44 = vld [vmem:[#allocation2 + $0x50] sm:$0x1]  ;;  %v500_v47 = vshrl.u32 %v375_v28, 16  ;;  %v503_v48 = vshll.u32 %v375_v28, 16  ;;  %v508_v49 = vshrl.u32 %v376_v30, 16 }
  0x49   : > { %v497_v45 = vsel %vm6018_vm10, %v489_v35, %v496_v36  ;;  %212 = vst [vmem:[#allocation2 + $0x54] sm:$0x1] %v211_v43  ;;  %v213_v50 = vld [vmem:[#allocation2 + $0x60] sm:$0x1]  ;;  %v2046_v31 = vsel %vm6048_vm11, %v2041_v16, %v2045_v39  ;;  %v2031_v51 = vrot.slane %v2029_v40, 5  ;;  %v2050_v52 = vor.u32 %v2049_v42, %v2045_v39 }
  0x4a   : > { %v746_v13 = vld [vmem:[#allocation2 + $0x38] sm:$0x1]  ;;  %759 = vst.msk [vmem:[#allocation2 + $0x4c] sm:$0xf] %vm303_vm3, %v497_v45  ;;  %v511_v46 = vshll.u32 %v376_v30, 16  ;;  %2337 = vrot.lane.b32.xlu0 %v2046_v31, %s5880_s4  ;;  %v502_v56 = vrot.slane %v500_v47, 7 }
  0x4b   : > { %v377_v53 = vld [vmem:[%s5996_s30 + $0x38] sm:$0xf]  ;;  %v747_v54 = vsel %vm5966_vm4, %v464_v10, %v746_v13  ;;  %v756_v55 = vld [vmem:[#allocation2 + $0x48] sm:$0xf]  ;;  %v6137_v57 = vrot.slane %v508_v49, 7  ;;  %v264_v58 = vsel %vm5971_vm5, 0, %v263_v44  ;;  %v2032_v60 = vsel %vm6048_vm11, %v6102_v59, %v2031_v51 }
  0x4c   : > { %748 = vst [vmem:[#allocation2 + $0x38] sm:$0x1] %v747_v54  ;;  %v6144_v61 = vrot.slane %v2050_v52, 4  ;;  %v757_v62 = vsel %vm6005_vm7, %v488_v34, %v756_v55  ;;  %v753_v63 = vld [vmem:[#allocation2 + $0x44] sm:$0x1]  ;;  %2335 = vrot.lane.b32.xlu1 %v2032_v60, %s5880_s4  ;;  %v506_v3 = vrot.slane %v502_v56, 4  ;;  %v505_v8 = vor.u32 %v503_v48, %v502_v56 }
  0x4d   : > { %265 = vst [vmem:[#allocation2 + $0x50] sm:$0x1] %v264_v58  ;;  %758 = vst [vmem:[#allocation2 + $0x48] sm:$0xf] %v757_v62  ;;  %v754_v1 = vsel %vm5966_vm4, %v481_v37, %v753_v63  ;;  %v513_v4 = vor.u32 %v511_v46, %v6137_v57  ;;  %v498_v5 = vrot.slane %v6115_v23, 4  ;;  %v214_v9 = vsel %vm5966_vm4, 0, %v213_v50 }
  0x4e   : > { %v378_v59 = vld [vmem:[%s5996_s30 + $0x3c] sm:$0xf]  ;;  %v1902_v7 = vld [vmem:[#allocation2 + $0x40] sm:$0xf]  ;;  %755 = vst [vmem:[#allocation2 + $0x44] sm:$0x1] %v754_v1 }
  0x4f   : > { %v1901_v6 = vld [vmem:[#allocation2 + $0x3c] sm:$0xf]  ;;  %v517_v10 = vshrl.u32 %v377_v53, 16  ;;  %v2067_v14 = vshll.u32 %v1902_v7, 16  ;;  %v2071_v15 = vshrl.u32 %v1902_v7, 16  ;;  %v514_v16 = vsel %vm6018_vm10, %v506_v3, %v513_v4 }
  0x50   : > { %v2058_v11 = vshrl.u32 %v1901_v6, 16  ;;  %v2061_v12 = vshll.u32 %v1901_v6, 16  ;;  %215 = vst [vmem:[#allocation2 + $0x60] sm:$0x1] %v214_v9  ;;  %v763_v17 = vld [vmem:[#allocation2 + $0x54] sm:$0xf] }
  0x51   : > { %v519_v18 = vrot.slane %v517_v10, 7  ;;  %v520_v19 = vshll.u32 %v377_v53, 16  ;;  %v525_v38 = vshrl.u32 %v378_v59, 16  ;;  %v2069_v21 = vrot.slane %v2067_v14, 5  ;;  %v1905_v23 = vld [vmem:[#allocation2 + $0x4c] sm:$0xf] }
  0x52   : > { %v2060_v20 = vrot.slane %v2058_v11, 4  ;;  %v2063_v32 = vrot.slane %v2061_v12, 5  ;;  %v2073_v24 = vrot.slane %v2071_v15, 4  ;;  %766 = vst.msk [vmem:[#allocation2 + $0x58] sm:$0xf] %vm303_vm3, %v514_v16  ;;  %v2091_v25 = vshll.u32 %v1905_v23, 16 }
  0x53   : > { %v2095_v26 = vshrl.u32 %v1905_v23, 16  ;;  %v764_v27 = vsel %vm6005_vm7, %v505_v8, %v763_v17  ;;  %v522_v28 = vor.u32 %v520_v19, %v519_v18  ;;  %v1900_v33 = vld [vmem:[#allocation2 + $0x38] sm:$0x1]  ;;  %v523_v36 = vrot.slane %v519_v18, 4  ;;  %v266_v45 = vld [vmem:[#allocation2 + $0x5c] sm:$0x1] }
  0x54   : > { %v2064_v30 = vor.u32 %v2063_v32, %v2060_v20  ;;  %v2074_v34 = vor.u32 %v2073_v24, %v2069_v21  ;;  %765 = vst [vmem:[#allocation2 + $0x54] sm:$0xf] %v764_v27  ;;  %v760_v35 = vld [vmem:[#allocation2 + $0x50] sm:$0x1]  ;;  %v6161_v37 = vrot.slane %v525_v38, 7  ;;  %v2053_v39 = vshll.u32 %v1900_v33, 16 }
  0x55   : > { %v1904_v40 = vld [vmem:[#allocation2 + $0x48] sm:$0xf]  ;;  %v2093_v42 = vrot.slane %v2091_v25, 5  ;;  %v761_v43 = vsel %vm5966_vm4, %v498_v5, %v760_v35  ;;  %v2097_v44 = vrot.slane %v2095_v26, 4  ;;  %v1903_v50 = vld [vmem:[#allocation2 + $0x44] sm:$0x1] }
  0x56   : > { %v2065_v47 = vrot.slane %v2064_v30, 4  ;;  %v2082_v48 = vshrl.u32 %v1904_v40, 16  ;;  %v2085_v49 = vshll.u32 %v1904_v40, 16  ;;  %v2075_v31 = vrot.slane %v2074_v34, 4  ;;  %762 = vst [vmem:[#allocation2 + $0x50] sm:$0x1] %v761_v43 }
  0x57   : > { %v2055_v51 = vrot.slane %v2053_v39, 5  ;;  %v2077_v13 = vshll.u32 %v1903_v50, 16  ;;  %v2098_v52 = vor.u32 %v2097_v44, %v2093_v42  ;;  %v528_v46 = vshll.u32 %v378_v59, 16  ;;  %v770_v53 = vld [vmem:[#allocation2 + $0x60] sm:$0xf] }
  0x58   : > { %v2070_v54 = vsel %vm6048_vm11, %v2065_v47, %v2069_v21  ;;  %v2084_v55 = vrot.slane %v2082_v48, 4  ;;  %v2087_v56 = vrot.slane %v2085_v49, 5  ;;  %v771_v58 = vsel %vm6005_vm7, %v522_v28, %v770_v53  ;;  %v216_v60 = vld [vmem:[#allocation2 + $0x6c] sm:$0x1]  ;;  %v379_v4 = vld [vmem:[%s5996_s30 + $0x40] sm:$0xf] }
  0x59   : > { %2341 = vrot.lane.b32.xlu0 %v2070_v54, %s5880_s4  ;;  %v2056_v62 = vsel %vm6048_vm11, %v6144_v61, %v2055_v51  ;;  %v2079_v63 = vrot.slane %v2077_v13, 5  ;;  %v1908_v1 = vld [vmem:[#allocation2 + $0x58] sm:$0xf]  ;;  %v530_v3 = vor.u32 %v528_v46, %v6161_v37  ;;  %772 = vst [vmem:[#allocation2 + $0x60] sm:$0xf] %v771_v58  ;;  %v2099_v6 = vrot.slane %v2098_v52, 4 }
  0x5a   : > { %2339 = vrot.lane.b32.xlu1 %v2056_v62, %s5880_s4  ;;  %v2088_v5 = vor.u32 %v2087_v56, %v2084_v55  ;;  %v2115_v59 = vshll.u32 %v1908_v1, 16  ;;  %v267_v7 = vsel %vm5971_vm5, 0, %v266_v45  ;;  %v380_v8 = vld [vmem:[%s5996_s30 + $0x44] sm:$0xf]  ;;  %v2119_v61 = vshrl.u32 %v1908_v1, 16 }
  0x5b   : > { %v2080_v9 = vsel %vm6048_vm11, %v2075_v31, %v2079_v63  ;;  %v1907_v10 = vld [vmem:[#allocation2 + $0x54] sm:$0xf]  ;;  %v531_v11 = vsel %vm6018_vm10, %v523_v36, %v530_v3  ;;  %268 = vst [vmem:[#allocation2 + $0x5c] sm:$0x1] %v267_v7  ;;  %v217_v12 = vsel %vm5966_vm4, 0, %v216_v60  ;;  %v515_v17 = vrot.slane %v6137_v57, 4 }
  0x5c   : > { %v2089_v14 = vrot.slane %v2088_v5, 4  ;;  %v2106_v15 = vshrl.u32 %v1907_v10, 16  ;;  %v2109_v16 = vshll.u32 %v1907_v10, 16  ;;  %773 = vst.msk [vmem:[#allocation2 + $0x64] sm:$0xf] %vm303_vm3, %v531_v11  ;;  %v6187_v19 = vrot.slane %v2115_v59, 5 }
  0x5d   : > { %218 = vst [vmem:[#allocation2 + $0x6c] sm:$0x1] %v217_v12  ;;  %v269_v18 = vld [vmem:[#allocation2 + $0x68] sm:$0x1]  ;;  %v1906_v38 = vld [vmem:[#allocation2 + $0x50] sm:$0x1] }
  0x5e   : > { %v534_v20 = vshrl.u32 %v379_v4, 16  ;;  %v537_v32 = vshll.u32 %v379_v4, 16  ;;  %v542_v21 = vshrl.u32 %v380_v8, 16  ;;  %v2094_v23 = vsel %vm6048_vm11, %v2089_v14, %v2093_v42  ;;  %2343 = vrot.lane.b32.xlu1 %v2080_v9, %s5880_s4  ;;  %v219_v39 = vld [vmem:[#allocation2 + $0x78] sm:$0x1] }
  0x5f   : > { %v2108_v24 = vrot.slane %v2106_v15, 4  ;;  %v2111_v25 = vrot.slane %v2109_v16, 5  ;;  %v2101_v26 = vshll.u32 %v1906_v38, 16  ;;  %2345 = vrot.lane.b32.xlu0 %v2094_v23, %s5880_s4  ;;  %v2121_v57 = vrot.slane %v2119_v61, 4  ;;  %v381_v45 = vld [vmem:[%s5996_s30 + $0x48] sm:$0xf] }
  0x60   : > { %v536_v27 = vrot.slane %v534_v20, 7  ;;  %v6193_v28 = vrot.slane %v542_v21, 7  ;;  %v545_v30 = vshll.u32 %v380_v8, 16  ;;  %v1910_v35 = vld [vmem:[#allocation2 + $0x60] sm:$0xf]  ;;  %v270_v36 = vsel %vm5971_vm5, 0, %v269_v18 }
  0x61   : > { %v2112_v33 = vor.u32 %v2111_v25, %v2108_v24  ;;  %v2103_v34 = vrot.slane %v2101_v26, 5  ;;  %v2130_v40 = vshrl.u32 %v1910_v35, 16  ;;  %v2133_v42 = vshll.u32 %v1910_v35, 16  ;;  %271 = vst [vmem:[#allocation2 + $0x68] sm:$0x1] %v270_v36 }
  0x62   : > { %v539_v43 = vor.u32 %v537_v32, %v536_v27  ;;  %v532_v44 = vrot.slane %v6161_v37, 4  ;;  %v767_v49 = vld [vmem:[#allocation2 + $0x5c] sm:$0x1]  ;;  %v540_v50 = vrot.slane %v536_v27, 4  ;;  %v547_v31 = vor.u32 %v545_v30, %v6193_v28  ;;  %v382_v51 = vld [vmem:[%s5996_s30 + $0x4c] sm:$0xf] }
  0x63   : > { %v2113_v47 = vrot.slane %v2112_v33, 4  ;;  %v2104_v48 = vsel %vm6048_vm11, %v2099_v6, %v2103_v34  ;;  %v1911_v13 = vld [vmem:[#allocation2 + $0x64] sm:$0xf]  ;;  %v2132_v52 = vrot.slane %v2130_v40, 4  ;;  %v2135_v46 = vrot.slane %v2133_v42, 5 }
  0x64   : > { %2347 = vrot.lane.b32.xlu1 %v2104_v48, %s5880_s4  ;;  %v768_v53 = vsel %vm5966_vm4, %v515_v17, %v767_v49  ;;  %v2122_v37 = vor.u32 %v2121_v57, %v6187_v19  ;;  %v777_v54 = vld [vmem:[#allocation2 + $0x6c] sm:$0xf]  ;;  %v2139_v56 = vshll.u32 %v1911_v13, 16  ;;  %v2143_v58 = vshrl.u32 %v1911_v13, 16  ;;  %v272_v62 = vld [vmem:[#allocation2 + $0x74] sm:$0x1] }
  0x65   : > { %v2118_v55 = vsel %vm6048_vm11, %v2113_v47, %v6187_v19  ;;  %769 = vst [vmem:[#allocation2 + $0x5c] sm:$0x1] %v768_v53  ;;  %v548_v60 = vsel %vm6018_vm10, %v540_v50, %v547_v31  ;;  %v2136_v63 = vor.u32 %v2135_v46, %v2132_v52  ;;  %v778_v1 = vsel %vm6005_vm7, %v539_v43, %v777_v54  ;;  %v222_v5 = vld [vmem:[#allocation2 + $0x84] sm:$0x1]  ;;  %v383_v59 = vld [vmem:[%s5996_s30 + $0x50] sm:$0xf] }
  0x66   : > { %2349 = vrot.lane.b32.xlu0 %v2118_v55, %s5880_s4  ;;  %780 = vst.msk [vmem:[#allocation2 + $0x70] sm:$0xf] %vm303_vm3, %v548_v60  ;;  %v220_v3 = vsel %vm5966_vm4, 0, %v219_v39  ;;  %v551_v4 = vshrl.u32 %v381_v45, 16  ;;  %v2141_v6 = vrot.slane %v2139_v56, 5  ;;  %v2145_v7 = vrot.slane %v2143_v58, 4 }
  0x67   : > { %779 = vst [vmem:[#allocation2 + $0x6c] sm:$0xf] %v778_v1  ;;  %221 = vst [vmem:[#allocation2 + $0x78] sm:$0x1] %v220_v3  ;;  %v554_v8 = vshll.u32 %v381_v45, 16  ;;  %v559_v9 = vshrl.u32 %v382_v51, 16 }
  0x68   : > { %v6220_v10 = vld [vmem:[%s5996_s30 + $0x54] sm:$0xf]  ;;  %v2137_v61 = vrot.slane %v2136_v63, 4  ;;  %v553_v11 = vrot.slane %v551_v4, 7  ;;  %v562_v12 = vshll.u32 %v382_v51, 16  ;;  %v273_v14 = vsel %vm5971_vm5, 0, %v272_v62 }
  0x69   : > { %v275_v15 = vld [vmem:[#allocation2 + $0x80] sm:$0x1]  ;;  %v2123_v16 = vrot.slane %v2122_v37, 4  ;;  %v774_v17 = vld [vmem:[#allocation2 + $0x68] sm:$0x1]  ;;  %v2146_v18 = vor.u32 %v2145_v7, %v2141_v6  ;;  %v6224_v19 = vrot.slane %v559_v9, 7 }
  0x6a   : > { %274 = vst [vmem:[#allocation2 + $0x74] sm:$0x1] %v273_v14  ;;  %v223_v38 = vsel %vm5966_vm4, 0, %v222_v5  ;;  %v2142_v20 = vsel %vm6048_vm11, %v2137_v61, %v2141_v6  ;;  %v775_v32 = vsel %vm5966_vm4, %v532_v44, %v774_v17  ;;  %v557_v21 = vrot.slane %v553_v11, 4  ;;  %v225_v24 = vld [vmem:[#allocation2 + $0x90] sm:$0x1] }
  0x6b   : > { %v549_v23 = vrot.slane %v6193_v28, 4  ;;  %224 = vst [vmem:[#allocation2 + $0x84] sm:$0x1] %v223_v38  ;;  %2353 = vrot.lane.b32.xlu0 %v2142_v20, %s5880_s4  ;;  %776 = vst [vmem:[#allocation2 + $0x68] sm:$0x1] %v775_v32  ;;  %v6234_v25 = vrot.slane %v2146_v18, 4  ;;  %v556_v26 = vor.u32 %v554_v8, %v553_v11  ;;  %v564_v57 = vor.u32 %v562_v12, %v6224_v19 }
  0x6c   : > { %v568_v27 = vshrl.u32 %v383_v59, 16  ;;  %v1909_v30 = vld [vmem:[#allocation2 + $0x5c] sm:$0x1]  ;;  %v571_v33 = vshll.u32 %v383_v59, 16  ;;  %v576_v34 = vshrl.u32 %v6220_v10, 16  ;;  %v579_v35 = vshll.u32 %v6220_v10, 16 }
  0x6d   : > { %v276_v28 = vsel %vm5971_vm5, 0, %v275_v15  ;;  %v2125_v36 = vshll.u32 %v1909_v30, 16  ;;  %v1914_v39 = vld [vmem:[#allocation2 + $0x70] sm:$0xf]  ;;  %v565_v40 = vsel %vm6018_vm10, %v557_v21, %v564_v57  ;;  %v226_v43 = vsel %vm5966_vm4, 0, %v225_v24 }
  0x6e   : > { %v570_v42 = vrot.slane %v568_v27, 7  ;;  %277 = vst [vmem:[#allocation2 + $0x80] sm:$0x1] %v276_v28  ;;  %v385_v44 = vld [vmem:[%s5996_s30 + $0x58] sm:$0xf]  ;;  %v2163_v47 = vshll.u32 %v1914_v39, 16 }
  0x6f   : > { %v1913_v45 = vld [vmem:[#allocation2 + $0x6c] sm:$0xf]  ;;  %v2167_v48 = vshrl.u32 %v1914_v39, 16  ;;  %v784_v49 = vld [vmem:[#allocation2 + $0x78] sm:$0xf]  ;;  %v2127_v50 = vrot.slane %v2125_v36, 5 }
  0x70   : > { %787 = vst.msk [vmem:[#allocation2 + $0x7c] sm:$0xf] %vm303_vm3, %v565_v40  ;;  %227 = vst [vmem:[#allocation2 + $0x90] sm:$0x1] %v226_v43  ;;  %v2154_v31 = vshrl.u32 %v1913_v45, 16  ;;  %v2157_v51 = vshll.u32 %v1913_v45, 16  ;;  %v785_v13 = vsel %vm6005_vm7, %v556_v26, %v784_v49  ;;  %v573_v54 = vor.u32 %v571_v33, %v570_v42 }
  0x71   : > { %v386_v52 = vld [vmem:[%s5996_s30 + $0x5c] sm:$0xf]  ;;  %v2165_v46 = vrot.slane %v2163_v47, 5  ;;  %786 = vst [vmem:[#allocation2 + $0x78] sm:$0xf] %v785_v13  ;;  %v2169_v37 = vrot.slane %v2167_v48, 4  ;;  %v2128_v56 = vsel %vm6048_vm11, %v2123_v16, %v2127_v50 }
  0x72   : > { %v781_v53 = vld [vmem:[#allocation2 + $0x74] sm:$0x1]  ;;  %v566_v55 = vrot.slane %v6224_v19, 4  ;;  %v2156_v58 = vrot.slane %v2154_v31, 4  ;;  %v2159_v60 = vrot.slane %v2157_v51, 5  ;;  %2351 = vrot.lane.b32.xlu1 %v2128_v56, %s5880_s4  ;;  %v574_v3 = vrot.slane %v570_v42, 4 }
  0x73   : > { %v782_v62 = vsel %vm5966_vm4, %v549_v23, %v781_v53  ;;  %v791_v63 = vld [vmem:[#allocation2 + $0x84] sm:$0xf]  ;;  %v1912_v1 = vld [vmem:[#allocation2 + $0x68] sm:$0x1]  ;;  %v6256_v4 = vrot.slane %v576_v34, 7  ;;  %v585_v59 = vshrl.u32 %v385_v44, 16  ;;  %v2170_v10 = vor.u32 %v2169_v37, %v2165_v46 }
  0x74   : > { %783 = vst [vmem:[#allocation2 + $0x74] sm:$0x1] %v782_v62  ;;  %v792_v5 = vsel %vm6005_vm7, %v573_v54, %v791_v63  ;;  %v2160_v6 = vor.u32 %v2159_v60, %v2156_v58  ;;  %v2149_v7 = vshll.u32 %v1912_v1, 16  ;;  %v588_v8 = vshll.u32 %v385_v44, 16  ;;  %v278_v24 = vld [vmem:[#allocation2 + $0x8c] sm:$0x1] }
  0x75   : > { %793 = vst [vmem:[#allocation2 + $0x84] sm:$0xf] %v792_v5  ;;  %v593_v9 = vshrl.u32 %v386_v52, 16  ;;  %v581_v61 = vor.u32 %v579_v35, %v6256_v4  ;;  %v788_v11 = vld [vmem:[#allocation2 + $0x80] sm:$0x1]  ;;  %v587_v12 = vrot.slane %v585_v59, 7 }
  0x76   : > { %v596_v14 = vshll.u32 %v386_v52, 16  ;;  %v2161_v15 = vrot.slane %v2160_v6, 4  ;;  %v2151_v16 = vrot.slane %v2149_v7, 5  ;;  %v789_v18 = vsel %vm5966_vm4, %v566_v55, %v788_v11  ;;  %v228_v34 = vld [vmem:[#allocation2 + $0x9c] sm:$0x1] }
  0x77   : > { %v1917_v17 = vld [vmem:[#allocation2 + $0x7c] sm:$0xf]  ;;  %v6263_v19 = vrot.slane %v593_v9, 7  ;;  %v582_v32 = vsel %vm6018_vm10, %v574_v3, %v581_v61  ;;  %790 = vst [vmem:[#allocation2 + $0x80] sm:$0x1] %v789_v18  ;;  %v590_v21 = vor.u32 %v588_v8, %v587_v12  ;;  %v591_v30 = vrot.slane %v587_v12, 4 }
  0x78   : > { %v2187_v38 = vshll.u32 %v1917_v17, 16  ;;  %v2191_v20 = vshrl.u32 %v1917_v17, 16  ;;  %v798_v23 = vld [vmem:[#allocation2 + $0x90] sm:$0xf]  ;;  %v2166_v26 = vsel %vm6048_vm11, %v2161_v15, %v2165_v46  ;;  %v2152_v57 = vsel %vm6048_vm11, %v6234_v25, %v2151_v16  ;;  %v1916_v27 = vld [vmem:[#allocation2 + $0x78] sm:$0xf] }
  0x79   : > { %794 = vst.msk [vmem:[#allocation2 + $0x88] sm:$0xf] %vm303_vm3, %v582_v32  ;;  %v598_v33 = vor.u32 %v596_v14, %v6263_v19  ;;  %2357 = vrot.lane.b32.xlu0 %v2166_v26, %s5880_s4  ;;  %2355 = vrot.lane.b32.xlu1 %v2152_v57, %s5880_s4  ;;  %v2178_v35 = vshrl.u32 %v1916_v27, 16  ;;  %v2181_v28 = vshll.u32 %v1916_v27, 16  ;;  %v387_v40 = vld [vmem:[%s5996_s30 + $0x60] sm:$0xf]  ;;  %v799_v44 = vsel %vm6005_vm7, %v590_v21, %v798_v23 }
  0x7a   : > { %v2189_v36 = vrot.slane %v2187_v38, 5  ;;  %v2193_v39 = vrot.slane %v2191_v20, 4  ;;  %v2171_v43 = vrot.slane %v2170_v10, 4  ;;  %v279_v45 = vsel %vm5971_vm5, 0, %v278_v24  ;;  %v388_v47 = vld [vmem:[%s5996_s30 + $0x64] sm:$0xf] }
  0x7b   : > { %v1915_v42 = vld [vmem:[#allocation2 + $0x74] sm:$0x1]  ;;  %v599_v25 = vsel %vm6018_vm10, %v591_v30, %v598_v33  ;;  %v2180_v48 = vrot.slane %v2178_v35, 4  ;;  %v2183_v49 = vrot.slane %v2181_v28, 5  ;;  %800 = vst [vmem:[#allocation2 + $0x90] sm:$0xf] %v799_v44 }
  0x7c   : > { %v2173_v50 = vshll.u32 %v1915_v42, 16  ;;  %v1919_v31 = vld [vmem:[#allocation2 + $0x84] sm:$0xf]  ;;  %v2194_v51 = vor.u32 %v2193_v39, %v2189_v36  ;;  %801 = vst.msk [vmem:[#allocation2 + $0x94] sm:$0xf] %vm303_vm3, %v599_v25  ;;  %v229_v46 = vsel %vm5966_vm4, 0, %v228_v34 }
  0x7d   : > { %280 = vst [vmem:[#allocation2 + $0x8c] sm:$0x1] %v279_v45  ;;  %v2202_v13 = vshrl.u32 %v1919_v31, 16  ;;  %v2205_v52 = vshll.u32 %v1919_v31, 16  ;;  %v602_v53 = vshrl.u32 %v387_v40, 16  ;;  %v2184_v37 = vor.u32 %v2183_v49, %v2180_v48 }
  0x7e   : > { %v2175_v54 = vrot.slane %v2173_v50, 5  ;;  %v583_v55 = vrot.slane %v6256_v4, 4  ;;  %230 = vst [vmem:[#allocation2 + $0x9c] sm:$0x1] %v229_v46  ;;  %v605_v56 = vshll.u32 %v387_v40, 16  ;;  %v610_v1 = vshrl.u32 %v388_v47, 16 }
  0x7f   : > { %v2204_v58 = vrot.slane %v2202_v13, 4  ;;  %v2207_v60 = vrot.slane %v2205_v52, 5  ;;  %v1918_v62 = vld [vmem:[#allocation2 + $0x80] sm:$0x1]  ;;  %v604_v63 = vrot.slane %v602_v53, 7  ;;  %v2185_v3 = vrot.slane %v2184_v37, 4 }
  0x80   : > { %v2176_v5 = vsel %vm6048_vm11, %v2171_v43, %v2175_v54  ;;  %v1920_v59 = vld [vmem:[#allocation2 + $0x88] sm:$0xf]  ;;  %v2195_v6 = vrot.slane %v2194_v51, 4  ;;  %v2197_v7 = vshll.u32 %v1918_v62, 16  ;;  %v613_v4 = vshll.u32 %v388_v47, 16 }
  0x81   : > { %2359 = vrot.lane.b32.xlu1 %v2176_v5, %s5880_s4  ;;  %v2208_v8 = vor.u32 %v2207_v60, %v2204_v58  ;;  %v2211_v9 = vshll.u32 %v1920_v59, 16  ;;  %v2215_v10 = vshrl.u32 %v1920_v59, 16  ;;  %v2190_v61 = vsel %vm6048_vm11, %v2185_v3, %v2189_v36  ;;  %v281_v15 = vld [vmem:[#allocation2 + $0x98] sm:$0x1]  ;;  %v231_v34 = vld [vmem:[#allocation2 + $0xa8] sm:$0x1] }
  0x82   : > { %v2199_v11 = vrot.slane %v2197_v7, 5  ;;  %v608_v12 = vrot.slane %v604_v63, 4  ;;  %v6293_v14 = vrot.slane %v610_v1, 7  ;;  %2361 = vrot.lane.b32.xlu0 %v2190_v61, %s5880_s4  ;;  %v1922_v18 = vld [vmem:[#allocation2 + $0x90] sm:$0xf]  ;;  %v607_v20 = vor.u32 %v605_v56, %v604_v63 }
  0x83   : > { %v2209_v16 = vrot.slane %v2208_v8, 4  ;;  %v2213_v17 = vrot.slane %v2211_v9, 5  ;;  %v1923_v38 = vld [vmem:[#allocation2 + $0x94] sm:$0xf]  ;;  %v2226_v21 = vshrl.u32 %v1922_v18, 16  ;;  %v2229_v23 = vshll.u32 %v1922_v18, 16 }
  0x84   : > { %v2200_v32 = vsel %vm6048_vm11, %v2195_v6, %v2199_v11  ;;  %v2235_v24 = vshll.u32 %v1923_v38, 16  ;;  %v795_v26 = vld [vmem:[#allocation2 + $0x8c] sm:$0x1]  ;;  %v2217_v30 = vrot.slane %v2215_v10, 4  ;;  %v615_v36 = vor.u32 %v613_v4, %v6293_v14  ;;  %v389_v39 = vld [vmem:[%s5996_s30 + $0x68] sm:$0xf] }
  0x85   : > { %v2214_v57 = vsel %vm6048_vm11, %v2209_v16, %v2213_v17  ;;  %2363 = vrot.lane.b32.xlu1 %v2200_v32, %s5880_s4  ;;  %v796_v27 = vsel %vm5966_vm4, %v583_v55, %v795_v26  ;;  %v805_v33 = vld [vmem:[#allocation2 + $0x9c] sm:$0xf]  ;;  %v2228_v35 = vrot.slane %v2226_v21, 4  ;;  %v2231_v28 = vrot.slane %v2229_v23, 5  ;;  %v390_v40 = vld [vmem:[%s5996_s30 + $0x6c] sm:$0xf] }
  0x86   : > { %797 = vst [vmem:[#allocation2 + $0x8c] sm:$0x1] %v796_v27  ;;  %2365 = vrot.lane.b32.xlu0 %v2214_v57, %s5880_s4  ;;  %v6307_v42 = vrot.slane %v2235_v24, 5  ;;  %v2239_v43 = vshrl.u32 %v1923_v38, 16  ;;  %v806_v25 = vsel %vm6005_vm7, %v607_v20, %v805_v33  ;;  %v282_v44 = vsel %vm5971_vm5, 0, %v281_v15 }
  0x87   : > { %v284_v45 = vld [vmem:[#allocation2 + $0xa4] sm:$0x1]  ;;  %v2232_v47 = vor.u32 %v2231_v28, %v2228_v35  ;;  %v2218_v48 = vor.u32 %v2217_v30, %v2213_v17  ;;  %v616_v49 = vsel %vm6018_vm10, %v608_v12, %v615_v36  ;;  %807 = vst [vmem:[#allocation2 + $0x9c] sm:$0xf] %v806_v25  ;;  %283 = vst [vmem:[#allocation2 + $0x98] sm:$0x1] %v282_v44 }
  0x88   : > { %v232_v50 = vsel %vm5966_vm4, 0, %v231_v34  ;;  %v234_v31 = vld [vmem:[#allocation2 + $0xb4] sm:$0x1]  ;;  %808 = vst.msk [vmem:[#allocation2 + $0xa0] sm:$0xf] %vm303_vm3, %v616_v49  ;;  %v600_v51 = vrot.slane %v6263_v19, 4 }
  0x89   : > { %233 = vst [vmem:[#allocation2 + $0xa8] sm:$0x1] %v232_v50  ;;  %v619_v13 = vshrl.u32 %v389_v39, 16  ;;  %v627_v52 = vshrl.u32 %v390_v40, 16  ;;  %v391_v46 = vld [vmem:[%s5996_s30 + $0x70] sm:$0xf] }
  0x8a   : > { %v2233_v53 = vrot.slane %v2232_v47, 4  ;;  %v622_v37 = vshll.u32 %v389_v39, 16  ;;  %v630_v54 = vshll.u32 %v390_v40, 16  ;;  %v285_v55 = vsel %vm5971_vm5, 0, %v284_v45  ;;  %v392_v56 = vld [vmem:[%s5996_s30 + $0x74] sm:$0xf] }
  0x8b   : > { %v6323_v58 = vrot.slane %v2239_v43, 4  ;;  %v621_v60 = vrot.slane %v619_v13, 7  ;;  %v6325_v62 = vrot.slane %v627_v52, 7  ;;  %286 = vst [vmem:[#allocation2 + $0xa4] sm:$0x1] %v285_v55  ;;  %v235_v19 = vsel %vm5966_vm4, 0, %v234_v31 }
  0x8c   : > { %v287_v63 = vld [vmem:[#allocation2 + $0xb0] sm:$0x1]  ;;  %v2238_v1 = vsel %vm6048_vm11, %v2233_v53, %v6307_v42  ;;  %v2219_v3 = vrot.slane %v2218_v48, 4  ;;  %v617_v5 = vrot.slane %v6293_v14, 4  ;;  %236 = vst [vmem:[#allocation2 + $0xb4] sm:$0x1] %v235_v19 }
  0x8d   : > { %v636_v59 = vshrl.u32 %v391_v46, 16  ;;  %2369 = vrot.lane.b32.xlu0 %v2238_v1, %s5880_s4  ;;  %v1921_v6 = vld [vmem:[#allocation2 + $0x8c] sm:$0x1]  ;;  %v625_v7 = vrot.slane %v621_v60, 4  ;;  %v632_v8 = vor.u32 %v630_v54, %v6325_v62  ;;  %v639_v9 = vshll.u32 %v391_v46, 16 }
  0x8e   : > { %v644_v10 = vshrl.u32 %v392_v56, 16  ;;  %v2221_v4 = vshll.u32 %v1921_v6, 16  ;;  %v624_v61 = vor.u32 %v622_v37, %v621_v60  ;;  %v288_v12 = vsel %vm5971_vm5, 0, %v287_v63  ;;  %v1925_v15 = vld [vmem:[#allocation2 + $0x9c] sm:$0xf] }
  0x8f   : > { %v638_v11 = vrot.slane %v636_v59, 7  ;;  %v802_v16 = vld [vmem:[#allocation2 + $0x98] sm:$0x1]  ;;  %v633_v14 = vsel %vm6018_vm10, %v625_v7, %v632_v8  ;;  %v647_v18 = vshll.u32 %v392_v56, 16  ;;  %289 = vst [vmem:[#allocation2 + $0xb0] sm:$0x1] %v288_v12  ;;  %v2242_v50 = vor.u32 %v6323_v58, %v6307_v42 }
  0x90   : > { %v6339_v17 = vrot.slane %v644_v10, 7  ;;  %v2223_v38 = vrot.slane %v2221_v4, 5  ;;  %v1926_v20 = vld [vmem:[#allocation2 + $0xa0] sm:$0xf]  ;;  %v2250_v32 = vshrl.u32 %v1925_v15, 16  ;;  %v2253_v21 = vshll.u32 %v1925_v15, 16 }
  0x91   : > { %v803_v23 = vsel %vm5966_vm4, %v600_v51, %v802_v16  ;;  %815 = vst.msk [vmem:[#allocation2 + $0xac] sm:$0xf] %vm303_vm3, %v633_v14  ;;  %v2259_v24 = vshll.u32 %v1926_v20, 16  ;;  %v2263_v26 = vshrl.u32 %v1926_v20, 16  ;;  %v812_v57 = vld [vmem:[#allocation2 + $0xa8] sm:$0xf]  ;;  %v641_v27 = vor.u32 %v639_v9, %v638_v11 }
  0x92   : > { %804 = vst [vmem:[#allocation2 + $0x98] sm:$0x1] %v803_v23  ;;  %v642_v30 = vrot.slane %v638_v11, 4  ;;  %v2224_v33 = vsel %vm6048_vm11, %v2219_v3, %v2223_v38  ;;  %v2252_v34 = vrot.slane %v2250_v32, 4  ;;  %v2255_v35 = vrot.slane %v2253_v21, 5 }
  0x93   : > { %v813_v28 = vsel %vm6005_vm7, %v624_v61, %v812_v57  ;;  %v809_v36 = vld [vmem:[#allocation2 + $0xa4] sm:$0x1]  ;;  %2367 = vrot.lane.b32.xlu1 %v2224_v33, %s5880_s4  ;;  %v649_v40 = vor.u32 %v647_v18, %v6339_v17  ;;  %v819_v43 = vld [vmem:[#allocation2 + $0xb4] sm:$0xf]  ;;  %v634_v25 = vrot.slane %v6325_v62, 4  ;;  %v2261_v47 = vrot.slane %v2259_v24, 5 }
  0x94   : > { %814 = vst [vmem:[#allocation2 + $0xa8] sm:$0xf] %v813_v28  ;;  %v810_v39 = vsel %vm5966_vm4, %v617_v5, %v809_v36  ;;  %v290_v44 = vld [vmem:[#allocation2 + $0xbc] sm:$0x1]  ;;  %v2256_v45 = vor.u32 %v2255_v35, %v2252_v34  ;;  %v2265_v48 = vrot.slane %v2263_v26, 4  ;;  %v820_v49 = vsel %vm6005_vm7, %v641_v27, %v819_v43 }
  0x95   : > { %811 = vst [vmem:[#allocation2 + $0xa4] sm:$0x1] %v810_v39  ;;  %v650_v31 = vsel %vm6018_vm10, %v642_v30, %v649_v40  ;;  %821 = vst [vmem:[#allocation2 + $0xb4] sm:$0xf] %v820_v49  ;;  %v291_v52 = vsel %vm5971_vm5, 0, %v290_v44  ;;  %v2243_v60 = vrot.slane %v2242_v50, 4 }
  0x96   : > { %v2257_v51 = vrot.slane %v2256_v45, 4  ;;  %822 = vst.msk [vmem:[#allocation2 + $0xb8] sm:$0xf] %vm303_vm3, %v650_v31  ;;  %v816_v13 = vld [vmem:[#allocation2 + $0xb0] sm:$0x1]  ;;  %v2266_v58 = vor.u32 %v2265_v48, %v2261_v47  ;;  %v651_v7 = vrot.slane %v6339_v17, 4 }
  0x97   : > { %v817_v53 = vsel %vm5966_vm4, %v634_v25, %v816_v13  ;;  %292 = vst [vmem:[#allocation2 + $0xbc] sm:$0x1] %v291_v52  ;;  %v1822_v37 = vld [vmem:[#allocation2 + $0x4] sm:$0xf]  ;;  %v1821_v34 = vld [vmem:[#allocation2] sm:$0xf] }
  0x98   : > { %v1929_v46 = vld [vmem:[#allocation2 + $0xac] sm:$0xf]  ;;  %v2262_v42 = vsel %vm6048_vm11, %v2257_v51, %v2261_v47  ;;  %818 = vst [vmem:[#allocation2 + $0xb0] sm:$0x1] %v817_v53  ;;  %1855 = vst.msk [vmem:[#allocation3 + $0x4] sm:$0xf] %vm303_vm3, %v1822_v37 }
  0x99   : > { %v1924_v54 = vld [vmem:[#allocation2 + $0x98] sm:$0x1]  ;;  %v2283_v55 = vshll.u32 %v1929_v46, 16  ;;  %v2287_v56 = vshrl.u32 %v1929_v46, 16  ;;  %2373 = vrot.lane.b32.xlu0 %v2262_v42, %s5880_s4  ;;  %v2267_v8 = vrot.slane %v2266_v58, 4  ;;  %vm2757_vm0 = vcmask 93248  }
  0x9a   : > { %v2245_v62 = vshll.u32 %v1924_v54, 16  ;;  %1854 = vst.msk [vmem:[#allocation3] sm:$0xf] %vm303_vm3, %v1821_v34  ;;  %v1823_v36 = vld [vmem:[#allocation2 + $0xc] sm:$0xf]  ;;  %vm2951_vm1 = vcmask 126048  }
  0x9b   : > { %v1928_v19 = vld [vmem:[#allocation2 + $0xa8] sm:$0xf]  ;;  %v2285_v63 = vrot.slane %v2283_v55, 5  ;;  %v2289_v1 = vrot.slane %v2287_v56, 4  ;;  %v2450_v43 = vld [vmem:[#allocation2] sm:$0xe] }
  0x9c   : > { %v2247_v3 = vrot.slane %v2245_v62, 5  ;;  %v2274_v5 = vshrl.u32 %v1928_v19, 16  ;;  %v2277_v59 = vshll.u32 %v1928_v19, 16  ;;  %v1927_v6 = vld [vmem:[#allocation2 + $0xa4] sm:$0x1]  ;;  %v5560_v31 = vrot.slane %v2450_v43, 9 }
  0x9d   : > { %v2269_v9 = vshll.u32 %v1927_v6, 16  ;;  %v1931_v10 = vld [vmem:[#allocation2 + $0xb4] sm:$0xf]  ;;  %v2290_v4 = vor.u32 %v2289_v1, %v2285_v63  ;;  %v1932_v15 = vld [vmem:[#allocation2 + $0xb8] sm:$0xf]  ;;  %vm5162_vm2 = vcmask 1041408  }
  0x9e   : > { %v2248_v61 = vsel %vm6048_vm11, %v2243_v60, %v2247_v3  ;;  %v2276_v11 = vrot.slane %v2274_v5, 4  ;;  %v2279_v12 = vrot.slane %v2277_v59, 5  ;;  %v2298_v16 = vshrl.u32 %v1931_v10, 16  ;;  %v823_v32 = vld [vmem:[#allocation2 + $0xbc] sm:$0x1] }
  0x9f   : > { %2371 = vrot.lane.b32.xlu1 %v2248_v61, %s5880_s4  ;;  %v2271_v14 = vrot.slane %v2269_v9, 5  ;;  %v2301_v18 = vshll.u32 %v1931_v10, 16  ;;  %v2307_v38 = vshll.u32 %v1932_v15, 16  ;;  %v2311_v20 = vshrl.u32 %v1932_v15, 16  ;;  %v1930_v23 = vld [vmem:[#allocation2 + $0xb0] sm:$0x1] }
  0xa0   : > { %v2280_v21 = vor.u32 %v2279_v12, %v2276_v11  ;;  %v2300_v17 = vrot.slane %v2298_v16, 4  ;;  %v2291_v24 = vrot.slane %v2290_v4, 4  ;;  %v824_v26 = vsel %vm5966_vm4, %v651_v7, %v823_v32  ;;  %v2451_v25 = vld [vmem:[#allocation2 + $0x4] sm:$0xf]  ;;  %1856 = vst.msk [vmem:[#allocation3 + $0x8] sm:$0xf] %vm303_vm3, %v1823_v36 }
  0xa1   : > { %v2272_v57 = vsel %vm6048_vm11, %v2267_v8, %v2271_v14  ;;  %v2303_v27 = vrot.slane %v2301_v18, 5  ;;  %v2309_v30 = vrot.slane %v2307_v38, 5  ;;  %v2293_v33 = vshll.u32 %v1930_v23, 16  ;;  %825 = vst [vmem:[#allocation2 + $0xbc] sm:$0x1] %v824_v26 }
  0xa2   : > { %v2281_v35 = vrot.slane %v2280_v21, 4  ;;  %v2313_v28 = vrot.slane %v2311_v20, 4  ;;  %v1825_v49 = vld [vmem:[#allocation2 + $0x18] sm:$0xf]  ;;  %v1824_v50 = vld [vmem:[#allocation2 + $0x10] sm:$0xf] }
  0xa3   : > { %2375 = vrot.lane.b32.xlu1 %v2272_v57, %s5880_s4  ;;  %v2304_v39 = vor.u32 %v2303_v27, %v2300_v17  ;;  %v2295_v40 = vrot.slane %v2293_v33, 5  ;;  %v2551_v51 = vrot.slane %v2451_v25, 5  ;;  %1858 = vst.msk [vmem:[#allocation3 + $0x10] sm:$0xf] %vm303_vm3, %v1825_v49  ;;  %1857 = vst.msk [vmem:[#allocation3 + $0xc] sm:$0xf] %vm303_vm3, %v1824_v50 }
  0xa4   : > { %v2286_v44 = vsel %vm6048_vm11, %v2281_v35, %v2285_v63  ;;  %v2314_v48 = vor.u32 %v2313_v28, %v2309_v30  ;;  %v2453_v46 = vld [vmem:[#allocation2 + $0xc] sm:$0xe]  ;;  %v2454_v53 = vld [vmem:[#allocation2 + $0x10] sm:$0xf]  ;;  %v2452_v42 = vld [vmem:[#allocation2 + $0x8] sm:$0x1]  ;;  %v2324_v63 = vpop.permute.xlu0 %2323 }
  0xa5   : > { %2377 = vrot.lane.b32.xlu0 %v2286_v44, %s5880_s4  ;;  %v2305_v45 = vrot.slane %v2304_v39, 4  ;;  %v2296_v47 = vsel %vm6048_vm11, %v2291_v24, %v2295_v40  ;;  %v1827_v56 = vld [vmem:[#allocation2 + $0x24] sm:$0xf]  ;;  %v2552_v58 = vsel %vm6389_vm14, %v5560_v31, %v2551_v51  ;;  %v5561_v60 = vrot.slane %v2453_v46, 9  ;;  %v2456_v19 = vld [vmem:[#allocation2 + $0x18] sm:$0xe] }
  0xa6   : > { %v2315_v54 = vrot.slane %v2314_v48, 4  ;;  %v2558_v62 = vrot.slane %v2454_v53, 5  ;;  %1860 = vst.msk [vmem:[#allocation3 + $0x18] sm:$0xf] %vm303_vm3, %v1827_v56  ;;  %v1826_v1 = vld [vmem:[#allocation2 + $0x1c] sm:$0xf] }
  0xa7   : > { %v2310_v13 = vsel %vm6048_vm11, %v2305_v45, %v2309_v30  ;;  %2379 = vrot.lane.b32.xlu1 %v2296_v47, %s5880_s4  ;;  %v2553_v5 = vrot.slane %v2551_v51, 4  ;;  %v2554_v59 = vrot.slane %v2452_v42, 5  ;;  %v2457_v6 = vld [vmem:[#allocation2 + $0x1c] sm:$0xf]  ;;  %1859 = vst.msk [vmem:[#allocation3 + $0x14] sm:$0xf] %vm303_vm3, %v1826_v1 }
  0xa8   : > { %v1933_v37 = vld [vmem:[#allocation2 + $0xbc] sm:$0x1]  ;;  %v2455_v7 = vld [vmem:[#allocation2 + $0x14] sm:$0x1]  ;;  %v1829_v8 = vld [vmem:[#allocation2 + $0x30] sm:$0xf]  ;;  %v2559_v4 = vsel %vm6389_vm14, %v5561_v60, %v2558_v62  ;;  %v2322_v15 = vpop.permute.xlu0 %2321 }
  0xa9   : > { %2381 = vrot.lane.b32.xlu0 %v2310_v13, %s5880_s4  ;;  %v2317_v55 = vshll.u32 %v1933_v37, 16  ;;  %1862 = vst.msk [vmem:[#allocation3 + $0x20] sm:$0xf] %vm303_vm3, %v1829_v8  ;;  %v1828_v10 = vld [vmem:[#allocation2 + $0x28] sm:$0xf]  ;;  %v5562_v61 = vrot.slane %v2456_v19, 9  ;;  %v2555_v16 = vsel %vm6389_vm14, %v2553_v5, %v2554_v59 }
  0xaa   : > { %v2565_v11 = vrot.slane %v2457_v6, 5  ;;  %v2459_v12 = vld [vmem:[#allocation2 + $0x24] sm:$0xe]  ;;  %1861 = vst.msk [vmem:[#allocation3 + $0x1c] sm:$0xf] %vm303_vm3, %v1828_v10  ;;  %v2560_v14 = vrot.slane %v2558_v62, 4 }
  0xab   : > { %v2319_v3 = vrot.slane %v2317_v55, 5  ;;  %v2561_v18 = vrot.slane %v2455_v7, 5  ;;  %v2460_v38 = vld [vmem:[#allocation2 + $0x28] sm:$0xf]  ;;  %v1831_v20 = vld [vmem:[#allocation2 + $0x3c] sm:$0xf]  ;;  %v2326_v23 = vpop.permute.xlu1 %2325 }
  0xac   : > { %v2458_v32 = vld [vmem:[#allocation2 + $0x20] sm:$0x1]  ;;  %1864 = vst.msk [vmem:[#allocation3 + $0x28] sm:$0xf] %vm303_vm3, %v1831_v20  ;;  %v1830_v21 = vld [vmem:[#allocation2 + $0x34] sm:$0xf]  ;;  %v2566_v24 = vsel %vm6389_vm14, %v5562_v61, %v2565_v11 }
  0xad   : > { %2661 = vrot.lane.b32.xlu0 %v2552_v58, %s5881_s5  ;;  %v2320_v9 = vsel %vm6048_vm11, %v2315_v54, %v2319_v3  ;;  %v2462_v17 = vld [vmem:[#allocation2 + $0x30] sm:$0xe]  ;;  %1863 = vst.msk [vmem:[#allocation3 + $0x24] sm:$0xf] %vm303_vm3, %v1830_v21  ;;  %v5563_v26 = vrot.slane %v2459_v12, 9  ;;  %v2572_v57 = vrot.slane %v2460_v38, 5  ;;  %v2562_v33 = vsel %vm6389_vm14, %v2560_v14, %v2561_v18  ;;  %v2330_v28 = vpop.permute.xlu0 %2329 }
  0xae   : > { %2383 = vrot.lane.b32.xlu1 %v2320_v9, %s5880_s4  ;;  %v2463_v27 = vld [vmem:[#allocation2 + $0x34] sm:$0xf]  ;;  %v1833_v30 = vld [vmem:[#allocation2 + $0x48] sm:$0xf]  ;;  %v2567_v34 = vrot.slane %v2565_v11, 4  ;;  %v2568_v35 = vrot.slane %v2458_v32, 5 }
  0xaf   : > { %1866 = vst.msk [vmem:[#allocation3 + $0x30] sm:$0xf] %vm303_vm3, %v1833_v30  ;;  %v1832_v36 = vld [vmem:[#allocation2 + $0x40] sm:$0xf]  ;;  %v2461_v39 = vld [vmem:[#allocation2 + $0x2c] sm:$0x1]  ;;  %v2328_v40 = vpop.permute.xlu1 %2327  ;;  %v2573_v25 = vsel %vm6389_vm14, %v5563_v26, %v2572_v57 }
  0xb0   : > { %2419 = vst.msk [vmem:[#allocation3 + $0x4] sm:$0xf] %vm2417_vm15, %v2324_v63  ;;  %2418 = vst.msk [vmem:[#allocation3] sm:$0xf] %vm2417_vm15, %v2322_v15  ;;  %v1835_v43 = vld [vmem:[#allocation2 + $0x54] sm:$0xf]  ;;  %v2569_v48 = vsel %vm6389_vm14, %v2567_v34, %v2568_v35 }
  0xb1   : > { %2665 = vrot.lane.b32.xlu0 %v2559_v4, %s5881_s5  ;;  %2420 = vst.msk [vmem:[#allocation3 + $0x8] sm:$0xf] %vm2417_vm15, %v2326_v23  ;;  %2422 = vst.msk [vmem:[#allocation3 + $0x10] sm:$0xf] %vm2417_vm15, %v2330_v28  ;;  %v5564_v44 = vrot.slane %v2462_v17, 9  ;;  %v2579_v45 = vrot.slane %v2463_v27, 5 }
  0xb2   : > { %2663 = vrot.lane.b32.xlu1 %v2555_v16, %s5881_s5  ;;  %1865 = vst.msk [vmem:[#allocation3 + $0x2c] sm:$0xf] %vm303_vm3, %v1832_v36  ;;  %1868 = vst.msk [vmem:[#allocation3 + $0x38] sm:$0xf] %vm303_vm3, %v1835_v43  ;;  %v1834_v47 = vld [vmem:[#allocation2 + $0x4c] sm:$0xf] }
  0xb3   : > { %2421 = vst.msk [vmem:[#allocation3 + $0xc] sm:$0xf] %vm2417_vm15, %v2328_v40  ;;  %v2574_v49 = vrot.slane %v2572_v57, 4  ;;  %v2575_v50 = vrot.slane %v2461_v39, 5  ;;  %v2465_v31 = vld [vmem:[#allocation2 + $0x3c] sm:$0xe]  ;;  %v2334_v46 = vpop.permute.xlu0 %2333  ;;  %v2332_v42 = vpop.permute.xlu1 %2331  ;;  %v2580_v55 = vsel %vm6389_vm14, %v5564_v44, %v2579_v45 }
  0xb4   : > { %v2466_v51 = vld [vmem:[#allocation2 + $0x40] sm:$0xf]  ;;  %1867 = vst.msk [vmem:[#allocation3 + $0x34] sm:$0xf] %vm303_vm3, %v1834_v47  ;;  %v2464_v13 = vld [vmem:[#allocation2 + $0x38] sm:$0x1] }
  0xb5   : > { %2669 = vrot.lane.b32.xlu0 %v2566_v24, %s5881_s5  ;;  %v1837_v53 = vld [vmem:[#allocation2 + $0x60] sm:$0xf]  ;;  %v2468_v37 = vld [vmem:[#allocation2 + $0x48] sm:$0xe]  ;;  %2424 = vst.msk [vmem:[#allocation3 + $0x18] sm:$0xf] %vm2417_vm15, %v2334_v46  ;;  %v2576_v19 = vsel %vm6389_vm14, %v2574_v49, %v2575_v50 }
  0xb6   : > { %2667 = vrot.lane.b32.xlu1 %v2562_v33, %s5881_s5  ;;  %1870 = vst.msk [vmem:[#allocation3 + $0x40] sm:$0xf] %vm303_vm3, %v1837_v53  ;;  %v1836_v54 = vld [vmem:[#allocation2 + $0x58] sm:$0xf]  ;;  %v5565_v56 = vrot.slane %v2465_v31, 9  ;;  %v2586_v58 = vrot.slane %v2466_v51, 5 }
  0xb7   : > { %2423 = vst.msk [vmem:[#allocation3 + $0x14] sm:$0xf] %vm2417_vm15, %v2332_v42  ;;  %v1839_v60 = vld [vmem:[#allocation2 + $0x6c] sm:$0xf]  ;;  %v1838_v62 = vld [vmem:[#allocation2 + $0x64] sm:$0xf] }
  0xb8   : > { %1869 = vst.msk [vmem:[#allocation3 + $0x3c] sm:$0xf] %vm303_vm3, %v1836_v54  ;;  %v2581_v63 = vrot.slane %v2579_v45, 4  ;;  %v2582_v1 = vrot.slane %v2464_v13, 5  ;;  %v2469_v3 = vld [vmem:[#allocation2 + $0x4c] sm:$0xf]  ;;  %v2587_v4 = vsel %vm6389_vm14, %v5565_v56, %v2586_v58 }
  0xb9   : > { %2673 = vrot.lane.b32.xlu0 %v2573_v25, %s5881_s5  ;;  %1872 = vst.msk [vmem:[#allocation3 + $0x48] sm:$0xf] %vm303_vm3, %v1839_v60  ;;  %1871 = vst.msk [vmem:[#allocation3 + $0x44] sm:$0xf] %vm303_vm3, %v1838_v62  ;;  %v1841_v5 = vld [vmem:[#allocation2 + $0x78] sm:$0xf] }
  0xba   : > { %2671 = vrot.lane.b32.xlu1 %v2569_v48, %s5881_s5  ;;  %v2467_v59 = vld [vmem:[#allocation2 + $0x44] sm:$0x1]  ;;  %v2471_v6 = vld [vmem:[#allocation2 + $0x54] sm:$0xe]  ;;  %1874 = vst.msk [vmem:[#allocation3 + $0x50] sm:$0xf] %vm303_vm3, %v1841_v5  ;;  %v2583_v16 = vsel %vm6389_vm14, %v2581_v63, %v2582_v1 }
  0xbb   : > { %v1840_v7 = vld [vmem:[#allocation2 + $0x70] sm:$0xf]  ;;  %v2472_v8 = vld [vmem:[#allocation2 + $0x58] sm:$0xf]  ;;  %v1843_v9 = vld [vmem:[#allocation2 + $0x84] sm:$0xf] }
  0xbc   : > { %1873 = vst.msk [vmem:[#allocation3 + $0x4c] sm:$0xf] %vm303_vm3, %v1840_v7  ;;  %v1842_v10 = vld [vmem:[#allocation2 + $0x7c] sm:$0xf]  ;;  %v5566_v61 = vrot.slane %v2468_v37, 9  ;;  %v2593_v11 = vrot.slane %v2469_v3, 5  ;;  %v2338_v30 = vpop.permute.xlu0 %2337 }
  0xbd   : > { %2677 = vrot.lane.b32.xlu0 %v2580_v55, %s5881_s5  ;;  %1876 = vst.msk [vmem:[#allocation3 + $0x58] sm:$0xf] %vm303_vm3, %v1843_v9  ;;  %1875 = vst.msk [vmem:[#allocation3 + $0x54] sm:$0xf] %vm303_vm3, %v1842_v10  ;;  %v1845_v12 = vld [vmem:[#allocation2 + $0x90] sm:$0xf] }
  0xbe   : > { %2675 = vrot.lane.b32.xlu1 %v2576_v19, %s5881_s5  ;;  %v1844_v15 = vld [vmem:[#allocation2 + $0x88] sm:$0xf]  ;;  %v2588_v14 = vrot.slane %v2586_v58, 4  ;;  %v2589_v18 = vrot.slane %v2467_v59, 5  ;;  %1878 = vst.msk [vmem:[#allocation3 + $0x60] sm:$0xf] %vm303_vm3, %v1845_v12  ;;  %v2594_v57 = vsel %vm6389_vm14, %v5566_v61, %v2593_v11  ;;  %v2336_v43 = vpop.permute.xlu1 %2335 }
  0xbf   : > { %1877 = vst.msk [vmem:[#allocation3 + $0x5c] sm:$0xf] %vm303_vm3, %v1844_v15  ;;  %v1847_v38 = vld [vmem:[#allocation2 + $0x9c] sm:$0xf]  ;;  %v2470_v20 = vld [vmem:[#allocation2 + $0x50] sm:$0x1] }
  0xc0   : > { %v2474_v32 = vld [vmem:[#allocation2 + $0x60] sm:$0xe]  ;;  %1880 = vst.msk [vmem:[#allocation3 + $0x68] sm:$0xf] %vm303_vm3, %v1847_v38  ;;  %v1846_v21 = vld [vmem:[#allocation2 + $0x94] sm:$0xf]  ;;  %v2590_v35 = vsel %vm6389_vm14, %v2588_v14, %v2589_v18 }
  0xc1   : > { %2681 = vrot.lane.b32.xlu0 %v2587_v4, %s5881_s5  ;;  %v5567_v17 = vrot.slane %v2471_v6, 9  ;;  %v2600_v23 = vrot.slane %v2472_v8, 5  ;;  %1879 = vst.msk [vmem:[#allocation3 + $0x64] sm:$0xf] %vm303_vm3, %v1846_v21  ;;  %v1849_v24 = vld [vmem:[#allocation2 + $0xa8] sm:$0xf] }
  0xc2   : > { %v1848_v26 = vld [vmem:[#allocation2 + $0xa0] sm:$0xf]  ;;  %2679 = vrot.lane.b32.xlu1 %v2583_v16, %s5881_s5  ;;  %v2475_v27 = vld [vmem:[#allocation2 + $0x64] sm:$0xf]  ;;  %1882 = vst.msk [vmem:[#allocation3 + $0x70] sm:$0xf] %vm303_vm3, %v1849_v24 }
  0xc3   : > { %1881 = vst.msk [vmem:[#allocation3 + $0x6c] sm:$0xf] %vm303_vm3, %v1848_v26  ;;  %v1851_v33 = vld [vmem:[#allocation2 + $0xb4] sm:$0xf]  ;;  %v1850_v34 = vld [vmem:[#allocation2 + $0xac] sm:$0xf]  ;;  %v2601_v25 = vsel %vm6389_vm14, %v5567_v17, %v2600_v23 }
  0xc4   : > { %v2595_v28 = vrot.slane %v2593_v11, 4  ;;  %v2596_v36 = vrot.slane %v2470_v20, 5  ;;  %v2473_v39 = vld [vmem:[#allocation2 + $0x5c] sm:$0x1]  ;;  %2426 = vst.msk [vmem:[#allocation3 + $0x20] sm:$0xf] %vm2417_vm15, %v2338_v30 }
  0xc5   : > { %1884 = vst.msk [vmem:[#allocation3 + $0x78] sm:$0xf] %vm303_vm3, %v1851_v33  ;;  %1883 = vst.msk [vmem:[#allocation3 + $0x74] sm:$0xf] %vm303_vm3, %v1850_v34  ;;  %v1852_v40 = vld [vmem:[#allocation2 + $0xb8] sm:$0xf]  ;;  %2685 = vrot.lane.b32.xlu0 %v2594_v57, %s5881_s5 }
  0xc6   : > { %1885 = vst.msk [vmem:[#allocation3 + $0x7c] sm:$0xf] %vm303_vm3, %v1852_v40  ;;  %v5568_v44 = vrot.slane %v2474_v32, 9  ;;  %v2607_v45 = vrot.slane %v2475_v27, 5  ;;  %v237_v47 = vld [vmem:[#allocation2 + $0xc0] sm:$0x1]  ;;  %2683 = vrot.lane.b32.xlu1 %v2590_v35, %s5881_s5  ;;  %v2597_v46 = vsel %vm6389_vm14, %v2595_v28, %v2596_v36 }
  0xc7   : > { %2425 = vst.msk [vmem:[#allocation3 + $0x1c] sm:$0xf] %vm2417_vm15, %v2336_v43  ;;  %v393_v48 = vld [vmem:[%s5996_s30 + $0x78] sm:$0xf]  ;;  %v2602_v49 = vrot.slane %v2600_v23, 4  ;;  %v2603_v50 = vrot.slane %v2473_v39, 5 }
  0xc8   : > { %v2477_v31 = vld [vmem:[#allocation2 + $0x6c] sm:$0xe]  ;;  %v238_v51 = vsel %vm5966_vm4, 0, %v237_v47  ;;  %v653_v13 = vshrl.u32 %v393_v48, 16  ;;  %v2478_v53 = vld [vmem:[#allocation2 + $0x70] sm:$0xf]  ;;  %v2608_v56 = vsel %vm6389_vm14, %v5568_v44, %v2607_v45 }
  0xc9   : > { %239 = vst [vmem:[#allocation2 + $0xc0] sm:$0x1] %v238_v51  ;;  %v656_v37 = vshll.u32 %v393_v48, 16  ;;  %v394_v42 = vld [vmem:[%s5996_s30 + $0x7c] sm:$0xf]  ;;  %2689 = vrot.lane.b32.xlu0 %v2601_v25, %s5881_s5  ;;  %v2604_v62 = vsel %vm6389_vm14, %v2602_v49, %v2603_v50  ;;  %v5569_v19 = vrot.slane %v2477_v31, 9 }
  0xca   : > { %v2476_v54 = vld [vmem:[#allocation2 + $0x68] sm:$0x1]  ;;  %v655_v55 = vrot.slane %v653_v13, 7  ;;  %v661_v58 = vshrl.u32 %v394_v42, 16  ;;  %v664_v60 = vshll.u32 %v394_v42, 16  ;;  %2687 = vrot.lane.b32.xlu1 %v2597_v46, %s5881_s5  ;;  %v2614_v63 = vrot.slane %v2478_v53, 5 }
  0xcb   : > { %v2609_v1 = vrot.slane %v2607_v45, 4  ;;  %v2480_v3 = vld [vmem:[#allocation2 + $0x78] sm:$0xe]  ;;  %v2610_v5 = vrot.slane %v2476_v54, 5  ;;  %v2481_v59 = vld [vmem:[#allocation2 + $0x7c] sm:$0xf]  ;;  %v2342_v20 = vpop.permute.xlu0 %2341 }
  0xcc   : > { %v658_v6 = vor.u32 %v656_v37, %v655_v55  ;;  %v659_v7 = vrot.slane %v655_v55, 4  ;;  %v6486_v8 = vrot.slane %v661_v58, 7  ;;  %v2479_v9 = vld [vmem:[#allocation2 + $0x74] sm:$0x1]  ;;  %v2615_v4 = vsel %vm6389_vm14, %v5569_v19, %v2614_v63  ;;  %v2483_v18 = vld [vmem:[#allocation2 + $0x84] sm:$0xe]  ;;  %v2340_v23 = vpop.permute.xlu1 %2339 }
  0xcd   : > { %2693 = vrot.lane.b32.xlu0 %v2608_v56, %s5881_s5  ;;  %v5570_v61 = vrot.slane %v2480_v3, 9  ;;  %v2621_v11 = vrot.slane %v2481_v59, 5  ;;  %v2616_v12 = vrot.slane %v2614_v63, 4  ;;  %v2611_v16 = vsel %vm6389_vm14, %v2609_v1, %v2610_v5  ;;  %v2484_v38 = vld [vmem:[#allocation2 + $0x88] sm:$0xf] }
  0xce   : > { %v666_v10 = vor.u32 %v664_v60, %v6486_v8  ;;  %2691 = vrot.lane.b32.xlu1 %v2604_v62, %s5881_s5  ;;  %v2617_v14 = vrot.slane %v2479_v9, 5  ;;  %v2482_v17 = vld [vmem:[#allocation2 + $0x80] sm:$0x1]  ;;  %2428 = vst.msk [vmem:[#allocation3 + $0x28] sm:$0xf] %vm2417_vm15, %v2342_v20  ;;  %v5571_v26 = vrot.slane %v2483_v18, 9 }
  0xcf   : > { %2427 = vst.msk [vmem:[#allocation3 + $0x24] sm:$0xf] %vm2417_vm15, %v2340_v23  ;;  %v2622_v24 = vsel %vm6389_vm14, %v5570_v61, %v2621_v11  ;;  %v2628_v57 = vrot.slane %v2484_v38, 5  ;;  %v2623_v27 = vrot.slane %v2621_v11, 4  ;;  %v2624_v30 = vrot.slane %v2482_v17, 5 }
  0xd0   : > { %v826_v15 = vld [vmem:[#allocation2 + $0xc0] sm:$0xf]  ;;  %v667_v21 = vsel %vm6018_vm10, %v659_v7, %v666_v10  ;;  %v2618_v41 = vsel %vm6389_vm14, %v2616_v12, %v2617_v14  ;;  %v2486_v33 = vld [vmem:[#allocation2 + $0x90] sm:$0xe]  ;;  %v2487_v34 = vld [vmem:[#allocation2 + $0x94] sm:$0xf]  ;;  %v2344_v28 = vpop.permute.xlu1 %2343 }
  0xd1   : > { %v827_v32 = vsel %vm6005_vm7, %v658_v6, %v826_v15  ;;  %829 = vst.msk [vmem:[#allocation2 + $0xc4] sm:$0xf] %vm303_vm3, %v667_v21  ;;  %2697 = vrot.lane.b32.xlu0 %v2615_v4, %s5881_s5  ;;  %v2485_v35 = vld [vmem:[#allocation2 + $0x8c] sm:$0x1]  ;;  %v2346_v36 = vpop.permute.xlu0 %2345  ;;  %v2629_v39 = vsel %vm6389_vm14, %v5571_v26, %v2628_v57  ;;  %v5572_v40 = vrot.slane %v2486_v33, 9  ;;  %v2635_v43 = vrot.slane %v2487_v34, 5 }
  0xd2   : > { %828 = vst [vmem:[#allocation2 + $0xc0] sm:$0xf] %v827_v32  ;;  %2695 = vrot.lane.b32.xlu1 %v2611_v16, %s5881_s5  ;;  %2429 = vst.msk [vmem:[#allocation3 + $0x2c] sm:$0xf] %vm2417_vm15, %v2344_v28  ;;  %v2625_v25 = vsel %vm6389_vm14, %v2623_v27, %v2624_v30  ;;  %v2630_v44 = vrot.slane %v2628_v57, 4  ;;  %v2631_v45 = vrot.slane %v2485_v35, 5 }
  0xd3   : > { %2430 = vst.msk [vmem:[#allocation3 + $0x30] sm:$0xf] %vm2417_vm15, %v2346_v36  ;;  %v2489_v47 = vld [vmem:[#allocation2 + $0x9c] sm:$0xe]  ;;  %v2490_v48 = vld [vmem:[#allocation2 + $0xa0] sm:$0xf]  ;;  %v2636_v31 = vsel %vm6389_vm14, %v5572_v40, %v2635_v43 }
  0xd4   : > { %v2488_v49 = vld [vmem:[#allocation2 + $0x98] sm:$0x1]  ;;  %v5573_v51 = vrot.slane %v2489_v47, 9  ;;  %v2642_v13 = vrot.slane %v2490_v48, 5  ;;  %v2632_v46 = vsel %vm6389_vm14, %v2630_v44, %v2631_v45  ;;  %v2637_v53 = vrot.slane %v2635_v43, 4 }
  0xd5   : > { %2701 = vrot.lane.b32.xlu0 %v2622_v24, %s5881_s5  ;;  %v2638_v37 = vrot.slane %v2488_v49, 5  ;;  %v2492_v42 = vld [vmem:[#allocation2 + $0xa8] sm:$0xe]  ;;  %v2493_v54 = vld [vmem:[#allocation2 + $0xac] sm:$0xf]  ;;  %vm3512_vm3 = vcmask 158848  }
  0xd6   : > { %2699 = vrot.lane.b32.xlu1 %v2618_v41, %s5881_s5  ;;  %v2348_v50 = vpop.permute.xlu1 %2347  ;;  %v2491_v56 = vld [vmem:[#allocation2 + $0xa4] sm:$0x1]  ;;  %v2643_v58 = vsel %vm6389_vm14, %v5573_v51, %v2642_v13  ;;  %v5574_v60 = vrot.slane %v2492_v42, 9  ;;  %v2649_v62 = vrot.slane %v2493_v54, 5  ;;  %v2644_v63 = vrot.slane %v2642_v13, 4 }
  0xd7   : > { %2431 = vst.msk [vmem:[#allocation3 + $0x34] sm:$0xf] %vm2417_vm15, %v2348_v50  ;;  %v2639_v19 = vsel %vm6389_vm14, %v2637_v53, %v2638_v37  ;;  %v2645_v1 = vrot.slane %v2491_v56, 5  ;;  %v2495_v3 = vld [vmem:[#allocation2 + $0xb4] sm:$0xe]  ;;  %vm3849_vm6 = vcmask 191648  }
  0xd8   : > { %v2350_v55 = vpop.permute.xlu0 %2349  ;;  %v2496_v5 = vld [vmem:[#allocation2 + $0xb8] sm:$0xf]  ;;  %v2494_v59 = vld [vmem:[#allocation2 + $0xb0] sm:$0x1]  ;;  %v2650_v7 = vsel %vm6389_vm14, %v5574_v60, %v2649_v62  ;;  %v5575_v9 = vrot.slane %v2495_v3, 9  ;;  %v2651_v61 = vrot.slane %v2649_v62, 4 }
  0xd9   : > { %2705 = vrot.lane.b32.xlu0 %v2629_v39, %s5881_s5  ;;  %2432 = vst.msk [vmem:[#allocation3 + $0x38] sm:$0xf] %vm2417_vm15, %v2350_v55  ;;  %v2656_v10 = vrot.slane %v2496_v5, 5  ;;  %v2646_v4 = vsel %vm6389_vm14, %v2644_v63, %v2645_v1  ;;  %v2652_v11 = vrot.slane %v2494_v59, 5  ;;  %v2497_v12 = vld [vmem:[#allocation2 + $0xbc] sm:$0x1] }
  0xda   : > { %2703 = vrot.lane.b32.xlu1 %v2625_v25, %s5881_s5  ;;  %v2659_v18 = vrot.slane %v2497_v12, 5  ;;  %v2791_v20 = vld [vmem:[#allocation2 + $0xc] sm:$0xf]  ;;  %v2793_v23 = vld [vmem:[#allocation2 + $0x18] sm:$0xf]  ;;  %vm5113_vm8 = vcmask 293888  }
  0xdb   : > { %v2657_v15 = vsel %vm6389_vm14, %v5575_v9, %v2656_v10  ;;  %v2653_v16 = vsel %vm6389_vm14, %v2651_v61, %v2652_v11  ;;  %v2658_v14 = vrot.slane %v2656_v10, 4  ;;  %v2792_v24 = vld [vmem:[#allocation2 + $0x10] sm:$0xf]  ;;  %v2795_v26 = vld [vmem:[#allocation2 + $0x24] sm:$0xf] }
  0xdc   : > { %v2794_v57 = vld [vmem:[#allocation2 + $0x1c] sm:$0xf]  ;;  %v2797_v27 = vld [vmem:[#allocation2 + $0x30] sm:$0xf]  ;;  %v2796_v33 = vld [vmem:[#allocation2 + $0x28] sm:$0xf] }
  0xdd   : > { %2709 = vrot.lane.b32.xlu0 %v2636_v31, %s5881_s5  ;;  %v2354_v6 = vpop.permute.xlu0 %2353  ;;  %v2660_v32 = vsel %vm6389_vm14, %v2658_v14, %v2659_v18  ;;  %v2799_v35 = vld [vmem:[#allocation2 + $0x3c] sm:$0xf]  ;;  %v2798_v36 = vld [vmem:[#allocation2 + $0x34] sm:$0xf]  ;;  %v2801_v39 = vld [vmem:[#allocation2 + $0x48] sm:$0xf] }
  0xde   : > { %2707 = vrot.lane.b32.xlu1 %v2632_v46, %s5881_s5  ;;  %2434 = vst.msk [vmem:[#allocation3 + $0x40] sm:$0xf] %vm2417_vm15, %v2354_v6  ;;  %v2800_v40 = vld [vmem:[#allocation2 + $0x40] sm:$0xf]  ;;  %v2803_v25 = vld [vmem:[#allocation2 + $0x54] sm:$0xf] }
  0xdf   : > { %v2802_v44 = vld [vmem:[#allocation2 + $0x4c] sm:$0xf]  ;;  %v2805_v45 = vld [vmem:[#allocation2 + $0x60] sm:$0xf]  ;;  %v2804_v48 = vld [vmem:[#allocation2 + $0x58] sm:$0xf] }
  0xe0   : > { %v2807_v49 = vld [vmem:[#allocation2 + $0x6c] sm:$0xf]  ;;  %v2806_v50 = vld [vmem:[#allocation2 + $0x64] sm:$0xf]  ;;  %v2809_v51 = vld [vmem:[#allocation2 + $0x78] sm:$0xf] }
  0xe1   : > { %2713 = vrot.lane.b32.xlu0 %v2643_v58, %s5881_s5  ;;  %v2808_v13 = vld [vmem:[#allocation2 + $0x70] sm:$0xf]  ;;  %v2811_v53 = vld [vmem:[#allocation2 + $0x84] sm:$0xf]  ;;  %v2810_v37 = vld [vmem:[#allocation2 + $0x7c] sm:$0xf] }
  0xe2   : > { %2711 = vrot.lane.b32.xlu1 %v2639_v19, %s5881_s5  ;;  %v2813_v54 = vld [vmem:[#allocation2 + $0x90] sm:$0xf]  ;;  %v2984_v55 = vld [vmem:[#allocation2 + $0xc] sm:$0xf]  ;;  %v2812_v58 = vld [vmem:[#allocation2 + $0x88] sm:$0xf] }
  0xe3   : > { %v3033_v62 = vshrl.u32 %v2984_v55, 16  ;;  %v3036_v19 = vshll.u32 %v2984_v55, 16  ;;  %v2815_v63 = vld [vmem:[#allocation2 + $0x9c] sm:$0xf]  ;;  %v2985_v1 = vld [vmem:[#allocation2 + $0x10] sm:$0xf] }
  0xe4   : > { %v2352_v38 = vpop.permute.xlu1 %2351  ;;  %v2987_v3 = vld [vmem:[#allocation2 + $0x18] sm:$0xf]  ;;  %v2814_v59 = vld [vmem:[#allocation2 + $0x94] sm:$0xf]  ;;  %v3042_v9 = vshll.u32 %v2985_v1, 16  ;;  %v3046_v61 = vshrl.u32 %v2985_v1, 16 }
  0xe5   : > { %2717 = vrot.lane.b32.xlu0 %v2650_v7, %s5881_s5  ;;  %2433 = vst.msk [vmem:[#allocation3 + $0x3c] sm:$0xf] %vm2417_vm15, %v2352_v38  ;;  %v3035_v6 = vrot.slane %v3033_v62, 4  ;;  %v3038_v7 = vrot.slane %v3036_v19, 5  ;;  %v3057_v10 = vshrl.u32 %v2987_v3, 16  ;;  %v3060_v12 = vshll.u32 %v2987_v3, 16 }
  0xe6   : > { %2715 = vrot.lane.b32.xlu1 %v2646_v4, %s5881_s5  ;;  %v2817_v4 = vld [vmem:[#allocation2 + $0xa8] sm:$0xf]  ;;  %v2988_v11 = vld [vmem:[#allocation2 + $0x1c] sm:$0xf]  ;;  %v2990_v14 = vld [vmem:[#allocation2 + $0x24] sm:$0xf] }
  0xe7   : > { %v2819_v38 = vld [vmem:[#allocation2 + $0xb4] sm:$0xf]  ;;  %v2992_v62 = vld [vmem:[#allocation2 + $0x2c] sm:$0x1]  ;;  %v3022_v22 = vld [vmem:[#allocation2 + $0xa4] sm:$0x1] }
  0xe9   : > { %2721 = vrot.lane.b32.xlu0 %v2657_v15, %s5881_s5 }
  0xea   : > { %2719 = vrot.lane.b32.xlu1 %v2653_v16, %s5881_s5  ;;  %v2816_v16 = vld [vmem:[#allocation2 + $0xa0] sm:$0xf] }
  0xeb   : > { %v2358_v21 = vpop.permute.xlu0 %2357  ;;  %v2356_v17 = vpop.permute.xlu1 %2355 }
  0xec   : > { %2436 = vst.msk [vmem:[#allocation3 + $0x48] sm:$0xf] %vm2417_vm15, %v2358_v21  ;;  %2435 = vst.msk [vmem:[#allocation3 + $0x44] sm:$0xf] %vm2417_vm15, %v2356_v17  ;;  %v6591_v21 = vrot.slane %v3042_v9, 5  ;;  %v3059_v17 = vrot.slane %v3057_v10, 4 }
  0xed   : > { %2855 = vrot.lane.b32.xlu0 %v2791_v20, %s5882_s6  ;;  %v2993_v20 = vld [vmem:[#allocation2 + $0x30] sm:$0xf] }
  0xee   : > { %2723 = vrot.lane.b32.xlu1 %v2660_v32, %s5881_s5  ;;  %v3039_v32 = vor.u32 %v3038_v7, %v3035_v6  ;;  %v2997_v6 = vld [vmem:[#allocation2 + $0x40] sm:$0xf] }
  0xf1   : > { %2859 = vrot.lane.b32.xlu0 %v2793_v23, %s5882_s6  ;;  %v3066_v23 = vshll.u32 %v2988_v11, 16 }
  0xf2   : > { %2857 = vrot.lane.b32.xlu1 %v2792_v24, %s5882_s6  ;;  %v2991_v24 = vld [vmem:[#allocation2 + $0x28] sm:$0xf] }
  0xf3   : > { %v2360_v41 = vpop.permute.xlu1 %2359 }
  0xf4   : > { %2437 = vst.msk [vmem:[#allocation3 + $0x4c] sm:$0xf] %vm2417_vm15, %v2360_v41  ;;  %v2362_v30 = vpop.permute.xlu0 %2361  ;;  %v3048_v41 = vrot.slane %v3046_v61, 4  ;;  %v2999_v61 = vld [vmem:[#allocation2 + $0x48] sm:$0xf] }
  0xf5   : > { %2863 = vrot.lane.b32.xlu0 %v2795_v26, %s5882_s6  ;;  %2438 = vst.msk [vmem:[#allocation3 + $0x50] sm:$0xf] %vm2417_vm15, %v2362_v30  ;;  %v3062_v26 = vrot.slane %v3060_v12, 5  ;;  %v3084_v30 = vshll.u32 %v2990_v14, 16  ;;  %v2822_v12 = vld [vmem:[#allocation2 + $0xc4] sm:$0xf] }
  0xf6   : > { %2861 = vrot.lane.b32.xlu1 %v2794_v57, %s5882_s6  ;;  %v2986_v57 = vld [vmem:[#allocation2 + $0x14] sm:$0x1] }
  0xf7   : > { %v2364_v34 = vpop.permute.xlu1 %2363 }
  0xf8   : > { %2439 = vst.msk [vmem:[#allocation3 + $0x54] sm:$0xf] %vm2417_vm15, %v2364_v34  ;;  %v2366_v28 = vpop.permute.xlu0 %2365  ;;  %v2818_v34 = vld [vmem:[#allocation2 + $0xac] sm:$0xf] }
  0xf9   : > { %2867 = vrot.lane.b32.xlu0 %v2797_v27, %s5882_s6  ;;  %2440 = vst.msk [vmem:[#allocation3 + $0x58] sm:$0xf] %vm2417_vm15, %v2366_v28  ;;  %v3081_v27 = vshrl.u32 %v2990_v14, 16  ;;  %v3105_v28 = vshrl.u32 %v2993_v20, 16 }
  0xfa   : > { %2865 = vrot.lane.b32.xlu1 %v2796_v33, %s5882_s6 }
  0xfd   : > { %2871 = vrot.lane.b32.xlu0 %v2799_v35, %s5882_s6  ;;  %v3070_v35 = vshrl.u32 %v2988_v11, 16 }
  0xfe   : > { %2869 = vrot.lane.b32.xlu1 %v2798_v36, %s5882_s6  ;;  %v3108_v36 = vshll.u32 %v2993_v20, 16 }
  0xff   : > { %v2370_v43 = vpop.permute.xlu0 %2369 }
 0x100   : > { %2442 = vst.msk [vmem:[#allocation3 + $0x60] sm:$0xf] %vm2417_vm15, %v2370_v43  ;;  %v3094_v43 = vshrl.u32 %v2991_v24, 16  ;;  %v3110_v55 = vrot.slane %v3108_v36, 5 }
 0x101   : > { %2875 = vrot.lane.b32.xlu0 %v2801_v39, %s5882_s6 }
 0x102   : > { %2873 = vrot.lane.b32.xlu1 %v2800_v40, %s5882_s6  ;;  %v3090_v40 = vshll.u32 %v2991_v24, 16  ;;  %v3096_v19 = vrot.slane %v3094_v43, 4  ;;  %v2995_v24 = vld [vmem:[#allocation2 + $0x38] sm:$0x1] }
 0x105   : > { %2879 = vrot.lane.b32.xlu0 %v2803_v25, %s5882_s6  ;;  %v2368_v47 = vpop.permute.xlu1 %2367  ;;  %v2994_v25 = vld [vmem:[#allocation2 + $0x34] sm:$0xf] }
 0x106   : > { %2877 = vrot.lane.b32.xlu1 %v2802_v44, %s5882_s6  ;;  %2441 = vst.msk [vmem:[#allocation3 + $0x5c] sm:$0xf] %vm2417_vm15, %v2368_v47  ;;  %v3040_v44 = vrot.slane %v3039_v32, 4  ;;  %v3052_v47 = vshll.u32 %v2986_v57, 16  ;;  %v3153_v57 = vshrl.u32 %v2999_v61, 16 }
 0x108   : > { %v3045_v3 = vsel %vm6048_vm11, %v3040_v44, %v6591_v21 }
 0x109   : > { %2883 = vrot.lane.b32.xlu0 %v2805_v45, %s5882_s6  ;;  %v6597_v45 = vrot.slane %v3066_v23, 5  ;;  %v3142_v23 = vshrl.u32 %v2997_v6, 16 }
 0x10a   : > { %2881 = vrot.lane.b32.xlu1 %v2804_v48, %s5882_s6  ;;  %v2996_v48 = vld [vmem:[#allocation2 + $0x3c] sm:$0xf] }
 0x10b   : > { %v2374_v31 = vpop.permute.xlu0 %2373  ;;  %v3132_v1 = vshll.u32 %v2996_v48, 16 }
 0x10c   : > { %2444 = vst.msk [vmem:[#allocation3 + $0x68] sm:$0xf] %vm2417_vm15, %v2374_v31  ;;  %v3063_v31 = vor.u32 %v3062_v26, %v3059_v17  ;;  %v3138_v17 = vshll.u32 %v2997_v6, 16 }
 0x10d   : > { %2887 = vrot.lane.b32.xlu0 %v2807_v49, %s5882_s6  ;;  %v2821_v49 = vld [vmem:[#allocation2 + $0xc0] sm:$0xf] }
 0x10e   : > { %2885 = vrot.lane.b32.xlu1 %v2806_v50, %s5882_s6  ;;  %v2820_v50 = vld [vmem:[#allocation2 + $0xb8] sm:$0xf]  ;;  %v3064_v7 = vrot.slane %v3063_v31, 4  ;;  %v3155_v31 = vrot.slane %v3153_v57, 4 }
 0x111   : > { %2891 = vrot.lane.b32.xlu0 %v2809_v51, %s5882_s6  ;;  %v2372_v46 = vpop.permute.xlu1 %2371  ;;  %v3049_v51 = vor.u32 %v3048_v41, %v6591_v21  ;;  %v3134_v21 = vrot.slane %v3132_v1, 5  ;;  %v3156_v41 = vshll.u32 %v2999_v61, 16 }
 0x112   : > { %2889 = vrot.lane.b32.xlu1 %v2808_v13, %s5882_s6  ;;  %2443 = vst.msk [vmem:[#allocation3 + $0x64] sm:$0xf] %vm2417_vm15, %v2372_v46  ;;  %v3083_v13 = vrot.slane %v3081_v27, 4  ;;  %v3086_v46 = vrot.slane %v3084_v30, 5  ;;  %v3069_v27 = vsel %vm6048_vm11, %v3064_v7, %v6597_v45 }
 0x113   : > { %v3050_v9 = vrot.slane %v3049_v51, 4  ;;  %v3158_v51 = vrot.slane %v3156_v41, 5 }
 0x114   : > { %v3087_v10 = vor.u32 %v3086_v46, %v3083_v13  ;;  %v3144_v13 = vrot.slane %v3142_v23, 4 }
 0x115   : > { %2895 = vrot.lane.b32.xlu0 %v2811_v53, %s5882_s6  ;;  %v2376_v42 = vpop.permute.xlu1 %2375  ;;  %v3159_v7 = vor.u32 %v3158_v51, %v3155_v31  ;;  %v3546_v51 = vld [vmem:[#allocation2 + $0x10] sm:$0xf] }
 0x116   : > { %2893 = vrot.lane.b32.xlu1 %v2810_v37, %s5882_s6  ;;  %2445 = vst.msk [vmem:[#allocation3 + $0x6c] sm:$0xf] %vm2417_vm15, %v2376_v42  ;;  %v2989_v37 = vld [vmem:[#allocation2 + $0x20] sm:$0x1]  ;;  %v3072_v42 = vrot.slane %v3070_v35, 4 }
 0x117   : > { %v2378_v56 = vpop.permute.xlu0 %2377  ;;  %v3160_v57 = vrot.slane %v3159_v7, 4 }
 0x118   : > { %2446 = vst.msk [vmem:[#allocation3 + $0x70] sm:$0xf] %vm2417_vm15, %v2378_v56  ;;  %v3114_v56 = vshll.u32 %v2994_v25, 16 }
 0x119   : > { %2899 = vrot.lane.b32.xlu0 %v2813_v54, %s5882_s6  ;;  %v2380_v60 = vpop.permute.xlu1 %2379  ;;  %v3107_v54 = vrot.slane %v3105_v28, 4 }
 0x11a   : > { %2897 = vrot.lane.b32.xlu1 %v2812_v58, %s5882_s6  ;;  %2447 = vst.msk [vmem:[#allocation3 + $0x74] sm:$0xf] %vm2417_vm15, %v2380_v60  ;;  %v6602_v60 = vrot.slane %v3090_v40, 5  ;;  %v6611_v14 = vrot.slane %v3114_v56, 5  ;;  %v3009_v40 = vld [vmem:[#allocation2 + $0x70] sm:$0xf] }
 0x11b   : > { %v2382_v5 = vpop.permute.xlu0 %2381 }
 0x11c   : > { %2448 = vst.msk [vmem:[#allocation3 + $0x78] sm:$0xf] %vm2417_vm15, %v2382_v5  ;;  %v3054_v5 = vrot.slane %v3052_v47, 5  ;;  %v3097_v20 = vor.u32 %v3096_v19, %v6602_v60  ;;  %v6624_v47 = vrot.slane %v3138_v17, 5  ;;  %v3012_v19 = vld [vmem:[#allocation2 + $0x7c] sm:$0xf] }
 0x11d   : > { %2903 = vrot.lane.b32.xlu0 %v2815_v63, %s5882_s6  ;;  %v3129_v63 = vshrl.u32 %v2996_v48, 16  ;;  %v3124_v48 = vshll.u32 %v2995_v24, 16 }
 0x11e   : > { %2901 = vrot.lane.b32.xlu1 %v2814_v59, %s5882_s6  ;;  %v3118_v59 = vshrl.u32 %v2994_v25, 16  ;;  %v3055_v30 = vsel %vm6048_vm11, %v3050_v9, %v3054_v5  ;;  %v3098_v25 = vrot.slane %v3097_v20, 4  ;;  %v3145_v9 = vor.u32 %v3144_v13, %v6624_v47 }
 0x11f   : > { %v2662_v15 = vpop.permute.xlu0 %2661  ;;  %v3131_v32 = vrot.slane %v3129_v63, 4 }
 0x120   : > { %2758 = vst.msk [vmem:[#allocation3] sm:$0xf] %vm2757_vm0, %v2662_v15  ;;  %v2384_v18 = vpop.permute.xlu1 %2383  ;;  %v3073_v15 = vor.u32 %v3072_v42, %v6597_v45  ;;  %v3120_v26 = vrot.slane %v3118_v59, 4  ;;  %v3238_v42 = vshrl.u32 %v3009_v40, 16  ;;  %v3011_v59 = vld [vmem:[#allocation2 + $0x78] sm:$0xf] }
 0x121   : > { %2449 = vst.msk [vmem:[#allocation3 + $0x7c] sm:$0xf] %vm2417_vm15, %v2384_v18  ;;  %2907 = vrot.lane.b32.xlu0 %v2817_v4, %s5882_s6  ;;  %v3076_v4 = vshll.u32 %v2989_v37, 16  ;;  %v3100_v18 = vshll.u32 %v2992_v62, 16  ;;  %v3135_v44 = vor.u32 %v3134_v21, %v3131_v32  ;;  %v3234_v37 = vshll.u32 %v3009_v40, 16 }
 0x122   : > { %2905 = vrot.lane.b32.xlu1 %v2816_v16, %s5882_s6  ;;  %v3111_v16 = vor.u32 %v3110_v55, %v3107_v54  ;;  %v3074_v35 = vrot.slane %v3073_v15, 4  ;;  %v3121_v45 = vor.u32 %v3120_v26, %v6611_v14  ;;  %v3262_v15 = vshrl.u32 %v3012_v19, 16 }
 0x123   : > { %v2666_v33 = vpop.permute.xlu0 %2665  ;;  %v3078_v28 = vrot.slane %v3076_v4, 5  ;;  %v3136_v1 = vrot.slane %v3135_v44, 4  ;;  %v3010_v4 = vld [vmem:[#allocation2 + $0x74] sm:$0x1]  ;;  %v6645_v61 = vrot.slane %v3234_v37, 5  ;;  %v3252_v20 = vshll.u32 %v3011_v59, 16 }
 0x124   : > { %2760 = vst.msk [vmem:[#allocation3 + $0x8] sm:$0xf] %vm2757_vm0, %v2666_v33  ;;  %v2664_v39 = vpop.permute.xlu1 %2663  ;;  %v3088_v33 = vrot.slane %v3087_v10, 4  ;;  %v3112_v36 = vrot.slane %v3111_v16, 4  ;;  %v3122_v6 = vrot.slane %v3121_v45, 4  ;;  %v3244_v26 = vshll.u32 %v3010_v4, 16 }
 0x125   : > { %2759 = vst.msk [vmem:[#allocation3 + $0x4] sm:$0xf] %vm2757_vm0, %v2664_v39  ;;  %2911 = vrot.lane.b32.xlu0 %v2819_v38, %s5882_s6  ;;  %v3102_v39 = vrot.slane %v3100_v18, 5  ;;  %v3079_v55 = vsel %vm6048_vm11, %v3074_v35, %v3078_v28  ;;  %v3141_v17 = vsel %vm6048_vm11, %v3136_v1, %v6624_v47  ;;  %v3013_v28 = vld [vmem:[#allocation2 + $0x80] sm:$0x1] }
 0x126   : > { %2909 = vrot.lane.b32.xlu1 %v2818_v34, %s5882_s6  ;;  %v3093_v46 = vsel %vm6048_vm11, %v3088_v33, %v6602_v60  ;;  %v3117_v56 = vsel %vm6048_vm11, %v3112_v36, %v6611_v14 }
 0x127   : > { %v2670_v53 = vpop.permute.xlu0 %2669  ;;  %v3103_v60 = vsel %vm6048_vm11, %v3098_v25, %v3102_v39  ;;  %v3254_v39 = vrot.slane %v3252_v20, 5  ;;  %v3550_v20 = vld [vmem:[#allocation2 + $0x20] sm:$0x1] }
 0x128   : > { %2762 = vst.msk [vmem:[#allocation3 + $0x10] sm:$0xf] %vm2757_vm0, %v2670_v53  ;;  %v2668_v58 = vpop.permute.xlu1 %2667  ;;  %v2998_v53 = vld [vmem:[#allocation2 + $0x44] sm:$0x1] }
 0x129   : > { %2761 = vst.msk [vmem:[#allocation3 + $0xc] sm:$0xf] %vm2757_vm0, %v2668_v58  ;;  %2915 = vrot.lane.b32.xlu0 %v2821_v49, %s5882_s6  ;;  %v3008_v49 = vld [vmem:[#allocation2 + $0x6c] sm:$0xf]  ;;  %v3148_v10 = vshll.u32 %v2998_v53, 16 }
 0x12a   : > { %2913 = vrot.lane.b32.xlu1 %v2820_v50, %s5882_s6  ;;  %v3000_v50 = vld [vmem:[#allocation2 + $0x4c] sm:$0xf]  ;;  %v3225_v58 = vshrl.u32 %v3008_v49, 16  ;;  %v3228_v62 = vshll.u32 %v3008_v49, 16 }
 0x12b   : > { %v2674_v11 = vpop.permute.xlu0 %2673  ;;  %v3162_v5 = vshll.u32 %v3000_v50, 16  ;;  %v3150_v24 = vrot.slane %v3148_v10, 5  ;;  %v3549_v10 = vld [vmem:[#allocation2 + $0x1c] sm:$0xf] }
 0x12c   : > { %2764 = vst.msk [vmem:[#allocation3 + $0x18] sm:$0xf] %vm2757_vm0, %v2674_v11  ;;  %v2672_v38 = vpop.permute.xlu1 %2671  ;;  %v3240_v11 = vrot.slane %v3238_v42, 4  ;;  %v3227_v14 = vrot.slane %v3225_v58, 4  ;;  %v3230_v18 = vrot.slane %v3228_v62, 5  ;;  %v3643_v42 = vrot.slane %v3546_v51, 5 }
 0x12d   : > { %2763 = vst.msk [vmem:[#allocation3 + $0x14] sm:$0xf] %vm2757_vm0, %v2672_v38  ;;  %3416 = vrot.lane.b32.xlu0 %v3045_v3, %s5883_s7  ;;  %v3126_v3 = vrot.slane %v3124_v48, 5  ;;  %v3249_v38 = vshrl.u32 %v3011_v59, 16  ;;  %v6648_v21 = vrot.slane %v3162_v5, 5  ;;  %v3268_v48 = vshll.u32 %v3013_v28, 16 }
 0x12e   : > { %2917 = vrot.lane.b32.xlu1 %v2822_v12, %s5882_s6  ;;  %v3258_v12 = vshll.u32 %v3012_v19, 16  ;;  %v3241_v41 = vor.u32 %v3240_v11, %v6645_v61  ;;  %v3231_v35 = vor.u32 %v3230_v18, %v3227_v14  ;;  %v3547_v58 = vld [vmem:[#allocation2 + $0x14] sm:$0x1]  ;;  %v3570_v62 = vld [vmem:[#allocation2 + $0x70] sm:$0xf]  ;;  %v3645_v1 = vrot.slane %v3643_v42, 4 }
 0x12f   : > { %v2678_v34 = vpop.permute.xlu0 %2677  ;;  %v3127_v23 = vsel %vm6048_vm11, %v3122_v6, %v3126_v3  ;;  %v3251_v36 = vrot.slane %v3249_v38, 4  ;;  %v3165_v25 = vsel %vm6048_vm11, %v3160_v57, %v6648_v21  ;;  %v3270_v37 = vrot.slane %v3268_v48, 5  ;;  %v3572_v28 = vld [vmem:[#allocation2 + $0x78] sm:$0xe]  ;;  %v4077_v48 = vld [vmem:[#allocation2 + $0x1c] sm:$0xf] }
 0x130   : > { %2766 = vst.msk [vmem:[#allocation3 + $0x20] sm:$0xf] %vm2757_vm0, %v2678_v34  ;;  %v2676_v43 = vpop.permute.xlu1 %2675  ;;  %v3146_v34 = vrot.slane %v3145_v9, 4  ;;  %v3242_v44 = vrot.slane %v3241_v41, 4  ;;  %v3232_v50 = vrot.slane %v3231_v35, 4  ;;  %v3646_v3 = vrot.slane %v3547_v58, 5 }
 0x131   : > { %2765 = vst.msk [vmem:[#allocation3 + $0x1c] sm:$0xf] %vm2757_vm0, %v2676_v43  ;;  %3420 = vrot.lane.b32.xlu0 %v3069_v27, %s5883_s7  ;;  %v3260_v27 = vrot.slane %v3258_v12, 5  ;;  %v3246_v43 = vrot.slane %v3244_v26, 5  ;;  %v3255_v31 = vor.u32 %v3254_v39, %v3251_v36  ;;  %v3699_v5 = vrot.slane %v3570_v62, 5  ;;  %s7367_s6 = scalar_lea.vmem [#allocation4], %s5523_s29 }
 0x132   : > { %3418 = vrot.lane.b32.xlu1 %v3055_v30, %s5883_s7  ;;  %v3264_v30 = vrot.slane %v3262_v15, 4  ;;  %v3151_v45 = vsel %vm6048_vm11, %v3146_v34, %v3150_v24  ;;  %v3571_v9 = vld [vmem:[#allocation2 + $0x74] sm:$0x1]  ;;  %v3647_v11 = vsel %vm6389_vm14, %v3645_v1, %v3646_v3  ;;  %v3653_v57 = vrot.slane %v3550_v20, 5  ;;  %v3574_v34 = vld [vmem:[#allocation2 + $0x80] sm:$0x1] }
 0x133   : > { %v2682_v54 = vpop.permute.xlu0 %2681  ;;  %v3701_v12 = vrot.slane %v3699_v5, 4  ;;  %v3702_v15 = vrot.slane %v3571_v9, 5  ;;  %v4100_v58 = vld [vmem:[#allocation2 + $0x78] sm:$0xf] }
 0x134   : > { %2768 = vst.msk [vmem:[#allocation3 + $0x28] sm:$0xf] %vm2757_vm0, %v2682_v54  ;;  %v2680_v63 = vpop.permute.xlu1 %2679  ;;  %v3265_v47 = vor.u32 %v3264_v30, %v3260_v27  ;;  %v4320_v9 = vshll.u32 %v4100_v58, 16 }
 0x135   : > { %2767 = vst.msk [vmem:[#allocation3 + $0x24] sm:$0xf] %vm2757_vm0, %v2680_v63  ;;  %3424 = vrot.lane.b32.xlu0 %v3093_v46, %s5883_s7  ;;  %v3247_v46 = vsel %vm6048_vm11, %v3242_v44, %v3246_v43  ;;  %v3545_v63 = vld [vmem:[#allocation2 + $0xc] sm:$0xe]  ;;  %v3703_v24 = vsel %vm6389_vm14, %v3701_v12, %v3702_v15  ;;  %v5585_v44 = vrot.slane %v3572_v28, 9 }
 0x136   : > { %3422 = vrot.lane.b32.xlu1 %v3079_v55, %s5883_s7  ;;  %v3266_v53 = vrot.slane %v3265_v47, 4  ;;  %v3237_v55 = vsel %vm6048_vm11, %v3232_v50, %v6645_v61  ;;  %v5576_v7 = vrot.slane %v3545_v63, 9  ;;  %v3569_v61 = vld [vmem:[#allocation2 + $0x6c] sm:$0xe] }
 0x137   : > { %v2686_v16 = vpop.permute.xlu0 %2685  ;;  %v5584_v38 = vrot.slane %v3569_v61, 9  ;;  %v3899_v61 = vld [vmem:[#allocation2 + $0x78] sm:$0xf] }
 0x138   : > { %2770 = vst.msk [vmem:[#allocation3 + $0x30] sm:$0xf] %vm2757_vm0, %v2686_v16  ;;  %v2684_v32 = vpop.permute.xlu1 %2683  ;;  %v3650_v16 = vrot.slane %v3549_v10, 5  ;;  %v3644_v18 = vsel %vm6389_vm14, %v5576_v7, %v3643_v42  ;;  %v3884_v42 = vld [vmem:[#allocation2 + $0x1c] sm:$0xf]  ;;  %v4317_v7 = vshrl.u32 %v4100_v58, 16 }
 0x139   : > { %2769 = vst.msk [vmem:[#allocation3 + $0x2c] sm:$0xf] %vm2757_vm0, %v2684_v32  ;;  %3428 = vrot.lane.b32.xlu0 %v3117_v56, %s5883_s7  ;;  %v3256_v56 = vrot.slane %v3255_v31, 4  ;;  %v3573_v32 = vld [vmem:[#allocation2 + $0x7c] sm:$0xf]  ;;  %v3700_v30 = vsel %vm6389_vm14, %v5584_v38, %v3699_v5 }
 0x13a   : > { %3426 = vrot.lane.b32.xlu1 %v3103_v60, %s5883_s7  ;;  %v3271_v60 = vsel %vm6048_vm11, %v3266_v53, %v3270_v37  ;;  %v3652_v26 = vrot.slane %v3650_v16, 4  ;;  %v3706_v41 = vrot.slane %v3573_v32, 5  ;;  %v4080_v10 = vld [vmem:[#allocation2 + $0x28] sm:$0xf] }
 0x13b   : > { %v2690_v33 = vpop.permute.xlu0 %2689  ;;  %v3261_v6 = vsel %vm6048_vm11, %v3256_v56, %v3260_v27  ;;  %v3883_v56 = vld [vmem:[#allocation2 + $0x18] sm:$0xf]  ;;  %v4158_v32 = vshll.u32 %v4080_v10, 16 }
 0x13c   : > { %2772 = vst.msk [vmem:[#allocation3 + $0x38] sm:$0xf] %vm2757_vm0, %v2690_v33  ;;  %v2688_v40 = vpop.permute.xlu1 %2687  ;;  %v3654_v36 = vsel %vm6389_vm14, %v3652_v26, %v3653_v57  ;;  %v3708_v39 = vrot.slane %v3706_v41, 4  ;;  %v3707_v31 = vsel %vm6389_vm14, %v5585_v44, %v3706_v41  ;;  %v4162_v26 = vshrl.u32 %v4080_v10, 16  ;;  %v3885_v41 = vld [vmem:[#allocation2 + $0x24] sm:$0xf] }
 0x13d   : > { %2771 = vst.msk [vmem:[#allocation3 + $0x34] sm:$0xf] %vm2757_vm0, %v2688_v40  ;;  %3432 = vrot.lane.b32.xlu0 %v3141_v17, %s5883_s7  ;;  %v3709_v40 = vrot.slane %v3574_v34, 5  ;;  %v6738_v44 = vrot.slane %v4158_v32, 5 }
 0x13e   : > { %3430 = vrot.lane.b32.xlu1 %v3127_v23, %s5883_s7  ;;  %v3548_v23 = vld [vmem:[#allocation2 + $0x18] sm:$0xe] }
 0x13f   : > { %v2694_v49 = vpop.permute.xlu0 %2693  ;;  %v5577_v33 = vrot.slane %v3548_v23, 9  ;;  %v4319_v23 = vrot.slane %v4317_v7, 4 }
 0x140   : > { %2774 = vst.msk [vmem:[#allocation3 + $0x40] sm:$0xf] %vm2757_vm0, %v2694_v49  ;;  %v2692_v13 = vpop.permute.xlu1 %2691  ;;  %v3710_v49 = vsel %vm6389_vm14, %v3708_v39, %v3709_v40  ;;  %v3902_v39 = vld [vmem:[#allocation2 + $0x88] sm:$0xf] }
 0x141   : > { %2773 = vst.msk [vmem:[#allocation3 + $0x3c] sm:$0xf] %vm2757_vm0, %v2692_v13  ;;  %3436 = vrot.lane.b32.xlu0 %v3165_v25, %s5883_s7  ;;  %v3651_v25 = vsel %vm6389_vm14, %v5577_v33, %v3650_v16  ;;  %v4134_v13 = vshll.u32 %v4077_v48, 16  ;;  %v4079_v16 = vld [vmem:[#allocation2 + $0x24] sm:$0xf] }
 0x142   : > { %3434 = vrot.lane.b32.xlu1 %v3151_v45, %s5883_s7  ;;  %v4076_v45 = vld [vmem:[#allocation2 + $0x18] sm:$0xf]  ;;  %v4104_v33 = vld [vmem:[#allocation2 + $0x88] sm:$0xf] }
 0x143   : > { %v2698_v54 = vpop.permute.xlu0 %2697  ;;  %v4125_v53 = vshrl.u32 %v4076_v45, 16  ;;  %v4128_v37 = vshll.u32 %v4076_v45, 16  ;;  %v4350_v45 = vshll.u32 %v4104_v33, 16 }
 0x144   : > { %2776 = vst.msk [vmem:[#allocation3 + $0x48] sm:$0xf] %vm2757_vm0, %v2698_v54  ;;  %v2696_v19 = vpop.permute.xlu1 %2695  ;;  %v4101_v54 = vld [vmem:[#allocation2 + $0x7c] sm:$0xf] }
 0x145   : > { %2775 = vst.msk [vmem:[#allocation3 + $0x44] sm:$0xf] %vm2757_vm0, %v2696_v19  ;;  %3450 = vrot.lane.b32.xlu0 %v3247_v46, %s5883_s7  ;;  %v4138_v46 = vshrl.u32 %v4077_v48, 16  ;;  %v6722_v19 = vrot.slane %v4134_v13, 5  ;;  %v4127_v1 = vrot.slane %v4125_v53, 4  ;;  %v4130_v3 = vrot.slane %v4128_v37, 5 }
 0x146   : > { %3448 = vrot.lane.b32.xlu1 %v3237_v55, %s5883_s7  ;;  %v4326_v5 = vshll.u32 %v4101_v54, 16  ;;  %v4081_v48 = vld [vmem:[#allocation2 + $0x2c] sm:$0x1] }
 0x147   : > { %v2702_v59 = vpop.permute.xlu0 %2701  ;;  %v4140_v63 = vrot.slane %v4138_v46, 4  ;;  %v4168_v58 = vshll.u32 %v4081_v48, 16 }
 0x148   : > { %2778 = vst.msk [vmem:[#allocation3 + $0x50] sm:$0xf] %vm2757_vm0, %v2702_v59  ;;  %v2700_v4 = vpop.permute.xlu1 %2699  ;;  %v4330_v59 = vshrl.u32 %v4101_v54, 16  ;;  %v6731_v38 = vrot.slane %v4326_v5, 5 }
 0x149   : > { %2777 = vst.msk [vmem:[#allocation3 + $0x4c] sm:$0xf] %vm2757_vm0, %v2700_v4  ;;  %3454 = vrot.lane.b32.xlu0 %v3271_v60, %s5883_s7  ;;  %v4078_v60 = vld [vmem:[#allocation2 + $0x20] sm:$0x1]  ;;  %v4141_v12 = vor.u32 %v4140_v63, %v6722_v19 }
 0x14a   : > { %3452 = vrot.lane.b32.xlu1 %v3261_v6, %s5883_s7  ;;  %v3900_v6 = vld [vmem:[#allocation2 + $0x7c] sm:$0xf]  ;;  %v4144_v15 = vshll.u32 %v4078_v60, 16  ;;  %v4332_v20 = vrot.slane %v4330_v59, 4  ;;  %v6751_v60 = vrot.slane %v4350_v45, 5 }
 0x14b   : > { %v2706_v14 = vpop.permute.xlu0 %2705  ;;  %v4142_v40 = vrot.slane %v4141_v12, 4 }
 0x14c   : > { %2780 = vst.msk [vmem:[#allocation3 + $0x58] sm:$0xf] %vm2757_vm0, %v2706_v14  ;;  %v2704_v17 = vpop.permute.xlu1 %2703  ;;  %v4131_v14 = vor.u32 %v4130_v3, %v4127_v1 }
 0x14d   : > { %2779 = vst.msk [vmem:[#allocation3 + $0x54] sm:$0xf] %vm2757_vm0, %v2704_v17  ;;  %3755 = vrot.lane.b32.xlu0 %v3647_v11, %s5884_s8  ;;  %v3886_v17 = vld [vmem:[#allocation2 + $0x28] sm:$0xf] }
 0x14e   : > { %3753 = vrot.lane.b32.xlu1 %v3644_v18, %s5884_s8  ;;  %v4102_v18 = vld [vmem:[#allocation2 + $0x80] sm:$0x1] }
 0x14f   : > { %v2710_v27 = vpop.permute.xlu0 %2709  ;;  %v4336_v28 = vshll.u32 %v4102_v18, 16 }
 0x150   : > { %2782 = vst.msk [vmem:[#allocation3 + $0x60] sm:$0xf] %vm2757_vm0, %v2710_v27  ;;  %v2708_v35 = vpop.permute.xlu1 %2707  ;;  %v4149_v27 = vshrl.u32 %v4079_v16, 16 }
 0x151   : > { %2781 = vst.msk [vmem:[#allocation3 + $0x5c] sm:$0xf] %vm2757_vm0, %v2708_v35  ;;  %3787 = vrot.lane.b32.xlu0 %v3703_v24, %s5884_s8  ;;  %v4322_v24 = vrot.slane %v4320_v9, 5  ;;  %v4146_v35 = vrot.slane %v4144_v15, 5 }
 0x152   : > { %3785 = vrot.lane.b32.xlu1 %v3700_v30, %s5884_s8  ;;  %v4152_v30 = vshll.u32 %v4079_v16, 16  ;;  %v4151_v13 = vrot.slane %v4149_v27, 4 }
 0x153   : > { %v2714_v43 = vpop.permute.xlu0 %2713  ;;  %v4147_v54 = vsel %vm6048_vm11, %v4142_v40, %v4146_v35 }
 0x154   : > { %2784 = vst.msk [vmem:[#allocation3 + $0x68] sm:$0xf] %vm2757_vm0, %v2714_v43  ;;  %v2712_v47 = vpop.permute.xlu1 %2711  ;;  %v4132_v43 = vrot.slane %v4131_v14, 4  ;;  %v4154_v46 = vrot.slane %v4152_v30, 5  ;;  %v4639_v30 = vld [vmem:[#allocation2 + $0x20] sm:$0x1] }
 0x155   : > { %2783 = vst.msk [vmem:[#allocation3 + $0x64] sm:$0xf] %vm2757_vm0, %v2712_v47  ;;  %3759 = vrot.lane.b32.xlu0 %v3654_v36, %s5884_s8  ;;  %v4103_v36 = vld [vmem:[#allocation2 + $0x84] sm:$0xf]  ;;  %v4323_v47 = vor.u32 %v4322_v24, %v4319_v23 }
 0x156   : > { %3757 = vrot.lane.b32.xlu1 %v3651_v25, %s5884_s8  ;;  %v4333_v25 = vor.u32 %v4332_v20, %v6731_v38  ;;  %v4341_v53 = vshrl.u32 %v4103_v36, 16  ;;  %v4344_v37 = vshll.u32 %v4103_v36, 16  ;;  %v4155_v59 = vor.u32 %v4154_v46, %v4151_v13  ;;  %v4638_v20 = vld [vmem:[#allocation2 + $0x1c] sm:$0xf]  ;;  %v4663_v36 = vld [vmem:[#allocation2 + $0x80] sm:$0x1] }
 0x157   : > { %v2718_v50 = vpop.permute.xlu0 %2717  ;;  %v4324_v5 = vrot.slane %v4323_v47, 4  ;;  %v4794_v13 = vrot.slane %v4663_v36, 5 }
 0x158   : > { %2786 = vst.msk [vmem:[#allocation3 + $0x70] sm:$0xf] %vm2757_vm0, %v2718_v50  ;;  %v2716_v51 = vpop.permute.xlu1 %2715  ;;  %v4354_v50 = vshrl.u32 %v4104_v33, 16  ;;  %v4343_v7 = vrot.slane %v4341_v53, 4  ;;  %v4346_v9 = vrot.slane %v4344_v37, 5  ;;  %v4156_v14 = vrot.slane %v4155_v59, 4 }
 0x159   : > { %2785 = vst.msk [vmem:[#allocation3 + $0x6c] sm:$0xf] %vm2757_vm0, %v2716_v51  ;;  %3791 = vrot.lane.b32.xlu0 %v3710_v49, %s5884_s8  ;;  %v4164_v49 = vrot.slane %v4162_v26, 4  ;;  %v3901_v51 = vld [vmem:[#allocation2 + $0x84] sm:$0xf]  ;;  %v4329_v16 = vsel %vm6048_vm11, %v4324_v5, %v6731_v38  ;;  %v4735_v38 = vrot.slane %v4638_v20, 5 }
 0x15a   : > { %3789 = vrot.lane.b32.xlu1 %v3707_v31, %s5884_s8  ;;  %v4356_v1 = vrot.slane %v4354_v50, 4  ;;  %v4347_v18 = vor.u32 %v4346_v9, %v4343_v7  ;;  %v3015_v50 = vld [vmem:[#allocation2 + $0x88] sm:$0xf]  ;;  %v3014_v53 = vld [vmem:[#allocation2 + $0x84] sm:$0xf] }
 0x15b   : > { %v2722_v55 = vpop.permute.xlu0 %2721  ;;  %v4165_v63 = vor.u32 %v4164_v49, %v6738_v44  ;;  %v5782_v37 = vld [vmem:[%s7508_s1 + $0x8] sm:$0xff]   ;;  %v3276_v5 = vshll.u32 %v3014_v53, 16  ;;  %v3018_v59 = vld [vmem:[#allocation2 + $0x94] sm:$0xf] }
 0x15c   : > { %2788 = vst.msk [vmem:[#allocation3 + $0x78] sm:$0xf] %vm2757_vm0, %v2722_v55  ;;  %v2720_v62 = vpop.permute.xlu1 %2719  ;;  %v4334_v55 = vrot.slane %v4333_v25, 4  ;;  %v4348_v27 = vrot.slane %v4347_v18, 4  ;;  %v4738_v25 = vrot.slane %v4639_v30, 5  ;;  %v3306_v18 = vshll.u32 %v3018_v59, 16 }
 0x15d   : > { %2787 = vst.msk [vmem:[#allocation3 + $0x74] sm:$0xf] %vm2757_vm0, %v2720_v62  ;;  %3949 = vrot.lane.b32.xlu0 %v3884_v42, %s5885_s9  ;;  %v4137_v62 = vsel %vm6048_vm11, %v4132_v43, %v6722_v19  ;;  %v4170_v19 = vrot.slane %v4168_v58, 5  ;;  %v4737_v43 = vrot.slane %v4735_v38, 4  ;;  %v6799_v58 = vld [vmem:[#allocation2 + $0x88] sm:$0xf] }
 0x15e   : > { %3947 = vrot.lane.b32.xlu1 %v3883_v56, %s5885_s9  ;;  %v4338_v56 = vrot.slane %v4336_v28, 5  ;;  %v5781_v28 = vld [vmem:[%s7508_s1 + $0x10] ss:$0 sps:$4 sm:$0x33]   ;;  %v4353_v49 = vsel %vm6048_vm11, %v4348_v27, %v6751_v60  ;;  %v3310_v20 = vshrl.u32 %v3018_v59, 16  ;;  %v3308_v36 = vrot.slane %v3306_v18, 5 }
 0x15f   : > { %v2856_v4 = vpop.permute.xlu0 %2855  ;;  %5714 = vmatprep.subr.msk.bf16.mxu0 %vm5162_vm2, %v5781_v28  ;;  %v5164_v47 = vsel %vm5162_vm2, %v5781_v28, 0  ;;  %5715 = vmatprep.subr.msk.bf16.mxu1 %vm5162_vm2, %v5781_v28  ;;  %v3576_v59 = vld [vmem:[#allocation2 + $0x88] sm:$0xf]  ;;  %v3575_v18 = vld [vmem:[#allocation2 + $0x84] sm:$0xe] }
 0x160   : > { %2952 = vst.msk [vmem:[#allocation3] sm:$0xf] %vm2951_vm1, %v2856_v4  ;;  %v2724_v11 = vpop.permute.xlu1 %2723  ;;  %v4339_v4 = vsel %vm6048_vm11, %v4334_v55, %v4338_v56  ;;  %5671 = vmatpush3.bf16.msra.mxu0 %v5164_v47  ;;  %5711 = vmatpush3.bf16.msra.mxu1 %v5164_v47  ;;  %v4739_v55 = vsel %vm6389_vm14, %v4737_v43, %v4738_v25  ;;  %v4640_v56 = vld [vmem:[#allocation2 + $0x24] sm:$0xe] }
 0x161   : > { %2789 = vst.msk [vmem:[#allocation3 + $0x7c] sm:$0xf] %vm2757_vm0, %v2724_v11  ;;  %3981 = vrot.lane.b32.xlu0 %v3900_v6, %s5885_s9  ;;  %v4105_v6 = vld [vmem:[#allocation2 + $0x8c] sm:$0x1]  ;;  %v4357_v11 = vor.u32 %v4356_v1, %v6751_v60  ;;  %5672 = vmatprep.subr.bf16.mxu0 %v5782_v37 }
 0x162   : > { %3979 = vrot.lane.b32.xlu1 %v3899_v61, %s5885_s9  ;;  %v4166_v61 = vrot.slane %v4165_v63, 4  ;;  %v4360_v12 = vshll.u32 %v4105_v6, 16  ;;  %v3286_v63 = vshrl.u32 %v3015_v50, 16  ;;  %5709 = vmatprep.subr.bf16.mxu1 %v5782_v37 }
 0x163   : > { %v2860_v57 = vpop.permute.xlu0 %2859  ;;  %v4358_v24 = vrot.slane %v4357_v11, 4  ;;  %v5593_v11 = vrot.slane %v4640_v56, 9 }
 0x164   : > { %2954 = vst.msk [vmem:[#allocation3 + $0x8] sm:$0xf] %vm2951_vm1, %v2860_v57  ;;  %v2858_v34 = vpop.permute.xlu1 %2857  ;;  %v4171_v23 = vsel %vm6048_vm11, %v4166_v61, %v4170_v19  ;;  %v4362_v26 = vrot.slane %v4360_v12, 5  ;;  %5673 = vmatpush3.bf16.msra.mxu0 %v5782_v37  ;;  %v5784_v19 = vld [vmem:[%s7508_s1] sm:$0xff]   ;;  %5712 = vmatpush3.bf16.msra.mxu1 %v5782_v37  ;;  %v4798_v12 = vrot.slane %v6799_v58, 5 }
 0x165   : > { %2953 = vst.msk [vmem:[#allocation3 + $0x4] sm:$0xf] %vm2951_vm1, %v2858_v34  ;;  %3953 = vrot.lane.b32.xlu0 %v3886_v17, %s5885_s9  ;;  %v6766_v17 = vld [vmem:[#allocation2 + $0x7c] sm:$0xf]  ;;  %v4637_v34 = vld [vmem:[#allocation2 + $0x18] sm:$0xe]  ;;  %5674 = vmatprep.subr.bf16.mxu0 %v5784_v19 }
 0x166   : > { %3951 = vrot.lane.b32.xlu1 %v3885_v41, %s5885_s9  ;;  %v4161_v41 = vsel %vm6048_vm11, %v4156_v14, %v6738_v44  ;;  %v4791_v35 = vrot.slane %v6766_v17, 5  ;;  %v4363_v40 = vsel %vm6048_vm11, %v4358_v24, %v4362_v26  ;;  %v6784_v44 = vld [vmem:[#allocation2 + $0x28] sm:$0xf]  ;;  %v5592_v45 = vrot.slane %v4637_v34, 9  ;;  %v3016_v17 = vld [vmem:[#allocation2 + $0x8c] sm:$0x1]  ;;  %5710 = vmatprep.subr.bf16.mxu1 %v5784_v19 }
 0x167   : > { %v2864_v31 = vpop.permute.xlu0 %2863  ;;  %v3288_v14 = vrot.slane %v3286_v63, 4  ;;  %v3278_v24 = vrot.slane %v3276_v5, 5  ;;  %v3292_v28 = vshll.u32 %v3016_v17, 16  ;;  %v3553_v5 = vld [vmem:[#allocation2 + $0x2c] sm:$0x1] }
 0x168   : > { %2956 = vst.msk [vmem:[#allocation3 + $0x10] sm:$0xf] %vm2951_vm1, %v2864_v31  ;;  %v2862_v42 = vpop.permute.xlu1 %2861  ;;  %v4736_v1 = vsel %vm6389_vm14, %v5592_v45, %v4735_v38  ;;  %5675 = vmatpush3.bf16.msra.mxu0 %v5784_v19  ;;  %5713 = vmatpush3.bf16.msra.mxu1 %v5784_v19  ;;  %v3660_v19 = vrot.slane %v3553_v5, 5  ;;  %v3888_v5 = vld [vmem:[#allocation2 + $0x34] sm:$0xf] }
 0x169   : > { %2955 = vst.msk [vmem:[#allocation3 + $0xc] sm:$0xf] %vm2951_vm1, %v2862_v42  ;;  %3985 = vrot.lane.b32.xlu0 %v3902_v39, %s5885_s9  ;;  %v4661_v39 = vld [vmem:[#allocation2 + $0x78] sm:$0xe]  ;;  %v4642_v42 = vld [vmem:[#allocation2 + $0x2c] sm:$0x1] }
 0x16a   : > { %3983 = vrot.lane.b32.xlu1 %v3901_v51, %s5885_s9  ;;  %v4793_v51 = vrot.slane %v4791_v35, 4  ;;  %v5600_v46 = vrot.slane %v4661_v39, 9  ;;  %v4745_v61 = vrot.slane %v4642_v42, 5  ;;  %v3312_v39 = vrot.slane %v3310_v20, 4 }
 0x16b   : > { %v2868_v3 = vpop.permute.xlu0 %2867 }
 0x16c   : > { %2958 = vst.msk [vmem:[#allocation3 + $0x18] sm:$0xf] %vm2951_vm1, %v2868_v3  ;;  %v2866_v10 = vpop.permute.xlu1 %2865  ;;  %v3273_v3 = vshrl.u32 %v3014_v53, 16  ;;  %v4795_v7 = vsel %vm6389_vm14, %v4793_v51, %v4794_v13  ;;  %v4792_v9 = vsel %vm6389_vm14, %v5600_v46, %v4791_v35  ;;  %v3313_v51 = vor.u32 %v3312_v39, %v3308_v36 }
 0x16d   : > { %2957 = vst.msk [vmem:[#allocation3 + $0x14] sm:$0xf] %vm2951_vm1, %v2866_v10  ;;  %4510 = vrot.lane.b32.xlu0 %v4147_v54, %s5886_s10  ;;  %v4742_v54 = vrot.slane %v6784_v44, 5  ;;  %v3017_v10 = vld [vmem:[#allocation2 + $0x90] sm:$0xf] }
 0x16e   : > { %4508 = vrot.lane.b32.xlu1 %v4137_v62, %s5886_s10  ;;  %v3282_v62 = vshll.u32 %v3015_v50, 16  ;;  %v3297_v26 = vshrl.u32 %v3017_v10, 16  ;;  %v3300_v38 = vshll.u32 %v3017_v10, 16  ;;  %v3019_v44 = vld [vmem:[#allocation2 + $0x98] sm:$0x1]  ;;  %v3314_v58 = vrot.slane %v3313_v51, 4 }
 0x16f   : > { %v2872_v15 = vpop.permute.xlu0 %2871  ;;  %v4743_v30 = vsel %vm6389_vm14, %v5593_v11, %v4742_v54  ;;  %v3316_v13 = vshll.u32 %v3019_v44, 16 }
 0x170   : > { %2960 = vst.msk [vmem:[#allocation3 + $0x20] sm:$0xf] %vm2951_vm1, %v2872_v15  ;;  %v2870_v32 = vpop.permute.xlu1 %2869  ;;  %v4666_v15 = vld [vmem:[#allocation2 + $0x8c] sm:$0x1]  ;;  %v3299_v47 = vrot.slane %v3297_v26, 4 }
 0x171   : > { %2959 = vst.msk [vmem:[#allocation3 + $0x1c] sm:$0xf] %vm2951_vm1, %v2870_v32  ;;  %4542 = vrot.lane.b32.xlu0 %v4339_v4, %s5886_s10  ;;  %v4744_v4 = vrot.slane %v4742_v54, 4  ;;  %v4801_v34 = vrot.slane %v4666_v15, 5  ;;  %v3552_v54 = vld [vmem:[#allocation2 + $0x28] sm:$0xf] }
 0x172   : > { %4540 = vrot.lane.b32.xlu1 %v4329_v16, %s5886_s10  ;;  %v6815_v16 = vrot.slane %v3282_v62, 5  ;;  %v3318_v62 = vrot.slane %v3316_v13, 5  ;;  %v3657_v63 = vrot.slane %v3552_v54, 5  ;;  %v3577_v15 = vld [vmem:[#allocation2 + $0x8c] sm:$0x1] }
 0x173   : > { %v2876_v57 = vpop.permute.xlu0 %2875  ;;  %v4746_v27 = vsel %vm6389_vm14, %v4744_v4, %v4745_v61  ;;  %v3713_v4 = vrot.slane %v3576_v59, 5  ;;  %v3716_v17 = vrot.slane %v3577_v15, 5  ;;  %v4107_v59 = vld [vmem:[#allocation2 + $0x94] sm:$0xf] }
 0x174   : > { %2962 = vst.msk [vmem:[#allocation3 + $0x28] sm:$0xf] %vm2951_vm1, %v2876_v57  ;;  %v2874_v33 = vpop.permute.xlu1 %2873  ;;  %v3289_v35 = vor.u32 %v3288_v14, %v6815_v16  ;;  %v3659_v10 = vrot.slane %v3657_v63, 4  ;;  %v4374_v15 = vshll.u32 %v4107_v59, 16 }
 0x175   : > { %2961 = vst.msk [vmem:[#allocation3 + $0x24] sm:$0xf] %vm2951_vm1, %v2874_v33  ;;  %4514 = vrot.lane.b32.xlu0 %v4171_v23, %s5886_s10  ;;  %v3275_v23 = vrot.slane %v3273_v3, 4  ;;  %v4800_v33 = vrot.slane %v4798_v12, 4 }
 0x176   : > { %4512 = vrot.lane.b32.xlu1 %v4161_v41, %s5886_s10  ;;  %v4664_v41 = vld [vmem:[#allocation2 + $0x84] sm:$0xe]  ;;  %v3290_v50 = vrot.slane %v3289_v35, 4  ;;  %v3661_v20 = vsel %vm6389_vm14, %v3659_v10, %v3660_v19 }
 0x177   : > { %v2880_v48 = vpop.permute.xlu0 %2879  ;;  %v5601_v43 = vrot.slane %v4664_v41, 9  ;;  %v3279_v25 = vor.u32 %v3278_v24, %v3275_v23  ;;  %v4802_v45 = vsel %vm6389_vm14, %v4800_v33, %v4801_v34  ;;  %v3579_v41 = vld [vmem:[#allocation2 + $0x94] sm:$0xf] }
 0x178   : > { %2964 = vst.msk [vmem:[#allocation3 + $0x30] sm:$0xf] %vm2951_vm1, %v2880_v48  ;;  %v2878_v31 = vpop.permute.xlu1 %2877  ;;  %v3302_v48 = vrot.slane %v3300_v38, 5  ;;  %v5586_v38 = vrot.slane %v3575_v18, 9 }
 0x179   : > { %2963 = vst.msk [vmem:[#allocation3 + $0x2c] sm:$0xf] %vm2951_vm1, %v2878_v31  ;;  %4546 = vrot.lane.b32.xlu0 %v4363_v40, %s5886_s10  ;;  %v3294_v31 = vrot.slane %v3292_v28, 5  ;;  %v4799_v53 = vsel %vm6389_vm14, %v5601_v43, %v4798_v12  ;;  %v3280_v37 = vrot.slane %v3279_v25, 4  ;;  %v3720_v28 = vrot.slane %v3579_v41, 5 }
 0x17a   : > { %4544 = vrot.lane.b32.xlu1 %v4353_v49, %s5886_s10  ;;  %v3303_v42 = vor.u32 %v3302_v48, %v3299_v47  ;;  %v3580_v25 = vld [vmem:[#allocation2 + $0x98] sm:$0x1]  ;;  %v3578_v48 = vld [vmem:[#allocation2 + $0x90] sm:$0xe]  ;;  %v4085_v41 = vld [vmem:[#allocation2 + $0x3c] sm:$0xf] }
 0x17b   : > { %v2884_v60 = vpop.permute.xlu0 %2883  ;;  %v3295_v56 = vsel %vm6048_vm11, %v3290_v50, %v3294_v31  ;;  %v3723_v50 = vrot.slane %v3580_v25, 5  ;;  %v5587_v13 = vrot.slane %v3578_v48, 9  ;;  %v4197_v25 = vshrl.u32 %v4085_v41, 16 }
 0x17c   : > { %2966 = vst.msk [vmem:[#allocation3 + $0x38] sm:$0xf] %vm2951_vm1, %v2884_v60  ;;  %v2882_v6 = vpop.permute.xlu1 %2881  ;;  %v3304_v3 = vrot.slane %v3303_v42, 4  ;;  %v4082_v42 = vld [vmem:[#allocation2 + $0x30] sm:$0xf] }
 0x17d   : > { %2965 = vst.msk [vmem:[#allocation3 + $0x34] sm:$0xf] %vm2951_vm1, %v2882_v6  ;;  %4847 = vrot.lane.b32.xlu0 %v4739_v55, %s5887_s27 }
 0x17e   : > { %4845 = vrot.lane.b32.xlu1 %v4736_v1, %s5887_s27  ;;  %v3285_v1 = vsel %vm6048_vm11, %v3280_v37, %v6815_v16  ;;  %v3309_v11 = vsel %vm6048_vm11, %v3304_v3, %v3308_v36  ;;  %v3555_v16 = vld [vmem:[#allocation2 + $0x34] sm:$0xf]  ;;  %v293_v36 = vld [vmem:[#allocation2 + $0xc8] sm:$0x1] }
 0x17f   : > { %v2888_v32 = vpop.permute.xlu0 %2887  ;;  %v3664_v23 = vrot.slane %v3555_v16, 5  ;;  %v294_v44 = vsel %vm5971_vm5, 0, %v293_v36  ;;  %v4083_v37 = vld [vmem:[#allocation2 + $0x34] sm:$0xf]  ;;  %v4378_v16 = vshrl.u32 %v4107_v59, 16 }
 0x180   : > { %2968 = vst.msk [vmem:[#allocation3 + $0x40] sm:$0xf] %vm2951_vm1, %v2888_v32  ;;  %v2886_v57 = vpop.permute.xlu1 %2885  ;;  %v3715_v32 = vrot.slane %v3713_v4, 4  ;;  %295 = vst [vmem:[#allocation2 + $0xc8] sm:$0x1] %v294_v44  ;;  %v4200_v44 = vshll.u32 %v4085_v41, 16 }
 0x181   : > { %2967 = vst.msk [vmem:[#allocation3 + $0x3c] sm:$0xf] %vm2951_vm1, %v2886_v57  ;;  %4879 = vrot.lane.b32.xlu0 %v4795_v7, %s5887_s27  ;;  %v3551_v7 = vld [vmem:[#allocation2 + $0x24] sm:$0xe]  ;;  %v3556_v57 = vld [vmem:[#allocation2 + $0x38] sm:$0x1] }
 0x182   : > { %4877 = vrot.lane.b32.xlu1 %v4792_v9, %s5887_s27  ;;  %v3319_v9 = vsel %vm6048_vm11, %v3314_v58, %v3318_v62  ;;  %v5578_v12 = vrot.slane %v3551_v7, 9  ;;  %v3717_v33 = vsel %vm6389_vm14, %v3715_v32, %v3716_v17  ;;  %v3666_v34 = vrot.slane %v3664_v23, 4  ;;  %v3903_v17 = vld [vmem:[#allocation2 + $0x90] sm:$0xf] }
 0x183   : > { %v2892_v40 = vpop.permute.xlu0 %2891  ;;  %v3667_v35 = vrot.slane %v3556_v57, 5  ;;  %v4182_v62 = vshll.u32 %v4083_v37, 16 }
 0x184   : > { %2970 = vst.msk [vmem:[#allocation3 + $0x48] sm:$0xf] %vm2951_vm1, %v2892_v40  ;;  %v2890_v49 = vpop.permute.xlu1 %2889  ;;  %v3658_v26 = vsel %vm6389_vm14, %v5578_v12, %v3657_v63  ;;  %v3714_v40 = vsel %vm6389_vm14, %v5586_v38, %v3713_v4  ;;  %v4186_v63 = vshrl.u32 %v4083_v37, 16  ;;  %v4084_v12 = vld [vmem:[#allocation2 + $0x38] sm:$0x1] }
 0x185   : > { %2969 = vst.msk [vmem:[#allocation3 + $0x44] sm:$0xf] %vm2951_vm1, %v2890_v49  ;;  %4851 = vrot.lane.b32.xlu0 %v4746_v27, %s5887_s27  ;;  %v3668_v49 = vsel %vm6389_vm14, %v3666_v34, %v3667_v35  ;;  %v6893_v19 = vrot.slane %v4182_v62, 5  ;;  %v4192_v38 = vshll.u32 %v4084_v12, 16  ;;  %v3890_v35 = vld [vmem:[#allocation2 + $0x40] sm:$0xf] }
 0x186   : > { %4849 = vrot.lane.b32.xlu1 %v4743_v30, %s5887_s27  ;;  %v3554_v30 = vld [vmem:[#allocation2 + $0x30] sm:$0xe]  ;;  %v4188_v4 = vrot.slane %v4186_v63, 4  ;;  %v3905_v37 = vld [vmem:[#allocation2 + $0x9c] sm:$0xf]  ;;  %v4199_v62 = vrot.slane %v4197_v25, 4 }
 0x187   : > { %v2896_v46 = vpop.permute.xlu0 %2895  ;;  %v5579_v43 = vrot.slane %v3554_v30, 9  ;;  %v830_v58 = vld [vmem:[#allocation2 + $0xc8] sm:$0x1]  ;;  %v4380_v30 = vrot.slane %v4378_v16, 4  ;;  %v4202_v63 = vrot.slane %v4200_v44, 5 }
 0x188   : > { %2972 = vst.msk [vmem:[#allocation3 + $0x50] sm:$0xf] %vm2951_vm1, %v2896_v46  ;;  %v2894_v55 = vpop.permute.xlu1 %2893  ;;  %v4111_v16 = vld [vmem:[#allocation2 + $0xa4] sm:$0x1]  ;;  %v4645_v25 = vld [vmem:[#allocation2 + $0x38] sm:$0x1] }
 0x189   : > { %2971 = vst.msk [vmem:[#allocation3 + $0x4c] sm:$0xf] %vm2951_vm1, %v2894_v55  ;;  %4883 = vrot.lane.b32.xlu0 %v4802_v45, %s5887_s27  ;;  %v3722_v45 = vrot.slane %v3720_v28, 4  ;;  %v3665_v51 = vsel %vm6389_vm14, %v5579_v43, %v3664_v23  ;;  %v4086_v23 = vld [vmem:[#allocation2 + $0x40] sm:$0xf] }
 0x18a   : > { %4881 = vrot.lane.b32.xlu1 %v4799_v53, %s5887_s27  ;;  %v668_v53 = vrot.slane %v6486_v8, 4  ;;  %v4206_v36 = vshll.u32 %v4086_v23, 16  ;;  %v3889_v43 = vld [vmem:[#allocation2 + $0x3c] sm:$0xf]  ;;  %v240_v44 = vld [vmem:[#allocation2 + $0xcc] sm:$0x1] }
 0x18b   : > { %v2900_v60 = vpop.permute.xlu0 %2899  ;;  %v3724_v54 = vsel %vm6389_vm14, %v3722_v45, %v3723_v50  ;;  %v4194_v45 = vrot.slane %v4192_v38, 5  ;;  %v4109_v50 = vld [vmem:[#allocation2 + $0x9c] sm:$0xf] }
 0x18c   : > { %2974 = vst.msk [vmem:[#allocation3 + $0x58] sm:$0xf] %vm2951_vm1, %v2900_v60  ;;  %v2898_v6 = vpop.permute.xlu1 %2897  ;;  %v4173_v60 = vshrl.u32 %v4082_v42, 16  ;;  %v831_v3 = vsel %vm5966_vm4, %v668_v53, %v830_v58 }
 0x18d   : > { %2973 = vst.msk [vmem:[#allocation3 + $0x54] sm:$0xf] %vm2951_vm1, %v2898_v6  ;;  %3458 = vrot.lane.b32.xlu0 %v3295_v56, %s5883_s7  ;;  %v3721_v56 = vsel %vm6389_vm14, %v5587_v13, %v3720_v28  ;;  %v4106_v6 = vld [vmem:[#allocation2 + $0x90] sm:$0xf]  ;;  %832 = vst [vmem:[#allocation2 + $0xc8] sm:$0x1] %v831_v3 }
 0x18e   : > { %3456 = vrot.lane.b32.xlu1 %v3285_v1, %s5883_s7  ;;  %v4176_v1 = vshll.u32 %v4082_v42, 16  ;;  %v4368_v18 = vshll.u32 %v4106_v6, 16  ;;  %v4108_v28 = vld [vmem:[#allocation2 + $0x98] sm:$0x1]  ;;  %v6910_v42 = vrot.slane %v4206_v36, 5 }
 0x18f   : > { %v2904_v61 = vpop.permute.xlu0 %2903 }
 0x190   : > { %2976 = vst.msk [vmem:[#allocation3 + $0x60] sm:$0xf] %vm2951_vm1, %v2904_v61  ;;  %v2902_v14 = vpop.permute.xlu1 %2901  ;;  %v4175_v61 = vrot.slane %v4173_v60, 4  ;;  %v4370_v34 = vrot.slane %v4368_v18, 5  ;;  %v4389_v60 = vshrl.u32 %v4109_v50, 16 }
 0x191   : > { %2975 = vst.msk [vmem:[#allocation3 + $0x5c] sm:$0xf] %vm2951_vm1, %v2902_v14  ;;  %3462 = vrot.lane.b32.xlu0 %v3319_v9, %s5883_s7  ;;  %v3887_v9 = vld [vmem:[#allocation2 + $0x30] sm:$0xf]  ;;  %v4365_v14 = vshrl.u32 %v4106_v6, 16 }
 0x192   : > { %3460 = vrot.lane.b32.xlu1 %v3309_v11, %s5883_s7  ;;  %v4178_v11 = vrot.slane %v4176_v1, 5  ;;  %v4392_v1 = vshll.u32 %v4109_v50, 16  ;;  %v4669_v50 = vld [vmem:[#allocation2 + $0x98] sm:$0x1] }
 0x193   : > { %v2908_v24 = vpop.permute.xlu0 %2907 }
 0x194   : > { %2978 = vst.msk [vmem:[#allocation3 + $0x68] sm:$0xf] %vm2951_vm1, %v2908_v24  ;;  %v2906_v27 = vpop.permute.xlu1 %2905  ;;  %v4179_v57 = vor.u32 %v4178_v11, %v4175_v61  ;;  %v4394_v18 = vrot.slane %v4392_v1, 5 }
 0x195   : > { %2977 = vst.msk [vmem:[#allocation3 + $0x64] sm:$0xf] %vm2951_vm1, %v2906_v27  ;;  %3763 = vrot.lane.b32.xlu0 %v3661_v20, %s5884_s8  ;;  %v3904_v20 = vld [vmem:[#allocation2 + $0x94] sm:$0xf]  ;;  %v6902_v27 = vrot.slane %v4374_v15, 5  ;;  %v4203_v15 = vor.u32 %v4202_v63, %v4199_v62 }
 0x196   : > { %3761 = vrot.lane.b32.xlu1 %v3658_v26, %s5884_s8  ;;  %v4189_v26 = vor.u32 %v4188_v4, %v6893_v19  ;;  %v4667_v62 = vld [vmem:[#allocation2 + $0x90] sm:$0xe] }
 0x197   : > { %v2912_v39 = vpop.permute.xlu0 %2911  ;;  %v4381_v13 = vor.u32 %v4380_v30, %v6902_v27  ;;  %v4644_v30 = vld [vmem:[#allocation2 + $0x34] sm:$0xf] }
 0x198   : > { %2980 = vst.msk [vmem:[#allocation3 + $0x70] sm:$0xf] %vm2951_vm1, %v2912_v39  ;;  %v2910_v47 = vpop.permute.xlu1 %2909  ;;  %v4210_v39 = vshrl.u32 %v4086_v23, 16 }
 0x199   : > { %2979 = vst.msk [vmem:[#allocation3 + $0x6c] sm:$0xf] %vm2951_vm1, %v2910_v47  ;;  %3795 = vrot.lane.b32.xlu0 %v3717_v33, %s5884_s8  ;;  %v4367_v33 = vrot.slane %v4365_v14, 4  ;;  %v4110_v47 = vld [vmem:[#allocation2 + $0xa0] sm:$0xf]  ;;  %v4382_v6 = vrot.slane %v4381_v13, 4 }
 0x19a   : > { %3793 = vrot.lane.b32.xlu1 %v3714_v40, %s5884_s8  ;;  %v4391_v14 = vrot.slane %v4389_v60, 4  ;;  %v4648_v60 = vld [vmem:[#allocation2 + $0x44] sm:$0x1] }
 0x19b   : > { %v2916_v31 = vpop.permute.xlu0 %2915  ;;  %v4371_v53 = vor.u32 %v4370_v34, %v4367_v33  ;;  %v6937_v34 = vld [vmem:[#allocation2 + $0x94] sm:$0xf] }
 0x19c   : > { %2982 = vst.msk [vmem:[#allocation3 + $0x78] sm:$0xf] %vm2951_vm1, %v2916_v31  ;;  %v2914_v46 = vpop.permute.xlu1 %2913  ;;  %v3906_v31 = vld [vmem:[#allocation2 + $0xa0] sm:$0xf]  ;;  %v4395_v41 = vor.u32 %v4394_v18, %v4391_v14  ;;  %v4759_v14 = vrot.slane %v4648_v60, 5 }
 0x19d   : > { %2981 = vst.msk [vmem:[#allocation3 + $0x74] sm:$0xf] %vm2951_vm1, %v2914_v46  ;;  %3767 = vrot.lane.b32.xlu0 %v3668_v49, %s5884_s8  ;;  %v4190_v49 = vrot.slane %v4189_v26, 4  ;;  %v4384_v46 = vshll.u32 %v4108_v28, 16  ;;  %v4372_v12 = vrot.slane %v4371_v53, 4 }
 0x19e   : > { %3765 = vrot.lane.b32.xlu1 %v3665_v51, %s5884_s8  ;;  %v4180_v51 = vrot.slane %v4179_v57, 4  ;;  %v4204_v57 = vrot.slane %v4203_v15, 4  ;;  %v3020_v53 = vld [vmem:[#allocation2 + $0x9c] sm:$0xf]  ;;  %v4672_v18 = vld [vmem:[#allocation2 + $0xa4] sm:$0x1] }
 0x19f   : > { %v3417_v55 = vpop.permute.xlu0 %3416  ;;  %v4377_v38 = vsel %vm6048_vm11, %v4372_v12, %v6902_v27  ;;  %v4749_v27 = vrot.slane %v4644_v30, 5  ;;  %v3321_v1 = vshrl.u32 %v3020_v53, 16  ;;  %v296_v30 = vld [vmem:[#allocation2 + $0xd4] sm:$0x1] }
 0x1a0   : > { %3513 = vst.msk [vmem:[#allocation3] sm:$0xf] %vm3512_vm3, %v3417_v55  ;;  %v2918_v8 = vpop.permute.xlu1 %2917  ;;  %v4398_v55 = vshll.u32 %v4110_v47, 16  ;;  %v4185_v59 = vsel %vm6048_vm11, %v4180_v51, %v6893_v19 }
 0x1a1   : > { %2983 = vst.msk [vmem:[#allocation3 + $0x7c] sm:$0xf] %vm2951_vm1, %v2918_v8  ;;  %3799 = vrot.lane.b32.xlu0 %v3724_v54, %s5884_s8  ;;  %v4212_v54 = vrot.slane %v4210_v39, 4  ;;  %v4087_v8 = vld [vmem:[#allocation2 + $0x44] sm:$0x1]  ;;  %v4751_v13 = vrot.slane %v4749_v27, 4 }
 0x1a2   : > { %3797 = vrot.lane.b32.xlu1 %v3721_v56, %s5884_s8  ;;  %v4402_v56 = vshrl.u32 %v4110_v47, 16  ;;  %v6922_v4 = vrot.slane %v4398_v55, 5  ;;  %v3021_v55 = vld [vmem:[#allocation2 + $0xa0] sm:$0xf] }
 0x1a3   : > { %v3421_v7 = vpop.permute.xlu0 %3420 }
 0x1a4   : > { %3515 = vst.msk [vmem:[#allocation3 + $0x8] sm:$0xf] %vm3512_vm3, %v3421_v7  ;;  %v3419_v10 = vpop.permute.xlu1 %3418  ;;  %v4386_v7 = vrot.slane %v4384_v46, 5  ;;  %v4404_v61 = vrot.slane %v4402_v56, 4  ;;  %v4752_v46 = vrot.slane %v4645_v25, 5 }
 0x1a5   : > { %3514 = vst.msk [vmem:[#allocation3 + $0x4] sm:$0xf] %vm3512_vm3, %v3419_v10  ;;  %3957 = vrot.lane.b32.xlu0 %v3888_v5, %s5885_s9  ;;  %v4195_v5 = vsel %vm6048_vm11, %v4190_v49, %v4194_v45  ;;  %v4216_v10 = vshll.u32 %v4087_v8, 16  ;;  %v4805_v49 = vrot.slane %v6937_v34, 5  ;;  %v241_v45 = vsel %vm5966_vm4, 0, %v240_v44 }
 0x1a6   : > { %3955 = vrot.lane.b32.xlu1 %v3887_v9, %s5885_s9  ;;  %v4213_v9 = vor.u32 %v4212_v54, %v6910_v42  ;;  %v4387_v19 = vsel %vm6048_vm11, %v4382_v6, %v4386_v7  ;;  %v4405_v23 = vor.u32 %v4404_v61, %v6922_v4  ;;  %242 = vst [vmem:[#allocation2 + $0xcc] sm:$0x1] %v241_v45  ;;  %v4808_v8 = vrot.slane %v4669_v50, 5  ;;  %v4646_v61 = vld [vmem:[#allocation2 + $0x3c] sm:$0xe] }
 0x1a7   : > { %v3425_v32 = vpop.permute.xlu0 %3424  ;;  %v3330_v6 = vshll.u32 %v3021_v55, 16  ;;  %v3334_v7 = vshrl.u32 %v3021_v55, 16  ;;  %v3024_v25 = vld [vmem:[#allocation2 + $0xac] sm:$0xf]  ;;  %v4815_v44 = vrot.slane %v4672_v18, 5 }
 0x1a8   : > { %3517 = vst.msk [vmem:[#allocation3 + $0x10] sm:$0xf] %vm3512_vm3, %v3425_v32  ;;  %v3423_v24 = vpop.permute.xlu1 %3422  ;;  %v4214_v32 = vrot.slane %v4213_v9, 4  ;;  %v4406_v28 = vrot.slane %v4405_v23, 4  ;;  %v3558_v18 = vld [vmem:[#allocation2 + $0x40] sm:$0xf] }
 0x1a9   : > { %3516 = vst.msk [vmem:[#allocation3 + $0xc] sm:$0xf] %vm3512_vm3, %v3423_v24  ;;  %3989 = vrot.lane.b32.xlu0 %v3904_v20, %s5885_s9  ;;  %v4408_v24 = vshll.u32 %v4111_v16, 16 }
 0x1aa   : > { %3987 = vrot.lane.b32.xlu1 %v3903_v17, %s5885_s9  ;;  %v4218_v17 = vrot.slane %v4216_v10, 5 }
 0x1ab   : > { %v3429_v40 = vpop.permute.xlu0 %3428  ;;  %v4410_v36 = vrot.slane %v4408_v24, 5 }
 0x1ac   : > { %3519 = vst.msk [vmem:[#allocation3 + $0x18] sm:$0xf] %vm3512_vm3, %v3429_v40  ;;  %v3427_v48 = vpop.permute.xlu1 %3426  ;;  %v4209_v40 = vsel %vm6048_vm11, %v4204_v57, %v6910_v42 }
 0x1ad   : > { %3518 = vst.msk [vmem:[#allocation3 + $0x14] sm:$0xf] %vm3512_vm3, %v3427_v48  ;;  %3961 = vrot.lane.b32.xlu0 %v3890_v35, %s5885_s9  ;;  %v4219_v35 = vsel %vm6048_vm11, %v4214_v32, %v4218_v17  ;;  %v4643_v48 = vld [vmem:[#allocation2 + $0x30] sm:$0xe]  ;;  %v4411_v51 = vsel %vm6048_vm11, %v4406_v28, %v4410_v36  ;;  %v4670_v32 = vld [vmem:[#allocation2 + $0x9c] sm:$0xe] }
 0x1ae   : > { %3959 = vrot.lane.b32.xlu1 %v3889_v43, %s5885_s9  ;;  %v4396_v43 = vrot.slane %v4395_v41, 4  ;;  %v5594_v54 = vrot.slane %v4643_v48, 9  ;;  %v3323_v17 = vrot.slane %v3321_v1, 4 }
 0x1af   : > { %v3433_v58 = vpop.permute.xlu0 %3432 }
 0x1b0   : > { %3521 = vst.msk [vmem:[#allocation3 + $0x20] sm:$0xf] %vm3512_vm3, %v3433_v58  ;;  %v3431_v3 = vpop.permute.xlu1 %3430  ;;  %v4401_v42 = vsel %vm6048_vm11, %v4396_v43, %v6922_v4  ;;  %v4807_v58 = vrot.slane %v4805_v49, 4  ;;  %v4750_v10 = vsel %vm6389_vm14, %v5594_v54, %v4749_v27  ;;  %v5602_v4 = vrot.slane %v4667_v62, 9 }
 0x1b1   : > { %3520 = vst.msk [vmem:[#allocation3 + $0x1c] sm:$0xf] %vm3512_vm3, %v3431_v3  ;;  %3993 = vrot.lane.b32.xlu0 %v3906_v31, %s5885_s9  ;;  %v6951_v31 = vld [vmem:[#allocation2 + $0x40] sm:$0xf]  ;;  %v3324_v3 = vshll.u32 %v3020_v53, 16  ;;  %v5595_v27 = vrot.slane %v4646_v61, 9 }
 0x1b2   : > { %3991 = vrot.lane.b32.xlu1 %v3905_v37, %s5885_s9  ;;  %v4756_v63 = vrot.slane %v6951_v31, 5  ;;  %v4809_v15 = vsel %vm6389_vm14, %v4807_v58, %v4808_v8  ;;  %v4806_v36 = vsel %vm6389_vm14, %v5602_v4, %v4805_v49  ;;  %v3340_v49 = vshll.u32 %v3022_v22, 16 }
 0x1b3   : > { %v3437_v11 = vpop.permute.xlu0 %3436  ;;  %v3326_v23 = vrot.slane %v3324_v3, 5  ;;  %v3358_v53 = vshrl.u32 %v3024_v25, 16 }
 0x1b4   : > { %3523 = vst.msk [vmem:[#allocation3 + $0x28] sm:$0xf] %vm3512_vm3, %v3437_v11  ;;  %v3435_v20 = vpop.permute.xlu1 %3434  ;;  %v3023_v11 = vld [vmem:[#allocation2 + $0xa8] sm:$0xf]  ;;  %v4758_v16 = vrot.slane %v4756_v63, 4  ;;  %v3342_v8 = vrot.slane %v3340_v49, 5 }
 0x1b5   : > { %3522 = vst.msk [vmem:[#allocation3 + $0x24] sm:$0xf] %vm3512_vm3, %v3435_v20  ;;  %4518 = vrot.lane.b32.xlu0 %v4195_v5, %s5886_s10  ;;  %v4753_v5 = vsel %vm6389_vm14, %v4751_v13, %v4752_v46  ;;  %v1813_v20 = vld [vmem:[#allocation2 + $0xcc] sm:$0xf]  ;;  %v3345_v57 = vshrl.u32 %v3023_v11, 16  ;;  %v3348_v41 = vshll.u32 %v3023_v11, 16  ;;  %v3327_v48 = vor.u32 %v3326_v23, %v3323_v17 }
 0x1b6   : > { %4516 = vrot.lane.b32.xlu1 %v4185_v59, %s5886_s10  ;;  %v6968_v59 = vld [vmem:[#allocation2 + $0xa0] sm:$0xf]  ;;  %v1814_v24 = vsel %vm6005_vm7, 0, %v1813_v20  ;;  %v4760_v43 = vsel %vm6389_vm14, %v4758_v16, %v4759_v14  ;;  %v3354_v46 = vshll.u32 %v3024_v25, 16  ;;  %v3557_v16 = vld [vmem:[#allocation2 + $0x3c] sm:$0xe] }
 0x1b7   : > { %v3451_v26 = vpop.permute.xlu0 %3450  ;;  %1815 = vst [vmem:[#allocation2 + $0xcc] sm:$0xf] %v1814_v24  ;;  %v3347_v45 = vrot.slane %v3345_v57, 4  ;;  %v3350_v50 = vrot.slane %v3348_v41, 5  ;;  %v3559_v41 = vld [vmem:[#allocation2 + $0x44] sm:$0x1] }
 0x1b8   : > { %3530 = vst.msk [vmem:[#allocation3 + $0x44] sm:$0xf] %vm3512_vm3, %v3451_v26  ;;  %v3449_v33 = vpop.permute.xlu1 %3448  ;;  %v6981_v26 = vrot.slane %v3330_v6, 5  ;;  %v3356_v3 = vrot.slane %v3354_v46, 5  ;;  %v3674_v22 = vrot.slane %v3559_v41, 5  ;;  %vm4941_vm7 = vcmask 290048  }
 0x1b9   : > { %3529 = vst.msk [vmem:[#allocation3 + $0x40] sm:$0xf] %vm3512_vm3, %v3449_v33  ;;  %4550 = vrot.lane.b32.xlu0 %v4387_v19, %s5886_s10  ;;  %v4812_v19 = vrot.slane %v6968_v59, 5  ;;  %v5800_v33 = vld [vmem:[#allocation2 + $0x4c] sm:$0xf]  ;;  %v3351_v62 = vor.u32 %v3350_v50, %v3347_v45 }
 0x1ba   : > { %4548 = vrot.lane.b32.xlu1 %v4377_v38, %s5886_s10  ;;  %v3336_v38 = vrot.slane %v3334_v7, 4  ;;  %v3025_v7 = vld [vmem:[#allocation2 + $0xb0] sm:$0x1]  ;;  %v3583_v25 = vld [vmem:[#allocation2 + $0xa4] sm:$0x1] }
 0x1bb   : > { %v3455_v39 = vpop.permute.xlu0 %3454  ;;  %v4814_v34 = vrot.slane %v4812_v19, 4  ;;  %v3352_v4 = vrot.slane %v3351_v62, 4  ;;  %v3730_v45 = vrot.slane %v3583_v25, 5  ;;  %v3585_v46 = vld [vmem:[#allocation2 + $0xac] sm:$0xf] }
 0x1bc   : > { %3532 = vst.msk [vmem:[#allocation3 + $0x4c] sm:$0xf] %vm3512_vm3, %v3455_v39  ;;  %v3453_v47 = vpop.permute.xlu1 %3452  ;;  %v297_v39 = vsel %vm5971_vm5, 0, %v296_v30  ;;  %v3337_v2 = vor.u32 %v3336_v38, %v6981_v26  ;;  %vm4043_vm5 = vcmask 224448   ;;  %v3581_v38 = vld [vmem:[#allocation2 + $0x9c] sm:$0xe] }
 0x1bd   : > { %3531 = vst.msk [vmem:[#allocation3 + $0x48] sm:$0xf] %vm3512_vm3, %v3453_v47  ;;  %4522 = vrot.lane.b32.xlu0 %v4219_v35, %s5886_s10  ;;  %v3166_v35 = vshrl.u32 %v5800_v33, 16  ;;  %298 = vst [vmem:[#allocation2 + $0xd4] sm:$0x1] %v297_v39  ;;  %v5603_v47 = vrot.slane %v4670_v32, 9  ;;  %v4816_v54 = vsel %vm6389_vm14, %v4814_v34, %v4815_v44  ;;  %v3357_v20 = vsel %vm6048_vm11, %v3352_v4, %v3356_v3 }
 0x1be   : > { %4520 = vrot.lane.b32.xlu1 %v4209_v40, %s5886_s10  ;;  %v3338_v58 = vrot.slane %v3337_v2, 4  ;;  %v3582_v30 = vld [vmem:[#allocation2 + $0xa0] sm:$0xf]  ;;  %v3561_v34 = vld [vmem:[#allocation2 + $0x4c] sm:$0xf] }
 0x1bf   : > { %v3756_v37 = vpop.permute.xlu0 %3755  ;;  %v3168_v13 = vrot.slane %v3166_v35, 4  ;;  %v4813_v55 = vsel %vm6389_vm14, %v5603_v47, %v4812_v19  ;;  %v5580_v19 = vrot.slane %v3557_v16, 9  ;;  %v5588_v35 = vrot.slane %v3581_v38, 9  ;;  %v3586_v62 = vld [vmem:[#allocation2 + $0xb0] sm:$0x1] }
 0x1c0   : > { %3851 = vst.msk [vmem:[#allocation3 + $0x4] sm:$0xf] %vm3849_vm6, %v3756_v37  ;;  %v3754_v56 = vpop.permute.xlu1 %3753  ;;  %v3727_v39 = vrot.slane %v3582_v30, 5  ;;  %v3678_v50 = vrot.slane %v3561_v34, 5  ;;  %v4112_v4 = vld [vmem:[#allocation2 + $0xa8] sm:$0xf] }
 0x1c1   : > { %3850 = vst.msk [vmem:[#allocation3] sm:$0xf] %vm3849_vm6, %v3754_v56  ;;  %4554 = vrot.lane.b32.xlu0 %v4411_v51, %s5886_s10  ;;  %v4757_v51 = vsel %vm6389_vm14, %v5595_v27, %v4756_v63  ;;  %v3328_v56 = vrot.slane %v3327_v48, 4  ;;  %v3169_v60 = vor.u32 %v3168_v13, %v6648_v21  ;;  %v3562_v13 = vld [vmem:[#allocation2 + $0x50] sm:$0x1] }
 0x1c2   : > { %4552 = vrot.lane.b32.xlu1 %v4401_v42, %s5886_s10  ;;  %v3001_v42 = vld [vmem:[#allocation2 + $0x50] sm:$0x1]  ;;  %v3728_v44 = vsel %vm6389_vm14, %v5588_v35, %v3727_v39  ;;  %v3729_v49 = vrot.slane %v3727_v39, 4  ;;  %v4115_v25 = vld [vmem:[#allocation2 + $0xb4] sm:$0xf] }
 0x1c3   : > { %v3788_v9 = vpop.permute.xlu0 %3787  ;;  %v3172_v1 = vshll.u32 %v3001_v42, 16  ;;  %v3333_v21 = vsel %vm6048_vm11, %v3328_v56, %v6981_v26  ;;  %v3170_v11 = vrot.slane %v3169_v60, 4  ;;  %v3671_v26 = vrot.slane %v3558_v18, 5  ;;  %v4090_v30 = vld [vmem:[#allocation2 + $0x50] sm:$0x1] }
 0x1c4   : > { %3867 = vst.msk [vmem:[#allocation3 + $0x44] sm:$0xf] %vm3849_vm6, %v3788_v9  ;;  %v3786_v12 = vpop.permute.xlu1 %3785  ;;  %v1818_v59 = vld [vmem:[#allocation2 + $0xd4] sm:$0x1]  ;;  %v3681_v56 = vrot.slane %v3562_v13, 5  ;;  %v4413_v18 = vshrl.u32 %v4112_v4, 16 }
 0x1c5   : > { %3866 = vst.msk [vmem:[#allocation3 + $0x40] sm:$0xf] %vm3849_vm6, %v3786_v12  ;;  %4855 = vrot.lane.b32.xlu0 %v4753_v5, %s5887_s27  ;;  %v3360_v5 = vrot.slane %v3358_v53, 4  ;;  %v1819_v9 = vsel %vm5966_vm4, 0, %v1818_v59  ;;  %v3174_v12 = vrot.slane %v3172_v1, 5  ;;  %v3672_v33 = vsel %vm6389_vm14, %v5580_v19, %v3671_v26 }
 0x1c6   : > { %4853 = vrot.lane.b32.xlu1 %v4750_v10, %s5887_s27  ;;  %1820 = vst [vmem:[#allocation2 + $0xd4] sm:$0x1] %v1819_v9  ;;  %v3343_v10 = vsel %vm6048_vm11, %v3338_v58, %v3342_v8  ;;  %v3673_v27 = vrot.slane %v3671_v26, 4  ;;  %vm4604_vm4 = vcmask 257248   ;;  %v3734_v58 = vrot.slane %v3585_v46, 5 }
 0x1c7   : > { %v3760_v28 = vpop.permute.xlu0 %3759  ;;  %v3361_v0 = vor.u32 %v3360_v5, %v3356_v3  ;;  %v3175_v17 = vsel %vm6048_vm11, %v3170_v11, %v3174_v12  ;;  %v3737_v59 = vrot.slane %v3586_v62, 5  ;;  %v3907_v19 = vld [vmem:[#allocation2 + $0xa8] sm:$0xf]  ;;  %v4114_v13 = vld [vmem:[#allocation2 + $0xb0] sm:$0x1] }
 0x1c8   : > { %3853 = vst.msk [vmem:[#allocation3 + $0xc] sm:$0xf] %vm3849_vm6, %v3760_v28  ;;  %v3758_v40 = vpop.permute.xlu1 %3757  ;;  %v3675_v2 = vsel %vm6389_vm14, %v3673_v27, %v3674_v22  ;;  %v3736_v5 = vrot.slane %v3734_v58, 4  ;;  %v3893_v27 = vld [vmem:[#allocation2 + $0x54] sm:$0xf] }
 0x1c9   : > { %3852 = vst.msk [vmem:[#allocation3 + $0x8] sm:$0xf] %vm3849_vm6, %v3758_v40  ;;  %4887 = vrot.lane.b32.xlu0 %v4809_v15, %s5887_s27  ;;  %v3364_v15 = vshll.u32 %v3025_v7, 16  ;;  %v3362_v23 = vrot.slane %v3361_v0, 4  ;;  %v3560_v40 = vld [vmem:[#allocation2 + $0x48] sm:$0xe] }
 0x1ca   : > { %4885 = vrot.lane.b32.xlu1 %v4806_v36, %s5887_s27  ;;  %v5581_v47 = vrot.slane %v3560_v40, 9  ;;  %v3738_v11 = vsel %vm6389_vm14, %v3736_v5, %v3737_v59  ;;  %v4432_v59 = vshll.u32 %v4114_v13, 16 }
 0x1cb   : > { %v3792_v31 = vpop.permute.xlu0 %3791  ;;  %v3366_v24 = vrot.slane %v3364_v15, 5 }
 0x1cc   : > { %3869 = vst.msk [vmem:[#allocation3 + $0x4c] sm:$0xf] %vm3849_vm6, %v3792_v31  ;;  %v3790_v37 = vpop.permute.xlu1 %3789  ;;  %v3584_v31 = vld [vmem:[#allocation2 + $0xa8] sm:$0xe]  ;;  %v3679_v53 = vsel %vm6389_vm14, %v5581_v47, %v3678_v50  ;;  %v4240_v47 = vshll.u32 %v4090_v30, 16 }
 0x1cd   : > { %3868 = vst.msk [vmem:[#allocation3 + $0x48] sm:$0xf] %vm3849_vm6, %v3790_v37  ;;  %4859 = vrot.lane.b32.xlu0 %v4760_v43, %s5887_s27  ;;  %v3367_v36 = vsel %vm6048_vm11, %v3362_v23, %v3366_v24  ;;  %v5589_v37 = vrot.slane %v3584_v31, 9  ;;  %v3892_v23 = vld [vmem:[#allocation2 + $0x4c] sm:$0xf] }
 0x1ce   : > { %4857 = vrot.lane.b32.xlu1 %v4757_v51, %s5887_s27  ;;  %v4091_v24 = vld [vmem:[#allocation2 + $0x54] sm:$0xf]  ;;  %v4242_v62 = vrot.slane %v4240_v47, 5 }
 0x1cf   : > { %v3950_v63 = vpop.permute.xlu0 %3949  ;;  %v3735_v60 = vsel %vm6389_vm14, %v5589_v37, %v3734_v58  ;;  %v4245_v22 = vshrl.u32 %v4091_v24, 16  ;;  %v4248_v39 = vshll.u32 %v4091_v24, 16  ;;  %v4437_v37 = vshrl.u32 %v4115_v25, 16 }
 0x1d0   : > { %4045 = vst.msk [vmem:[#allocation3 + $0x4] sm:$0xf] %vm4043_vm5, %v3950_v63  ;;  %v3948_v6 = vpop.permute.xlu1 %3947  ;;  %v4088_v63 = vld [vmem:[#allocation2 + $0x48] sm:$0xf] }
 0x1d1   : > { %4044 = vst.msk [vmem:[#allocation3] sm:$0xf] %vm4043_vm5, %v3948_v6  ;;  %4891 = vrot.lane.b32.xlu0 %v4816_v54, %s5887_s27  ;;  %v3731_v54 = vsel %vm6389_vm14, %v3729_v49, %v3730_v45  ;;  %v4221_v7 = vshrl.u32 %v4088_v63, 16  ;;  %v4224_v9 = vshll.u32 %v4088_v63, 16  ;;  %v3909_v49 = vld [vmem:[#allocation2 + $0xb4] sm:$0xf] }
 0x1d2   : > { %4889 = vrot.lane.b32.xlu1 %v4813_v55, %s5887_s27  ;;  %v3680_v55 = vrot.slane %v3678_v50, 4  ;;  %v4247_v46 = vrot.slane %v4245_v22, 4  ;;  %v4116_v63 = vld [vmem:[#allocation2 + $0xb8] sm:$0xf] }
 0x1d3   : > { %v3982_v61 = vpop.permute.xlu0 %3981  ;;  %v4223_v0 = vrot.slane %v4221_v7, 4  ;;  %v4226_v15 = vrot.slane %v4224_v9, 5  ;;  %v4093_v9 = vld [vmem:[#allocation2 + $0x5c] sm:$0x1] }
 0x1d4   : > { %4061 = vst.msk [vmem:[#allocation3 + $0x44] sm:$0xf] %vm4043_vm5, %v3982_v61  ;;  %v3980_v14 = vpop.permute.xlu1 %3979  ;;  %v3682_v3 = vsel %vm6389_vm14, %v3680_v55, %v3681_v56 }
 0x1d5   : > { %4060 = vst.msk [vmem:[#allocation3 + $0x40] sm:$0xf] %vm4043_vm5, %v3980_v14  ;;  %3466 = vrot.lane.b32.xlu0 %v3343_v10, %s5883_s7  ;;  %v3891_v10 = vld [vmem:[#allocation2 + $0x48] sm:$0xf]  ;;  %v4227_v38 = vor.u32 %v4226_v15, %v4223_v0  ;;  %v4450_v0 = vshrl.u32 %v4116_v63, 16 }
 0x1d6   : > { %3464 = vrot.lane.b32.xlu1 %v3333_v21, %s5883_s7  ;;  %v4089_v21 = vld [vmem:[#allocation2 + $0x4c] sm:$0xf] }
 0x1d7   : > { %v3954_v32 = vpop.permute.xlu0 %3953  ;;  %v4230_v16 = vshll.u32 %v4089_v21, 16  ;;  %v4234_v14 = vshrl.u32 %v4089_v21, 16  ;;  %v4228_v45 = vrot.slane %v4227_v38, 4  ;;  %v4439_v21 = vrot.slane %v4437_v37, 4  ;;  %v4674_v37 = vld [vmem:[#allocation2 + $0xac] sm:$0xf] }
 0x1d8   : > { %4047 = vst.msk [vmem:[#allocation3 + $0xc] sm:$0xf] %vm4043_vm5, %v3954_v32  ;;  %v3952_v57 = vpop.permute.xlu1 %3951  ;;  %v4113_v32 = vld [vmem:[#allocation2 + $0xac] sm:$0xf] }
 0x1d9   : > { %4046 = vst.msk [vmem:[#allocation3 + $0x8] sm:$0xf] %vm4043_vm5, %v3952_v57  ;;  %3468 = vrot.lane.b32.xlu0 %v3357_v20, %s5883_s7  ;;  %v4416_v20 = vshll.u32 %v4112_v4, 16  ;;  %v7069_v57 = vrot.slane %v4230_v16, 5  ;;  %v4236_v41 = vrot.slane %v4234_v14, 4 }
 0x1da   : > { %3438 = vrot.lane.b32.xlu1 %v3175_v17, %s5883_s7 }
 0x1db   : > { %v3986_v28 = vpop.permute.xlu0 %3985  ;;  %v4418_v35 = vrot.slane %v4416_v20, 5 }
 0x1dc   : > { %4063 = vst.msk [vmem:[#allocation3 + $0x4c] sm:$0xf] %vm4043_vm5, %v3986_v28  ;;  %v3984_v43 = vpop.permute.xlu1 %3983  ;;  %v4422_v28 = vshll.u32 %v4113_v32, 16 }
 0x1dd   : > { %4062 = vst.msk [vmem:[#allocation3 + $0x48] sm:$0xf] %vm4043_vm5, %v3984_v43  ;;  %3769 = vrot.lane.b32.xlu0 %v3672_v33, %s5884_s8  ;;  %v4415_v33 = vrot.slane %v4413_v18, 4  ;;  %v3908_v43 = vld [vmem:[#allocation2 + $0xac] sm:$0xf]  ;;  %v4434_v18 = vrot.slane %v4432_v59, 5 }
 0x1de   : > { %3470 = vrot.lane.b32.xlu1 %v3367_v36, %s5883_s7  ;;  %v4426_v36 = vshrl.u32 %v4113_v32, 16  ;;  %v4424_v31 = vrot.slane %v4422_v28, 5  ;;  %v4264_v32 = vshll.u32 %v4093_v9, 16  ;;  %v4675_v59 = vld [vmem:[#allocation2 + $0xb0] sm:$0x1] }
 0x1df   : > { %v4511_v48 = vpop.permute.xlu0 %4510  ;;  %v4419_v50 = vor.u32 %v4418_v35, %v4415_v33  ;;  %v4117_v33 = vld [vmem:[#allocation2 + $0xbc] sm:$0x1] }
 0x1e0   : > { %4606 = vst.msk [vmem:[#allocation3 + $0x4] sm:$0xf] %vm4604_vm4, %v4511_v48  ;;  %v4509_v51 = vpop.permute.xlu1 %4508  ;;  %v4092_v48 = vld [vmem:[#allocation2 + $0x58] sm:$0xf]  ;;  %v4266_v28 = vrot.slane %v4264_v32, 5 }
 0x1e1   : > { %4605 = vst.msk [vmem:[#allocation3] sm:$0xf] %vm4604_vm4, %v4509_v51  ;;  %3801 = vrot.lane.b32.xlu0 %v3728_v44, %s5884_s8  ;;  %v4237_v44 = vor.u32 %v4236_v41, %v7069_v57  ;;  %v4428_v51 = vrot.slane %v4426_v36, 4  ;;  %v4254_v55 = vshll.u32 %v4092_v48, 16  ;;  %v4258_v56 = vshrl.u32 %v4092_v48, 16 }
 0x1e2   : > { %3771 = vrot.lane.b32.xlu1 %v3675_v2, %s5884_s8  ;;  %v3894_v2 = vld [vmem:[#allocation2 + $0x58] sm:$0xf] }
 0x1e3   : > { %v4543_v42 = vpop.permute.xlu0 %4542  ;;  %v4429_v5 = vor.u32 %v4428_v51, %v4424_v31 }
 0x1e4   : > { %4622 = vst.msk [vmem:[#allocation3 + $0x44] sm:$0xf] %vm4604_vm4, %v4543_v42  ;;  %v4541_v8 = vpop.permute.xlu1 %4540  ;;  %v4440_v42 = vshll.u32 %v4115_v25, 16  ;;  %v4456_v25 = vshll.u32 %v4117_v33, 16 }
 0x1e5   : > { %4621 = vst.msk [vmem:[#allocation3 + $0x40] sm:$0xf] %vm4604_vm4, %v4541_v8  ;;  %3773 = vrot.lane.b32.xlu0 %v3679_v53, %s5884_s8  ;;  %v4250_v53 = vrot.slane %v4248_v39, 5  ;;  %v4430_v24 = vrot.slane %v4429_v5, 4 }
 0x1e6   : > { %3803 = vrot.lane.b32.xlu1 %v3731_v54, %s5884_s8 }
 0x1e7   : > { %v4515_v1 = vpop.permute.xlu0 %4514  ;;  %v4251_v7 = vor.u32 %v4250_v53, %v4247_v46  ;;  %v4435_v39 = vsel %vm6048_vm11, %v4430_v24, %v4434_v18  ;;  %v4458_v46 = vrot.slane %v4456_v25, 5  ;;  %v4673_v53 = vld [vmem:[#allocation2 + $0xa8] sm:$0xe]  ;;  %v4822_v18 = vrot.slane %v4675_v59, 5  ;;  %v4654_v24 = vld [vmem:[#allocation2 + $0x5c] sm:$0x1] }
 0x1e8   : > { %4608 = vst.msk [vmem:[#allocation3 + $0xc] sm:$0xf] %vm4604_vm4, %v4515_v1  ;;  %v4513_v6 = vpop.permute.xlu1 %4512  ;;  %v4233_v1 = vsel %vm6048_vm11, %v4228_v45, %v7069_v57  ;;  %v4452_v57 = vrot.slane %v4450_v0, 4 }
 0x1e9   : > { %4607 = vst.msk [vmem:[#allocation3 + $0x8] sm:$0xf] %vm4604_vm4, %v4513_v6  ;;  %3805 = vrot.lane.b32.xlu0 %v3735_v60, %s5884_s8  ;;  %v3910_v60 = vld [vmem:[#allocation2 + $0xb8] sm:$0xf]  ;;  %v4420_v6 = vrot.slane %v4419_v50, 4 }
 0x1ea   : > { %3775 = vrot.lane.b32.xlu1 %v3682_v3, %s5884_s8  ;;  %v4238_v3 = vrot.slane %v4237_v44, 4  ;;  %v4651_v50 = vld [vmem:[#allocation2 + $0x50] sm:$0x1] }
 0x1eb   : > { %v4547_v61 = vpop.permute.xlu0 %4546  ;;  %v4425_v20 = vsel %vm6048_vm11, %v4420_v6, %v4424_v31  ;;  %v4652_v6 = vld [vmem:[#allocation2 + $0x54] sm:$0xe] }
 0x1ec   : > { %4624 = vst.msk [vmem:[#allocation3 + $0x4c] sm:$0xf] %vm4604_vm4, %v4547_v61  ;;  %v4545_v12 = vpop.permute.xlu1 %4544  ;;  %v4256_v61 = vrot.slane %v4254_v55, 5  ;;  %v4243_v14 = vsel %vm6048_vm11, %v4238_v3, %v4242_v62  ;;  %v4766_v62 = vrot.slane %v4651_v50, 5 }
 0x1ed   : > { %4623 = vst.msk [vmem:[#allocation3 + $0x48] sm:$0xf] %vm4604_vm4, %v4545_v12  ;;  %3963 = vrot.lane.b32.xlu0 %v3891_v10, %s5885_s9  ;;  %v4442_v10 = vrot.slane %v4440_v42, 5  ;;  %v4446_v12 = vshll.u32 %v4116_v63, 16  ;;  %v5604_v63 = vrot.slane %v4673_v53, 9 }
 0x1ee   : > { %3807 = vrot.lane.b32.xlu1 %v3738_v11, %s5884_s8  ;;  %v4260_v11 = vrot.slane %v4258_v56, 4  ;;  %v3006_v53 = vld [vmem:[#allocation2 + $0x64] sm:$0xf] }
 0x1ef   : > { %v4848_v17 = vpop.permute.xlu0 %4847  ;;  %v4448_v38 = vrot.slane %v4446_v12, 5  ;;  %v4676_v12 = vld [vmem:[#allocation2 + $0xb4] sm:$0xe] }
 0x1f0   : > { %4943 = vst.msk [vmem:[#allocation3 + $0x4] sm:$0xf] %vm4941_vm7, %v4848_v17  ;;  %v4846_v26 = vpop.permute.xlu1 %4845  ;;  %v4443_v17 = vor.u32 %v4442_v10, %v4439_v21  ;;  %v4677_v21 = vld [vmem:[#allocation2 + $0xb8] sm:$0xf] }
 0x1f1   : > { %4942 = vst.msk [vmem:[#allocation3] sm:$0xf] %vm4941_vm7, %v4846_v26  ;;  %3995 = vrot.lane.b32.xlu0 %v3907_v19, %s5885_s9  ;;  %v4252_v19 = vrot.slane %v4251_v7, 4  ;;  %v4261_v26 = vor.u32 %v4260_v11, %v4256_v61  ;;  %v4653_v7 = vld [vmem:[#allocation2 + $0x58] sm:$0xf] }
 0x1f2   : > { %3965 = vrot.lane.b32.xlu1 %v3892_v23, %s5885_s9  ;;  %v4444_v36 = vrot.slane %v4443_v17, 4 }
 0x1f3   : > { %v4880_v40 = vpop.permute.xlu0 %4879  ;;  %v4257_v35 = vsel %vm6048_vm11, %v4252_v19, %v4256_v61  ;;  %v3027_v19 = vld [vmem:[#allocation2 + $0xb8] sm:$0xf] }
 0x1f4   : > { %4959 = vst.msk [vmem:[#allocation3 + $0x44] sm:$0xf] %vm4941_vm7, %v4880_v40  ;;  %v4878_v34 = vpop.permute.xlu1 %4877  ;;  %v4262_v40 = vrot.slane %v4261_v26, 4  ;;  %v4826_v26 = vrot.slane %v4677_v21, 5 }
 0x1f5   : > { %4958 = vst.msk [vmem:[#allocation3 + $0x40] sm:$0xf] %vm4941_vm7, %v4878_v34  ;;  %3967 = vrot.lane.b32.xlu0 %v3893_v27, %s5885_s9  ;;  %v4650_v27 = vld [vmem:[#allocation2 + $0x4c] sm:$0xf]  ;;  %v4649_v34 = vld [vmem:[#allocation2 + $0x48] sm:$0xe] }
 0x1f6   : > { %3997 = vrot.lane.b32.xlu1 %v3908_v43, %s5885_s9  ;;  %v4453_v43 = vor.u32 %v4452_v57, %v4448_v38  ;;  %v4763_v48 = vrot.slane %v4650_v27, 5  ;;  %v5596_v45 = vrot.slane %v4649_v34, 9  ;;  %v4267_v51 = vsel %vm6048_vm11, %v4262_v40, %v4266_v28 }
 0x1f7   : > { %v4852_v54 = vpop.permute.xlu0 %4851  ;;  %v3382_v40 = vshrl.u32 %v3027_v19, 16 }
 0x1f8   : > { %4945 = vst.msk [vmem:[#allocation3 + $0xc] sm:$0xf] %vm4941_vm7, %v4852_v54  ;;  %v4850_v58 = vpop.permute.xlu1 %4849  ;;  %v5783_v8 = vld [vmem:[#allocation3] sm:$0xff]   ;;  %v4454_v13 = vrot.slane %v4453_v43, 4  ;;  %v4765_v56 = vrot.slane %v4763_v48, 4 }
 0x1f9   : > { %4944 = vst.msk [vmem:[#allocation3 + $0x8] sm:$0xf] %vm4941_vm7, %v4850_v58  ;;  %3999 = vrot.lane.b32.xlu0 %v3909_v49, %s5885_s9  ;;  %5676 = vmatprep.mubr.msk.bf16.mxu0 %vm5113_vm8, %v5783_v8  ;;  %v4449_v49 = vsel %vm6048_vm11, %v4444_v36, %v4448_v38  ;;  %v3003_v58 = vld [vmem:[#allocation2 + $0x58] sm:$0xf]  ;;  %v4764_v8 = vsel %vm6389_vm14, %v5596_v45, %v4763_v48  ;;  %v3005_v38 = vld [vmem:[#allocation2 + $0x60] sm:$0xf] }
 0x1fa   : > { %3969 = vrot.lane.b32.xlu1 %v3894_v2, %s5885_s9  ;;  %v3002_v2 = vld [vmem:[#allocation2 + $0x54] sm:$0xf]  ;;  %v4459_v5 = vsel %vm6048_vm11, %v4454_v13, %v4458_v46  ;;  %v3186_v61 = vshll.u32 %v3003_v58, 16  ;;  %v3190_v11 = vshrl.u32 %v3003_v58, 16  ;;  %v4767_v17 = vsel %vm6389_vm14, %v4765_v56, %v4766_v62  ;;  %v3004_v36 = vld [vmem:[#allocation2 + $0x5c] sm:$0x1] }
 0x1fb   : > { %v4884_v4 = vpop.permute.xlu0 %4883  ;;  %v3177_v54 = vshrl.u32 %v3002_v2, 16  ;;  %v3180_v55 = vshll.u32 %v3002_v2, 16  ;;  %v3201_v25 = vshrl.u32 %v3005_v38, 16  ;;  %v3204_v34 = vshll.u32 %v3005_v38, 16  ;;  %v3029_v45 = vld [vmem:[#allocation2 + $0xc0] sm:$0xf] }
 0x1fc   : > { %4961 = vst.msk [vmem:[#allocation3 + $0x4c] sm:$0xf] %vm4941_vm7, %v4884_v4  ;;  %v4882_v15 = vpop.permute.xlu1 %4881  ;;  %v5785_v16 = vld [vmem:[#allocation3 + $0x40] sm:$0xff]   ;;  %v3192_v28 = vrot.slane %v3190_v11, 4  ;;  %v4773_v2 = vrot.slane %v4654_v24, 5  ;;  %v3196_v46 = vshll.u32 %v3004_v36, 16 }
 0x1fd   : > { %4960 = vst.msk [vmem:[#allocation3 + $0x48] sm:$0xf] %vm4941_vm7, %v4882_v15  ;;  %4524 = vrot.lane.b32.xlu0 %v4233_v1, %s5886_s10  ;;  %5692 = vmatprep.mubr.msk.bf16.mxu1 %vm5113_vm8, %v5785_v16  ;;  %v3026_v1 = vld [vmem:[#allocation2 + $0xb4] sm:$0xf]  ;;  %v3179_v10 = vrot.slane %v3177_v54, 4  ;;  %v3182_v4 = vrot.slane %v3180_v55, 5 }
 0x1fe   : > { %4001 = vrot.lane.b32.xlu1 %v3910_v60, %s5885_s9  ;;  %v4819_v60 = vrot.slane %v4674_v37, 5  ;;  %v3369_v0 = vshrl.u32 %v3026_v1, 16  ;;  %v3372_v15 = vshll.u32 %v3026_v1, 16  ;;  %v3384_v55 = vrot.slane %v3382_v40, 4  ;;  %v3028_v56 = vld [vmem:[#allocation2 + $0xbc] sm:$0x1] }
 0x1ff   : > { %v3459_v23 = vpop.permute.xlu0 %3458  ;;  %v3183_v33 = vor.u32 %v3182_v4, %v3179_v10  ;;  %v3203_v58 = vrot.slane %v3201_v25, 4  ;;  %v3393_v62 = vshrl.u32 %v3029_v45, 16 }
 0x200   : > { %3534 = vst.msk [vmem:[#allocation3 + $0x54] sm:$0xf] %vm3512_vm3, %v3459_v23  ;;  %v3457_v41 = vpop.permute.xlu1 %3456  ;;  %v5786_v30 = vld [vmem:[#allocation3 + $0x8] sm:$0xff]   ;;  %v4820_v16 = vsel %vm6389_vm14, %v5604_v63, %v4819_v60  ;;  %v4770_v23 = vrot.slane %v4653_v7, 5  ;;  %v3371_v27 = vrot.slane %v3369_v0, 4  ;;  %v3396_v63 = vshll.u32 %v3029_v45, 16 }
 0x201   : > { %3533 = vst.msk [vmem:[#allocation3 + $0x50] sm:$0xf] %vm3512_vm3, %v3457_v41  ;;  %4556 = vrot.lane.b32.xlu0 %v4425_v20, %s5886_s10  ;;  %5677 = vmatmul.mubr.msk.bf16.vlgmr.msra.gmra.mxu0 %vm5113_vm8, %v5786_v30  ;;  %v5597_v20 = vrot.slane %v4652_v6, 9  ;;  %v5605_v41 = vrot.slane %v4676_v12, 9  ;;  %v4678_v30 = vld [vmem:[#allocation2 + $0xbc] sm:$0x1] }
 0x202   : > { %4526 = vrot.lane.b32.xlu1 %v4243_v14, %s5886_s10  ;;  %v4821_v14 = vrot.slane %v4819_v60, 4  ;;  %v4772_v48 = vrot.slane %v4770_v23, 4  ;;  %v3184_v13 = vrot.slane %v3183_v33, 4  ;;  %v3198_v7 = vrot.slane %v3196_v46, 5  ;;  %v3564_v45 = vld [vmem:[#allocation2 + $0x58] sm:$0xf] }
 0x203   : > { %v3463_v22 = vpop.permute.xlu0 %3462  ;;  %v4771_v43 = vsel %vm6389_vm14, %v5597_v20, %v4770_v23  ;;  %v3395_v0 = vrot.slane %v3393_v62, 4 }
 0x204   : > { %3536 = vst.msk [vmem:[#allocation3 + $0x5c] sm:$0xf] %vm3512_vm3, %v3463_v22  ;;  %v3461_v44 = vpop.permute.xlu1 %3460  ;;  %v5787_v47 = vld [vmem:[#allocation3 + $0x48] sm:$0xff]   ;;  %v3374_v22 = vrot.slane %v3372_v15, 5  ;;  %v4774_v1 = vsel %vm6389_vm14, %v4772_v48, %v4773_v2  ;;  %v3398_v15 = vrot.slane %v3396_v63, 5 }
 0x205   : > { %3535 = vst.msk [vmem:[#allocation3 + $0x58] sm:$0xf] %vm3512_vm3, %v3461_v44  ;;  %4528 = vrot.lane.b32.xlu0 %v4257_v35, %s5886_s10  ;;  %5693 = vmatmul.mubr.msk.bf16.vlgmr.msra.gmra.mxu1 %vm5113_vm8, %v5787_v47  ;;  %v7131_v35 = vrot.slane %v3186_v61, 5  ;;  %v4823_v47 = vsel %vm6389_vm14, %v4821_v14, %v4822_v18  ;;  %v3388_v61 = vshll.u32 %v3028_v56, 16  ;;  %v3563_v2 = vld [vmem:[#allocation2 + $0x54] sm:$0xe] }
 0x206   : > { %4558 = vrot.lane.b32.xlu1 %v4435_v39, %s5886_s10  ;;  %v3378_v39 = vshll.u32 %v3027_v19, 16  ;;  %v3588_v56 = vld [vmem:[#allocation2 + $0xb8] sm:$0xf] }
 0x207   : > { %v3764_v31 = vpop.permute.xlu0 %3763  ;;  %v3193_v37 = vor.u32 %v3192_v28, %v7131_v35  ;;  %v3189_v21 = vsel %vm6048_vm11, %v3184_v13, %v7131_v35  ;;  %v3390_v24 = vrot.slane %v3388_v61, 5 }
 0x208   : > { %3855 = vst.msk [vmem:[#allocation3 + $0x14] sm:$0xf] %vm3849_vm6, %v3764_v31  ;;  %v3762_v42 = vpop.permute.xlu1 %3761  ;;  %v4827_v31 = vsel %vm6389_vm14, %v5605_v41, %v4826_v26  ;;  %v3380_v54 = vrot.slane %v3378_v39, 5  ;;  %v3399_v41 = vor.u32 %v3398_v15, %v3395_v0  ;;  %v3590_v0 = vld [vmem:[#allocation2 + $0xc0] sm:$0xe] }
 0x209   : > { %3854 = vst.msk [vmem:[#allocation3 + $0x10] sm:$0xf] %vm3849_vm6, %v3762_v42  ;;  %4560 = vrot.lane.b32.xlu0 %v4449_v49, %s5886_s10  ;;  %v4828_v49 = vrot.slane %v4826_v26, 4  ;;  %v3375_v42 = vor.u32 %v3374_v22, %v3371_v27  ;;  %v3194_v10 = vrot.slane %v3193_v37, 4  ;;  %v3031_v22 = vld [vmem:[#allocation2 + $0xc8] sm:$0x1] }
 0x20a   : > { %4530 = vrot.lane.b32.xlu1 %v4267_v51, %s5886_s10  ;;  %v4829_v51 = vrot.slane %v4678_v30, 5  ;;  %v3385_v4 = vor.u32 %v3384_v55, %v3380_v54  ;;  %v3412_v48 = vshll.u32 %v3031_v22, 16  ;;  %v3685_v37 = vrot.slane %v3564_v45, 5  ;;  %v3565_v55 = vld [vmem:[#allocation2 + $0x5c] sm:$0x1] }
 0x20b   : > { %v3796_v3 = vpop.permute.xlu0 %3795  ;;  %v3376_v11 = vrot.slane %v3375_v42, 4  ;;  %v3199_v23 = vsel %vm6048_vm11, %v3194_v10, %v3198_v7  ;;  %v3587_v42 = vld [vmem:[#allocation2 + $0xb4] sm:$0xe]  ;;  %v3567_v7 = vld [vmem:[#allocation2 + $0x64] sm:$0xf] }
 0x20c   : > { %3871 = vst.msk [vmem:[#allocation3 + $0x54] sm:$0xf] %vm3849_vm6, %v3796_v3  ;;  %v3794_v9 = vpop.permute.xlu1 %3793  ;;  %v3210_v3 = vshll.u32 %v3006_v53, 16  ;;  %v4830_v6 = vsel %vm6389_vm14, %v4828_v49, %v4829_v51  ;;  %v3386_v38 = vrot.slane %v3385_v4, 4 }
 0x20d   : > { %3870 = vst.msk [vmem:[#allocation3 + $0x50] sm:$0xf] %vm3849_vm6, %v3794_v9  ;;  %4861 = vrot.lane.b32.xlu0 %v4764_v8, %s5887_s27  ;;  %v3206_v8 = vrot.slane %v3204_v34, 5  ;;  %v3030_v9 = vld [vmem:[#allocation2 + $0xc4] sm:$0xf]  ;;  %v3381_v26 = vsel %vm6048_vm11, %v3376_v11, %v3380_v54 }
 0x20e   : > { %4562 = vrot.lane.b32.xlu1 %v4459_v5, %s5886_s10  ;;  %v3214_v5 = vshrl.u32 %v3006_v53, 16  ;;  %v3212_v14 = vrot.slane %v3210_v3, 5  ;;  %v3402_v20 = vshll.u32 %v3030_v9, 16  ;;  %v3406_v19 = vshrl.u32 %v3030_v9, 16 }
 0x20f   : > { %v3768_v32 = vpop.permute.xlu0 %3767  ;;  %v3207_v12 = vor.u32 %v3206_v8, %v3203_v58  ;;  %v3391_v39 = vsel %vm6048_vm11, %v3386_v38, %v3390_v24  ;;  %v3414_v53 = vrot.slane %v3412_v48, 5  ;;  %v5590_v8 = vrot.slane %v3587_v42, 9  ;;  %v3592_v38 = vld [vmem:[#allocation2 + $0xc8] sm:$0x1] }
 0x210   : > { %3857 = vst.msk [vmem:[#allocation3 + $0x1c] sm:$0xf] %vm3849_vm6, %v3768_v32  ;;  %v3766_v57 = vpop.permute.xlu1 %3765  ;;  %v3216_v18 = vrot.slane %v3214_v5, 4  ;;  %v3404_v28 = vrot.slane %v3402_v20, 5  ;;  %v3408_v36 = vrot.slane %v3406_v19, 4  ;;  %v3741_v3 = vrot.slane %v3588_v56, 5 }
 0x211   : > { %3856 = vst.msk [vmem:[#allocation3 + $0x18] sm:$0xf] %vm3849_vm6, %v3766_v57  ;;  %4893 = vrot.lane.b32.xlu0 %v4820_v16, %s5887_s27  ;;  %v3208_v57 = vrot.slane %v3207_v12, 4  ;;  %v3566_v5 = vld [vmem:[#allocation2 + $0x60] sm:$0xe]  ;;  %v3692_v12 = vrot.slane %v3567_v7, 5 }
 0x212   : > { %4863 = vrot.lane.b32.xlu1 %v4767_v17, %s5887_s27  ;;  %v3007_v17 = vld [vmem:[#allocation2 + $0x68] sm:$0x1]  ;;  %v3217_v33 = vor.u32 %v3216_v18, %v3212_v14  ;;  %v3742_v9 = vsel %vm6389_vm14, %v5590_v8, %v3741_v3  ;;  %v3743_v61 = vrot.slane %v3741_v3, 4  ;;  %v5591_v20 = vrot.slane %v3590_v0, 9  ;;  %v4121_v7 = vld [vmem:[#allocation2 + $0xcc] sm:$0xf] }
 0x213   : > { %v3800_v44 = vpop.permute.xlu0 %3799  ;;  %v3220_v35 = vshll.u32 %v3007_v17, 16  ;;  %v3213_v40 = vsel %vm6048_vm11, %v3208_v57, %v3212_v14  ;;  %v3591_v14 = vld [vmem:[#allocation2 + $0xc4] sm:$0xf]  ;;  %v3694_v17 = vrot.slane %v3692_v12, 4  ;;  %v4094_v57 = vld [vmem:[#allocation2 + $0x60] sm:$0xf] }
 0x214   : > { %3873 = vst.msk [vmem:[#allocation3 + $0x5c] sm:$0xf] %vm3849_vm6, %v3800_v44  ;;  %v3798_v50 = vpop.permute.xlu1 %3797  ;;  %v3218_v34 = vrot.slane %v3217_v33, 4  ;;  %v3748_v24 = vrot.slane %v3591_v14, 5  ;;  %v4272_v22 = vshll.u32 %v4094_v57, 16 }
 0x215   : > { %3872 = vst.msk [vmem:[#allocation3 + $0x58] sm:$0xf] %vm3849_vm6, %v3798_v50  ;;  %4865 = vrot.lane.b32.xlu0 %v4771_v43, %s5887_s27  ;;  %v3400_v43 = vrot.slane %v3399_v41, 4  ;;  %v3222_v44 = vrot.slane %v3220_v35, 5  ;;  %v4120_v14 = vld [vmem:[#allocation2 + $0xc8] sm:$0x1] }
 0x216   : > { %4895 = vrot.lane.b32.xlu1 %v4823_v47, %s5887_s27  ;;  %v3409_v47 = vor.u32 %v3408_v36, %v3404_v28  ;;  %v3749_v41 = vsel %vm6389_vm14, %v5591_v20, %v3748_v24  ;;  %v3750_v35 = vrot.slane %v3748_v24, 4  ;;  %v4274_v48 = vrot.slane %v4272_v22, 5 }
 0x217   : > { %v3958_v60 = vpop.permute.xlu0 %3957  ;;  %v3405_v50 = vsel %vm6048_vm11, %v3400_v43, %v3404_v28  ;;  %v3223_v13 = vsel %vm6048_vm11, %v3218_v34, %v3222_v44  ;;  %v3751_v28 = vrot.slane %v3592_v38, 5  ;;  %v4118_v43 = vld [vmem:[#allocation2 + $0xc0] sm:$0xf] }
 0x218   : > { %4049 = vst.msk [vmem:[#allocation3 + $0x14] sm:$0xf] %vm4043_vm5, %v3958_v60  ;;  %v3956_v59 = vpop.permute.xlu1 %3955  ;;  %v3410_v46 = vrot.slane %v3409_v47, 4  ;;  %v3687_v60 = vrot.slane %v3685_v37, 4  ;;  %v4461_v45 = vshrl.u32 %v4118_v43, 16 }
 0x219   : > { %4048 = vst.msk [vmem:[#allocation3 + $0x10] sm:$0xf] %vm4043_vm5, %v3956_v59  ;;  %4897 = vrot.lane.b32.xlu0 %v4827_v31, %s5887_s27  ;;  %v5582_v31 = vrot.slane %v3563_v2, 9  ;;  %v3752_v34 = vsel %vm6389_vm14, %v3750_v35, %v3751_v28 }
 0x21a   : > { %4867 = vrot.lane.b32.xlu1 %v4774_v1, %s5887_s27  ;;  %v3415_v63 = vsel %vm6048_vm11, %v3410_v46, %v3414_v53  ;;  %v3688_v1 = vrot.slane %v3565_v55, 5  ;;  %v3896_v46 = vld [vmem:[#allocation2 + $0x64] sm:$0xf]  ;;  %v4097_v53 = vld [vmem:[#allocation2 + $0x6c] sm:$0xf]  ;;  %v4463_v8 = vrot.slane %v4461_v45, 4 }
 0x21b   : > { %v3990_v16 = vpop.permute.xlu0 %3989  ;;  %v3686_v58 = vsel %vm6389_vm14, %v5582_v31, %v3685_v37  ;;  %v3911_v31 = vld [vmem:[#allocation2 + $0xc0] sm:$0xf]  ;;  %v4293_v3 = vshrl.u32 %v4097_v53, 16 }
 0x21c   : > { %4065 = vst.msk [vmem:[#allocation3 + $0x54] sm:$0xf] %vm4043_vm5, %v3990_v16  ;;  %v3988_v32 = vpop.permute.xlu1 %3987  ;;  %v3689_v4 = vsel %vm6389_vm14, %v3687_v60, %v3688_v1  ;;  %v3568_v16 = vld [vmem:[#allocation2 + $0x68] sm:$0x1]  ;;  %v3897_v1 = vld [vmem:[#allocation2 + $0x6c] sm:$0xf] }
 0x21d   : > { %4064 = vst.msk [vmem:[#allocation3 + $0x50] sm:$0xf] %vm4043_vm5, %v3988_v32  ;;  %3440 = vrot.lane.b32.xlu0 %v3189_v21, %s5883_s7  ;;  %v5583_v21 = vrot.slane %v3566_v5, 9  ;;  %v4296_v5 = vshll.u32 %v4097_v53, 16 }
 0x21e   : > { %4899 = vrot.lane.b32.xlu1 %v4830_v6, %s5887_s27  ;;  %v3589_v6 = vld [vmem:[#allocation2 + $0xbc] sm:$0x1] }
 0x21f   : > { %v3962_v30 = vpop.permute.xlu0 %3961  ;;  %v3744_v11 = vrot.slane %v3589_v6, 5  ;;  %v3693_v18 = vsel %vm6389_vm14, %v5583_v21, %v3692_v12  ;;  %v3912_v6 = vld [vmem:[#allocation2 + $0xc4] sm:$0xf]  ;;  %v4298_v20 = vrot.slane %v4296_v5, 5 }
 0x220   : > { %4051 = vst.msk [vmem:[#allocation3 + $0x1c] sm:$0xf] %vm4043_vm5, %v3962_v30  ;;  %v3960_v27 = vpop.permute.xlu1 %3959 }
 0x221   : > { %4050 = vst.msk [vmem:[#allocation3 + $0x18] sm:$0xf] %vm4043_vm5, %v3960_v27  ;;  %3472 = vrot.lane.b32.xlu0 %v3381_v26, %s5883_s7  ;;  %v3745_v32 = vsel %vm6389_vm14, %v3743_v61, %v3744_v11  ;;  %v4269_v27 = vshrl.u32 %v4094_v57, 16  ;;  %v4098_v61 = vld [vmem:[#allocation2 + $0x70] sm:$0xf] }
 0x222   : > { %3442 = vrot.lane.b32.xlu1 %v3199_v23, %s5883_s7  ;;  %v3695_v23 = vrot.slane %v3568_v16, 5  ;;  %v3913_v11 = vld [vmem:[#allocation2 + $0xcc] sm:$0xf]  ;;  %v4302_v24 = vshll.u32 %v4098_v61, 16 }
 0x223   : > { %v3994_v25 = vpop.permute.xlu0 %3993  ;;  %v4271_v47 = vrot.slane %v4269_v27, 4  ;;  %v3914_v27 = vld [vmem:[#allocation2 + $0xd0] sm:$0xf] }
 0x224   : > { %4067 = vst.msk [vmem:[#allocation3 + $0x5c] sm:$0xf] %vm4043_vm5, %v3994_v25  ;;  %v3992_v49 = vpop.permute.xlu1 %3991  ;;  %v3696_v33 = vsel %vm6389_vm14, %v3694_v17, %v3695_v23  ;;  %v3898_v17 = vld [vmem:[#allocation2 + $0x70] sm:$0xf] }
 0x225   : > { %4066 = vst.msk [vmem:[#allocation3 + $0x58] sm:$0xf] %vm4043_vm5, %v3992_v49  ;;  %3444 = vrot.lane.b32.xlu0 %v3213_v40, %s5883_s7  ;;  %v3895_v40 = vld [vmem:[#allocation2 + $0x60] sm:$0xf] }
 0x226   : > { %3474 = vrot.lane.b32.xlu1 %v3391_v39, %s5883_s7  ;;  %v4095_v39 = vld [vmem:[#allocation2 + $0x64] sm:$0xf] }
 0x227   : > { %v4519_v51 = vpop.permute.xlu0 %4518  ;;  %v4278_v2 = vshll.u32 %v4095_v39, 16  ;;  %v4282_v49 = vshrl.u32 %v4095_v39, 16 }
 0x228   : > { %4610 = vst.msk [vmem:[#allocation3 + $0x14] sm:$0xf] %vm4604_vm4, %v4519_v51  ;;  %v4517_v54 = vpop.permute.xlu1 %4516  ;;  %v4119_v51 = vld [vmem:[#allocation2 + $0xc4] sm:$0xf] }
 0x229   : > { %4609 = vst.msk [vmem:[#allocation3 + $0x10] sm:$0xf] %vm4604_vm4, %v4517_v54  ;;  %3476 = vrot.lane.b32.xlu0 %v3405_v50, %s5883_s7  ;;  %v4464_v50 = vshll.u32 %v4118_v43, 16  ;;  %v4275_v54 = vor.u32 %v4274_v48, %v4271_v47  ;;  %v7225_v55 = vrot.slane %v4278_v2, 5  ;;  %v4284_v56 = vrot.slane %v4282_v49, 4 }
 0x22a   : > { %3446 = vrot.lane.b32.xlu1 %v3223_v13, %s5883_s7  ;;  %v4474_v60 = vshrl.u32 %v4119_v51, 16 }
 0x22b   : > { %v4551_v62 = vpop.permute.xlu0 %4550  ;;  %v4276_v12 = vrot.slane %v4275_v54, 4 }
 0x22c   : > { %4626 = vst.msk [vmem:[#allocation3 + $0x54] sm:$0xf] %vm4604_vm4, %v4551_v62  ;;  %v4549_v59 = vpop.permute.xlu1 %4548  ;;  %v4466_v62 = vrot.slane %v4464_v50, 5  ;;  %v4476_v16 = vrot.slane %v4474_v60, 4 }
 0x22d   : > { %4625 = vst.msk [vmem:[#allocation3 + $0x50] sm:$0xf] %vm4604_vm4, %v4549_v59  ;;  %3777 = vrot.lane.b32.xlu0 %v3686_v58, %s5884_s8  ;;  %v4096_v58 = vld [vmem:[#allocation2 + $0x68] sm:$0x1] }
 0x22e   : > { %3478 = vrot.lane.b32.xlu1 %v3415_v63, %s5883_s7  ;;  %v4470_v63 = vshll.u32 %v4119_v51, 16  ;;  %v4467_v0 = vor.u32 %v4466_v62, %v4463_v8  ;;  %v4123_v8 = vld [vmem:[#allocation2 + $0xd4] sm:$0x1]  ;;  %s5650_s7 = sshll.u32 %s5869_s15, 12  ;;  %s7461_s15 = scalar_lea.sflag [#allocation5], %s175_s28 }
 0x22f   : > { %v4523_v10 = vpop.permute.xlu0 %4522  ;;  %s7452_s11 = scalar_lea.hbm %s7510_s3, %s5650_s7 }
 0x230   : > { %4612 = vst.msk [vmem:[#allocation3 + $0x1c] sm:$0xf] %vm4604_vm4, %v4523_v10  ;;  %v4521_v15 = vpop.permute.xlu1 %4520  ;;  %v4285_v10 = vor.u32 %v4284_v56, %v7225_v55  ;;  %v4468_v28 = vrot.slane %v4467_v0, 4 }
 0x231   : > { %4611 = vst.msk [vmem:[#allocation3 + $0x18] sm:$0xf] %vm4604_vm4, %v4521_v15  ;;  %3809 = vrot.lane.b32.xlu0 %v3742_v9, %s5884_s8  ;;  %v4472_v15 = vrot.slane %v4470_v63, 5 }
 0x232   : > { %3779 = vrot.lane.b32.xlu1 %v3689_v4, %s5884_s8  ;;  %v4288_v4 = vshll.u32 %v4096_v58, 16  ;;  %v4286_v35 = vrot.slane %v4285_v10, 4 }
 0x233   : > { %v4555_v19 = vpop.permute.xlu0 %4554  ;;  %v4477_v22 = vor.u32 %v4476_v16, %v4472_v15  ;;  %v4473_v51 = vsel %vm6048_vm11, %v4468_v28, %v4472_v15  ;;  %v4679_v16 = vld [vmem:[#allocation2 + $0xc0] sm:$0xe] }
 0x234   : > { %4628 = vst.msk [vmem:[#allocation3 + $0x5c] sm:$0xf] %vm4604_vm4, %v4555_v19  ;;  %v4553_v26 = vpop.permute.xlu1 %4552  ;;  %v4485_v19 = vshrl.u32 %v4121_v7, 16 }
 0x235   : > { %4627 = vst.msk [vmem:[#allocation3 + $0x58] sm:$0xf] %vm4604_vm4, %v4553_v26  ;;  %3781 = vrot.lane.b32.xlu0 %v3693_v18, %s5884_s8  ;;  %v4295_v18 = vrot.slane %v4293_v3, 4  ;;  %v4306_v26 = vshrl.u32 %v4098_v61, 16 }
 0x236   : > { %3811 = vrot.lane.b32.xlu1 %v3745_v32, %s5884_s8  ;;  %v4488_v32 = vshll.u32 %v4121_v7, 16  ;;  %v4487_v43 = vrot.slane %v4485_v19, 4  ;;  %v4655_v7 = vld [vmem:[#allocation2 + $0x60] sm:$0xe] }
 0x237   : > { %v4856_v30 = vpop.permute.xlu0 %4855  ;;  %v4299_v39 = vor.u32 %v4298_v20, %v4295_v18  ;;  %v4308_v47 = vrot.slane %v4306_v26, 4  ;;  %v4657_v18 = vld [vmem:[#allocation2 + $0x68] sm:$0x1]  ;;  %v4680_v20 = vld [vmem:[#allocation2 + $0xc4] sm:$0xf] }
 0x238   : > { %4947 = vst.msk [vmem:[#allocation3 + $0x14] sm:$0xf] %vm4941_vm7, %v4856_v30  ;;  %v4854_v36 = vpop.permute.xlu1 %4853  ;;  %v4122_v30 = vld [vmem:[#allocation2 + $0xd0] sm:$0xf]  ;;  %v4780_v26 = vrot.slane %v4657_v18, 5 }
 0x239   : > { %4946 = vst.msk [vmem:[#allocation3 + $0x10] sm:$0xf] %vm4941_vm7, %v4854_v36  ;;  %3813 = vrot.lane.b32.xlu0 %v3749_v41, %s5884_s8  ;;  %v4290_v41 = vrot.slane %v4288_v4, 5  ;;  %v4480_v36 = vshll.u32 %v4120_v14, 16  ;;  %v4494_v48 = vshll.u32 %v4122_v30, 16  ;;  %v4498_v2 = vshrl.u32 %v4122_v30, 16 }
 0x23a   : > { %3783 = vrot.lane.b32.xlu1 %v3696_v33, %s5884_s8  ;;  %v4281_v33 = vsel %vm6048_vm11, %v4276_v12, %v7225_v55  ;;  %v5598_v4 = vrot.slane %v4655_v7, 9  ;;  %v4681_v30 = vld [vmem:[#allocation2 + $0xc8] sm:$0x1] }
 0x23b   : > { %v4888_v25 = vpop.permute.xlu0 %4887  ;;  %v4291_v50 = vsel %vm6048_vm11, %v4286_v35, %v4290_v41  ;;  %v4496_v55 = vrot.slane %v4494_v48, 5  ;;  %v4500_v56 = vrot.slane %v4498_v2, 4 }
 0x23c   : > { %4963 = vst.msk [vmem:[#allocation3 + $0x54] sm:$0xf] %vm4941_vm7, %v4888_v25  ;;  %v4886_v44 = vpop.permute.xlu1 %4885  ;;  %v4490_v25 = vrot.slane %v4488_v32, 5  ;;  %v5606_v32 = vrot.slane %v4679_v16, 9 }
 0x23d   : > { %4962 = vst.msk [vmem:[#allocation3 + $0x50] sm:$0xf] %vm4941_vm7, %v4886_v44  ;;  %3971 = vrot.lane.b32.xlu0 %v3895_v40, %s5885_s9  ;;  %v4099_v40 = vld [vmem:[#allocation2 + $0x74] sm:$0x1]  ;;  %v4304_v44 = vrot.slane %v4302_v24, 5 }
 0x23e   : > { %3815 = vrot.lane.b32.xlu1 %v3752_v34, %s5884_s8  ;;  %v4491_v53 = vor.u32 %v4490_v25, %v4487_v43  ;;  %v4660_v25 = vld [vmem:[#allocation2 + $0x74] sm:$0x1]  ;;  %s5375_s8 = sshll.u32 %s7367_s6, 4  ;;  %s7456_s8 = int_to_ptr.vmem [resolvable:$true] %s5375_s8 }
 0x23f   : > { %v4860_v13 = vpop.permute.xlu0 %4859  ;;  %v4309_v54 = vor.u32 %v4308_v47, %v4304_v44  ;;  %s5801_s18 = scalar_lea.vmem %s7456_s8, 4096  ;;  %p5808_p1 = scmp.lt.s32.totalorder %s7456_s8, %s5806_s21 }
 0x240   : > { %4949 = vst.msk [vmem:[#allocation3 + $0x1c] sm:$0xf] %vm4941_vm7, %v4860_v13  ;;  %v4858_v37 = vpop.permute.xlu1 %4857  ;;  %v5788_v42 = vld [vmem:[#allocation3 + $0x10] sm:$0xff]   ;;  %v4300_v13 = vrot.slane %v4299_v39, 4  ;;  %v4492_v60 = vrot.slane %v4491_v53, 4  ;;  %p5802_p12 = scmp.ne.s32.totalorder %s7456_s8, %s5801_s18  ;;  %p5809_p2 = scmp.lt.s32.totalorder %s5807_s23, %s5801_s18 }
 0x241   : > { %4948 = vst.msk [vmem:[#allocation3 + $0x18] sm:$0xf] %vm4941_vm7, %v4858_v37  ;;  %4003 = vrot.lane.b32.xlu0 %v3911_v31, %s5885_s9  ;;  %5680 = vmatprep.mubr.msk.bf16.mxu0 %vm5113_vm8, %v5788_v42  ;;  %v4482_v31 = vrot.slane %v4480_v36, 5  ;;  %v4478_v42 = vrot.slane %v4477_v22, 4  ;;  %v4310_v5 = vrot.slane %v4309_v54, 4  ;;  %v4836_v22 = vrot.slane %v4681_v30, 5 }
 0x242   : > { %3973 = vrot.lane.b32.xlu1 %v3896_v46, %s5885_s9  ;;  %v4312_v46 = vshll.u32 %v4099_v40, 16  ;;  %v4305_v62 = vsel %vm6048_vm11, %v4300_v13, %v4304_v44  ;;  %v4497_v10 = vsel %vm6048_vm11, %v4492_v60, %v4496_v55  ;;  %v4682_v40 = vld [vmem:[#allocation2 + $0xcc] sm:$0xe]  ;;  %p5803_p13 = pnand %p5802_p12, %p5950_p4  ;;  %p5810_p3 = por %p5809_p2, %p5808_p1 }
 0x243   : > { %v4892_v59 = vpop.permute.xlu0 %4891  ;;  %v5607_v47 = vrot.slane %v4682_v40, 9 }
 0x244   : > { %4965 = vst.msk [vmem:[#allocation3 + $0x5c] sm:$0xf] %vm4941_vm7, %v4892_v59  ;;  %v4890_v9 = vpop.permute.xlu1 %4889  ;;  %v5789_v21 = vld [vmem:[#allocation3 + $0x50] sm:$0xff]   ;;  %v4314_v63 = vrot.slane %v4312_v46, 5  ;;  %v4501_v59 = vor.u32 %v4500_v56, %v4496_v55  ;;  %p5804_p0 = pneg %p5803_p13 }
 0x245   : > { %4964 = vst.msk [vmem:[#allocation3 + $0x58] sm:$0xf] %vm4941_vm7, %v4890_v9  ;;  %3975 = vrot.lane.b32.xlu0 %v3897_v1, %s5885_s9  ;;  %5696 = vmatprep.mubr.msk.bf16.mxu1 %vm5113_vm8, %v5789_v21  ;;  %v4483_v1 = vsel %vm6048_vm11, %v4478_v42, %v4482_v31  ;;  %v4656_v21 = vld [vmem:[#allocation2 + $0x64] sm:$0xf] }
 0x246   : > { %4005 = vrot.lane.b32.xlu1 %v3912_v6, %s5885_s9  ;;  %v4504_v6 = vshll.u32 %v4123_v8, 16  ;;  %v4315_v61 = vsel %vm6048_vm11, %v4310_v5, %v4314_v63  ;;  %v4502_v12 = vrot.slane %v4501_v59, 4  ;;  %v4777_v15 = vrot.slane %v4656_v21, 5  ;;  %p5811_p5 = pnand %p5810_p3, %p5804_p0 }
 0x247   : > { %v3467_v23 = vpop.permute.xlu0 %3466 }
 0x248   : > { %v3465_v38 = vpop.permute.xlu1 %3464  ;;  %v5790_v57 = vld [vmem:[#allocation3 + $0x18] sm:$0xff]   ;;  %3538 = vst.msk [vmem:[#allocation3 + $0x64] sm:$0xf] %vm3512_vm3, %v3467_v23  ;;  %v4506_v0 = vrot.slane %v4504_v6, 5  ;;  %v4778_v19 = vsel %vm6389_vm14, %v5598_v4, %v4777_v15  ;;  %v4779_v24 = vrot.slane %v4777_v15, 4 }
 0x249   : > { %3537 = vst.msk [vmem:[#allocation3 + $0x60] sm:$0xf] %vm3512_vm3, %v3465_v38  ;;  %4007 = vrot.lane.b32.xlu0 %v3913_v11, %s5885_s9  ;;  %5681 = vmatmul.mubr.msk.bf16.gmra.mxu0 %vm5113_vm8, %v5790_v57  ;;  %v4833_v38 = vrot.slane %v4680_v20, 5  ;;  %v4658_v57 = vld [vmem:[#allocation2 + $0x6c] sm:$0xe] }
 0x24a   : > { %3977 = vrot.lane.b32.xlu1 %v3898_v17, %s5885_s9  ;;  %v4507_v17 = vsel %vm6048_vm11, %v4502_v12, %v4506_v0  ;;  %v5599_v35 = vrot.slane %v4658_v57, 9  ;;  %v4781_v28 = vsel %vm6389_vm14, %v4779_v24, %v4780_v26 }
 0x24b   : > { %v3469_v34 = vpop.permute.xlu0 %3468  ;;  %v4834_v29 = vsel %vm6389_vm14, %v5606_v32, %v4833_v38 }
 0x24c   : > { %v3439_v49 = vpop.permute.xlu1 %3438  ;;  %v5791_v45 = vld [vmem:[#allocation3 + $0x58] sm:$0xff]   ;;  %3539 = vst.msk [vmem:[#allocation3 + $0x68] sm:$0xf] %vm3512_vm3, %v3469_v34 }
 0x24d   : > { %3524 = vst.msk [vmem:[#allocation3 + $0x2c] sm:$0xf] %vm3512_vm3, %v3439_v49  ;;  %4532 = vrot.lane.b32.xlu0 %v4281_v33, %s5886_s10  ;;  %5697 = vmatmul.mubr.msk.bf16.gmra.mxu1 %vm5113_vm8, %v5791_v45  ;;  %v4659_v33 = vld [vmem:[#allocation2 + $0x70] sm:$0xf]  ;;  %v4787_v45 = vrot.slane %v4660_v25, 5 }
 0x24e   : > { %4009 = vrot.lane.b32.xlu1 %v3914_v27, %s5885_s9  ;;  %v4835_v27 = vrot.slane %v4833_v38, 4  ;;  %v4784_v39 = vrot.slane %v4659_v33, 5  ;;  %v4683_v34 = vld [vmem:[#allocation2 + $0xd0] sm:$0xf] }
 0x24f   : > { %v3770_v37 = vpop.permute.xlu0 %3769 }
 0x250   : > { %v3471_v58 = vpop.permute.xlu1 %3470  ;;  %3858 = vst.msk [vmem:[#allocation3 + $0x20] sm:$0xf] %vm3849_vm6, %v3770_v37  ;;  %v4785_v44 = vsel %vm6389_vm14, %v5599_v35, %v4784_v39  ;;  %v4837_v48 = vsel %vm6389_vm14, %v4835_v27, %v4836_v22  ;;  %v4786_v49 = vrot.slane %v4784_v39, 4 }
 0x251   : > { %3540 = vst.msk [vmem:[#allocation3 + $0x6c] sm:$0xf] %vm3512_vm3, %v3471_v58  ;;  %4564 = vrot.lane.b32.xlu0 %v4473_v51, %s5886_s10  ;;  %v4684_v51 = vld [vmem:[#allocation2 + $0xd4] sm:$0x1] }
 0x252   : > { %4534 = vrot.lane.b32.xlu1 %v4291_v50, %s5886_s10  ;;  %v4840_v50 = vrot.slane %v4683_v34, 5  ;;  %v4788_v46 = vsel %vm6389_vm14, %v4786_v49, %v4787_v45  ;;  %v4843_v42 = vrot.slane %v4684_v51, 5 }
 0x253   : > { %v3802_v3 = vpop.permute.xlu0 %3801 }
 0x254   : > { %v3772_v9 = vpop.permute.xlu1 %3771  ;;  %3874 = vst.msk [vmem:[#allocation3 + $0x60] sm:$0xf] %vm3849_vm6, %v3802_v3  ;;  %v4841_v13 = vsel %vm6389_vm14, %v5607_v47, %v4840_v50  ;;  %v4842_v37 = vrot.slane %v4840_v50, 4 }
 0x255   : > { %3859 = vst.msk [vmem:[#allocation3 + $0x24] sm:$0xf] %vm3849_vm6, %v3772_v9  ;;  %4536 = vrot.lane.b32.xlu0 %v4305_v62, %s5886_s10 }
 0x256   : > { %4566 = vrot.lane.b32.xlu1 %v4483_v1, %s5886_s10  ;;  %v4844_v55 = vsel %vm6389_vm14, %v4842_v37, %v4843_v42 }
 0x257   : > { %v3774_v11 = vpop.permute.xlu0 %3773 }
 0x258   : > { %v3804_v14 = vpop.permute.xlu1 %3803  ;;  %3860 = vst.msk [vmem:[#allocation3 + $0x28] sm:$0xf] %vm3849_vm6, %v3774_v11 }
 0x259   : > { %3875 = vst.msk [vmem:[#allocation3 + $0x64] sm:$0xf] %vm3849_vm6, %v3804_v14  ;;  %4568 = vrot.lane.b32.xlu0 %v4497_v10, %s5886_s10 }
 0x25a   : > { %4538 = vrot.lane.b32.xlu1 %v4315_v61, %s5886_s10 }
 0x25b   : > { %v3806_v23 = vpop.permute.xlu0 %3805 }
 0x25c   : > { %v3776_v41 = vpop.permute.xlu1 %3775  ;;  %3876 = vst.msk [vmem:[#allocation3 + $0x68] sm:$0xf] %vm3849_vm6, %v3806_v23 }
 0x25d   : > { %3861 = vst.msk [vmem:[#allocation3 + $0x2c] sm:$0xf] %vm3849_vm6, %v3776_v41  ;;  %4869 = vrot.lane.b32.xlu0 %v4778_v19, %s5887_s27 }
 0x25e   : > { %4570 = vrot.lane.b32.xlu1 %v4507_v17, %s5886_s10 }
 0x25f   : > { %v3964_v36 = vpop.permute.xlu0 %3963 }
 0x260   : > { %v3808_v43 = vpop.permute.xlu1 %3807  ;;  %4052 = vst.msk [vmem:[#allocation3 + $0x20] sm:$0xf] %vm4043_vm5, %v3964_v36 }
 0x261   : > { %3877 = vst.msk [vmem:[#allocation3 + $0x6c] sm:$0xf] %vm3849_vm6, %v3808_v43  ;;  %4901 = vrot.lane.b32.xlu0 %v4834_v29, %s5887_s27 }
 0x262   : > { %4871 = vrot.lane.b32.xlu1 %v4781_v28, %s5887_s27 }
 0x263   : > { %v3996_v2 = vpop.permute.xlu0 %3995 }
 0x264   : > { %v3966_v31 = vpop.permute.xlu1 %3965  ;;  %4068 = vst.msk [vmem:[#allocation3 + $0x60] sm:$0xf] %vm4043_vm5, %v3996_v2 }
 0x265   : > { %4053 = vst.msk [vmem:[#allocation3 + $0x24] sm:$0xf] %vm4043_vm5, %v3966_v31  ;;  %4873 = vrot.lane.b32.xlu0 %v4785_v44, %s5887_s27  ;;  %v7361_v44 = vld [vmem:[%s7509_s2] ss:$0 sm:$0xff] }
 0x266   : > { %4903 = vrot.lane.b32.xlu1 %v4837_v48, %s5887_s27 }
 0x267   : > { %v3968_v53 = vpop.permute.xlu0 %3967 }
 0x268   : > { %v3998_v54 = vpop.permute.xlu1 %3997  ;;  %4054 = vst.msk [vmem:[#allocation3 + $0x28] sm:$0xf] %vm4043_vm5, %v3968_v53 }
 0x269   : > { %4069 = vst.msk [vmem:[#allocation3 + $0x64] sm:$0xf] %vm4043_vm5, %v3998_v54  ;;  %4905 = vrot.lane.b32.xlu0 %v4841_v13, %s5887_s27 }
 0x26a   : > { %4875 = vrot.lane.b32.xlu1 %v4788_v46, %s5887_s27 }
 0x26b   : > { %v4000_v56 = vpop.permute.xlu0 %3999 }
 0x26c   : > { %v3970_v58 = vpop.permute.xlu1 %3969  ;;  %4070 = vst.msk [vmem:[#allocation3 + $0x68] sm:$0xf] %vm4043_vm5, %v4000_v56 }
 0x26d   : > { %4055 = vst.msk [vmem:[#allocation3 + $0x2c] sm:$0xf] %vm4043_vm5, %v3970_v58 }
 0x26e   : > { %4907 = vrot.lane.b32.xlu1 %v4844_v55, %s5887_s27 }
 0x26f   : > { %v4525_v8 = vpop.permute.xlu0 %4524 }
 0x270   : > { %v4002_v62 = vpop.permute.xlu1 %4001  ;;  %4613 = vst.msk [vmem:[#allocation3 + $0x20] sm:$0xf] %vm4604_vm4, %v4525_v8 }
 0x271   : > { %4071 = vst.msk [vmem:[#allocation3 + $0x6c] sm:$0xf] %vm4043_vm5, %v4002_v62 }
 0x273   : > { %v4557_v63 = vpop.permute.xlu0 %4556 }
 0x274   : > { %v4527_v60 = vpop.permute.xlu1 %4526  ;;  %4629 = vst.msk [vmem:[#allocation3 + $0x60] sm:$0xf] %vm4604_vm4, %v4557_v63 }
 0x275   : > { %4614 = vst.msk [vmem:[#allocation3 + $0x24] sm:$0xf] %vm4604_vm4, %v4527_v60 }
 0x277   : > { %v4529_v52 = vpop.permute.xlu0 %4528 }
 0x278   : > { %v4559_v1 = vpop.permute.xlu1 %4558  ;;  %4615 = vst.msk [vmem:[#allocation3 + $0x28] sm:$0xf] %vm4604_vm4, %v4529_v52 }
 0x279   : > { %4630 = vst.msk [vmem:[#allocation3 + $0x64] sm:$0xf] %vm4604_vm4, %v4559_v1 }
 0x27b   : > { %v4561_v3 = vpop.permute.xlu0 %4560 }
 0x27c   : > { %v4531_v5 = vpop.permute.xlu1 %4530  ;;  %4631 = vst.msk [vmem:[#allocation3 + $0x68] sm:$0xf] %vm4604_vm4, %v4561_v3 }
 0x27d   : > { %4616 = vst.msk [vmem:[#allocation3 + $0x2c] sm:$0xf] %vm4604_vm4, %v4531_v5 }
 0x27f   : > { %v4862_v59 = vpop.permute.xlu0 %4861 }
 0x280   : > { %v4563_v6 = vpop.permute.xlu1 %4562  ;;  %4950 = vst.msk [vmem:[#allocation3 + $0x20] sm:$0xf] %vm4941_vm7, %v4862_v59 }
 0x281   : > { %4632 = vst.msk [vmem:[#allocation3 + $0x6c] sm:$0xf] %vm4604_vm4, %v4563_v6 }
 0x283   : > { %v4894_v7 = vpop.permute.xlu0 %4893 }
 0x284   : > { %v4864_v9 = vpop.permute.xlu1 %4863  ;;  %4966 = vst.msk [vmem:[#allocation3 + $0x60] sm:$0xf] %vm4941_vm7, %v4894_v7 }
 0x285   : > { %4951 = vst.msk [vmem:[#allocation3 + $0x24] sm:$0xf] %vm4941_vm7, %v4864_v9 }
 0x287   : > { %v4866_v21 = vpop.permute.xlu0 %4865 }
 0x288   : > { %v4896_v10 = vpop.permute.xlu1 %4895  ;;  %4952 = vst.msk [vmem:[#allocation3 + $0x28] sm:$0xf] %vm4941_vm7, %v4866_v21 }
 0x289   : > { %4967 = vst.msk [vmem:[#allocation3 + $0x64] sm:$0xf] %vm4941_vm7, %v4896_v10 }
 0x28b   : > { %v4898_v4 = vpop.permute.xlu0 %4897 }
 0x28c   : > { %v4868_v61 = vpop.permute.xlu1 %4867  ;;  %v5792_v11 = vld [vmem:[#allocation3 + $0x20] sm:$0xff]   ;;  %4968 = vst.msk [vmem:[#allocation3 + $0x68] sm:$0xf] %vm4941_vm7, %v4898_v4 }
 0x28d   : > { %4953 = vst.msk [vmem:[#allocation3 + $0x2c] sm:$0xf] %vm4941_vm7, %v4868_v61  ;;  %5684 = vmatprep.mubr.msk.bf16.mxu0 %vm5113_vm8, %v5792_v11 }
 0x28f   : > { %v3441_v12 = vpop.permute.xlu0 %3440 }
 0x290   : > { %v4900_v0 = vpop.permute.xlu1 %4899  ;;  %v5793_v15 = vld [vmem:[#allocation3 + $0x60] sm:$0xff]   ;;  %3525 = vst.msk [vmem:[#allocation3 + $0x30] sm:$0xf] %vm3512_vm3, %v3441_v12 }
 0x291   : > { %4969 = vst.msk [vmem:[#allocation3 + $0x6c] sm:$0xf] %vm4941_vm7, %v4900_v0  ;;  %5700 = vmatprep.mubr.msk.bf16.mxu1 %vm5113_vm8, %v5793_v15 }
 0x293   : > { %v3473_v16 = vpop.permute.xlu0 %3472 }
 0x294   : > { %v3443_v14 = vpop.permute.xlu1 %3442  ;;  %v5794_v18 = vld [vmem:[#allocation3 + $0x28] sm:$0xff]   ;;  %3541 = vst.msk [vmem:[#allocation3 + $0x70] sm:$0xf] %vm3512_vm3, %v3473_v16 }
 0x295   : > { %3526 = vst.msk [vmem:[#allocation3 + $0x34] sm:$0xf] %vm3512_vm3, %v3443_v14  ;;  %5685 = vmatmul.mubr.msk.bf16.gmra.mxu0 %vm5113_vm8, %v5794_v18 }
 0x297   : > { %v3445_v20 = vpop.permute.xlu0 %3444 }
 0x298   : > { %v3475_v19 = vpop.permute.xlu1 %3474  ;;  %v5795_v32 = vld [vmem:[#allocation3 + $0x68] sm:$0xff]   ;;  %3527 = vst.msk [vmem:[#allocation3 + $0x38] sm:$0xf] %vm3512_vm3, %v3445_v20 }
 0x299   : > { %3542 = vst.msk [vmem:[#allocation3 + $0x74] sm:$0xf] %vm3512_vm3, %v3475_v19  ;;  %5701 = vmatmul.mubr.msk.bf16.gmra.mxu1 %vm5113_vm8, %v5795_v32 }
 0x29b   : > { %v3477_v17 = vpop.permute.xlu0 %3476 }
 0x29c   : > { %v3447_v23 = vpop.permute.xlu1 %3446  ;;  %3543 = vst.msk [vmem:[#allocation3 + $0x78] sm:$0xf] %vm3512_vm3, %v3477_v17 }
 0x29d   : > { %3528 = vst.msk [vmem:[#allocation3 + $0x3c] sm:$0xf] %vm3512_vm3, %v3447_v23 }
 0x29f   : > { %v3778_v24 = vpop.permute.xlu0 %3777 }
 0x2a0   : > { %v3479_v26 = vpop.permute.xlu1 %3478  ;;  %3862 = vst.msk [vmem:[#allocation3 + $0x30] sm:$0xf] %vm3849_vm6, %v3778_v24 }
 0x2a1   : > { %3544 = vst.msk [vmem:[#allocation3 + $0x7c] sm:$0xf] %vm3512_vm3, %v3479_v26 }
 0x2a3   : > { %v3810_v38 = vpop.permute.xlu0 %3809 }
 0x2a4   : > { %v3780_v57 = vpop.permute.xlu1 %3779  ;;  %3878 = vst.msk [vmem:[#allocation3 + $0x70] sm:$0xf] %vm3849_vm6, %v3810_v38 }
 0x2a5   : > { %3863 = vst.msk [vmem:[#allocation3 + $0x34] sm:$0xf] %vm3849_vm6, %v3780_v57 }
 0x2a7   : > { %v3782_v41 = vpop.permute.xlu0 %3781 }
 0x2a8   : > { %v3812_v30 = vpop.permute.xlu1 %3811  ;;  %3864 = vst.msk [vmem:[#allocation3 + $0x38] sm:$0xf] %vm3849_vm6, %v3782_v41 }
 0x2a9   : > { %3879 = vst.msk [vmem:[#allocation3 + $0x74] sm:$0xf] %vm3849_vm6, %v3812_v30 }
 0x2ab   : > { %v3814_v33 = vpop.permute.xlu0 %3813 }
 0x2ac   : > { %v3784_v29 = vpop.permute.xlu1 %3783  ;;  %3880 = vst.msk [vmem:[#allocation3 + $0x78] sm:$0xf] %vm3849_vm6, %v3814_v33 }
 0x2ad   : > { %3865 = vst.msk [vmem:[#allocation3 + $0x3c] sm:$0xf] %vm3849_vm6, %v3784_v29 }
 0x2af   : > { %v3972_v35 = vpop.permute.xlu0 %3971 }
 0x2b0   : > { %v3816_v28 = vpop.permute.xlu1 %3815  ;;  %4056 = vst.msk [vmem:[#allocation3 + $0x30] sm:$0xf] %vm4043_vm5, %v3972_v35 }
 0x2b1   : > { %3881 = vst.msk [vmem:[#allocation3 + $0x7c] sm:$0xf] %vm3849_vm6, %v3816_v28 }
 0x2b3   : > { %v4004_v36 = vpop.permute.xlu0 %4003 }
 0x2b4   : > { %v3974_v27 = vpop.permute.xlu1 %3973  ;;  %4072 = vst.msk [vmem:[#allocation3 + $0x70] sm:$0xf] %vm4043_vm5, %v4004_v36 }
 0x2b5   : > { %4057 = vst.msk [vmem:[#allocation3 + $0x34] sm:$0xf] %vm4043_vm5, %v3974_v27 }
 0x2b7   : > { %v3976_v22 = vpop.permute.xlu0 %3975 }
 0x2b8   : > { %v4006_v39 = vpop.permute.xlu1 %4005  ;;  %4058 = vst.msk [vmem:[#allocation3 + $0x38] sm:$0xf] %vm4043_vm5, %v3976_v22 }
 0x2b9   : > { %4073 = vst.msk [vmem:[#allocation3 + $0x74] sm:$0xf] %vm4043_vm5, %v4006_v39 }
 0x2bb   : > { %v4008_v40 = vpop.permute.xlu0 %4007 }
 0x2bc   : > { %v3978_v43 = vpop.permute.xlu1 %3977  ;;  %4074 = vst.msk [vmem:[#allocation3 + $0x78] sm:$0xf] %vm4043_vm5, %v4008_v40 }
 0x2bd   : > { %4059 = vst.msk [vmem:[#allocation3 + $0x3c] sm:$0xf] %vm4043_vm5, %v3978_v43 }
 0x2bf   : > { %v4533_v25 = vpop.permute.xlu0 %4532 }
 0x2c0   : > { %v4010_v34 = vpop.permute.xlu1 %4009  ;;  %4617 = vst.msk [vmem:[#allocation3 + $0x30] sm:$0xf] %vm4604_vm4, %v4533_v25 }
 0x2c1   : > { %4075 = vst.msk [vmem:[#allocation3 + $0x7c] sm:$0xf] %vm4043_vm5, %v4010_v34  ;;  %v5678_v47 = vpop.f32.mrf.mxu0 }
 0x2c2   : > { %v5209_v48 = vadd.f32 %v5678_v47, %v7361_v44 }
 0x2c3   : > { %v4565_v2 = vpop.permute.xlu0 %4564  ;;  %v5200_v45 = vpop.f32.mrf.mxu0 }
 0x2c4   : > { %v4535_v49 = vpop.permute.xlu1 %4534  ;;  %4633 = vst.msk [vmem:[#allocation3 + $0x70] sm:$0xf] %vm4604_vm4, %v4565_v2  ;;  %5329 = vst [vmem:[%s7367_s6 + $0x10] sm:$0xff] %v5209_v48  ;;  %v5201_v50 = vadd.f32 %v7361_v44, %v5200_v45 }
 0x2c5   : > { %4618 = vst.msk [vmem:[#allocation3 + $0x34] sm:$0xf] %vm4604_vm4, %v4535_v49  ;;  %v5679_v31 = vpop.f32.mrf.mxu0  ;;  %v5694_v51 = vpop.f32.mrf.mxu1 }
 0x2c6   : > { %5327 = vst [vmem:[%s7367_s6] sm:$0xff] %v5201_v50  ;;  %v5212_v13 = vadd.f32 %v5679_v31, %v7361_v44  ;;  %v5273_v46 = vadd.f32 %v5694_v51, %v7361_v44 }
 0x2c7   : > { %v4537_v53 = vpop.permute.xlu0 %4536  ;;  %v5203_v42 = vpop.f32.mrf.mxu0 }
 0x2c8   : > { %v4567_v37 = vpop.permute.xlu1 %4566  ;;  %4619 = vst.msk [vmem:[#allocation3 + $0x38] sm:$0xf] %vm4604_vm4, %v4537_v53  ;;  %5330 = vst [vmem:[%s7367_s6 + $0x18] sm:$0xff] %v5212_v13  ;;  %v5204_v54 = vadd.f32 %v7361_v44, %v5203_v42  ;;  %v5264_v55 = vpop.f32.mrf.mxu1 }
 0x2c9   : > { %5345 = vst [vmem:[%s7367_s6 + $0x90] sm:$0xff] %v5273_v46  ;;  %4634 = vst.msk [vmem:[#allocation3 + $0x74] sm:$0xf] %vm4604_vm4, %v4567_v37  ;;  %v5265_v56 = vadd.f32 %v7361_v44, %v5264_v55 }
 0x2ca   : > { %5328 = vst [vmem:[%s7367_s6 + $0x8] sm:$0xff] %v5204_v54  ;;  %v5695_v58 = vpop.f32.mrf.mxu1 }
 0x2cb   : > { %v4569_v8 = vpop.permute.xlu0 %4568  ;;  %5343 = vst [vmem:[%s7367_s6 + $0x80] sm:$0xff] %v5265_v56  ;;  %v5276_v62 = vadd.f32 %v5695_v58, %v7361_v44 }
 0x2cc   : > { %v4539_v63 = vpop.permute.xlu1 %4538  ;;  %4635 = vst.msk [vmem:[#allocation3 + $0x78] sm:$0xf] %vm4604_vm4, %v4569_v8  ;;  %v5267_v60 = vpop.f32.mrf.mxu1 }
 0x2cd   : > { %4620 = vst.msk [vmem:[#allocation3 + $0x3c] sm:$0xf] %vm4604_vm4, %v4539_v63  ;;  %5346 = vst [vmem:[%s7367_s6 + $0x98] sm:$0xff] %v5276_v62  ;;  %v5268_v52 = vadd.f32 %v7361_v44, %v5267_v60 }
 0x2cf   : > { %v4870_v1 = vpop.permute.xlu0 %4869  ;;  %5344 = vst [vmem:[%s7367_s6 + $0x88] sm:$0xff] %v5268_v52 }
 0x2d0   : > { %v4571_v3 = vpop.permute.xlu1 %4570  ;;  %4954 = vst.msk [vmem:[#allocation3 + $0x30] sm:$0xf] %vm4941_vm7, %v4870_v1 }
 0x2d1   : > { %4636 = vst.msk [vmem:[#allocation3 + $0x7c] sm:$0xf] %vm4604_vm4, %v4571_v3 }
 0x2d3   : > { %v4902_v5 = vpop.permute.xlu0 %4901 }
 0x2d4   : > { %v4872_v59 = vpop.permute.xlu1 %4871  ;;  %4970 = vst.msk [vmem:[#allocation3 + $0x70] sm:$0xf] %vm4941_vm7, %v4902_v5 }
 0x2d5   : > { %4955 = vst.msk [vmem:[#allocation3 + $0x34] sm:$0xf] %vm4941_vm7, %v4872_v59 }
 0x2d7   : > { %v4874_v6 = vpop.permute.xlu0 %4873 }
 0x2d8   : > { %v4904_v7 = vpop.permute.xlu1 %4903  ;;  %4956 = vst.msk [vmem:[#allocation3 + $0x38] sm:$0xf] %vm4941_vm7, %v4874_v6 }
 0x2d9   : > { %4971 = vst.msk [vmem:[#allocation3 + $0x74] sm:$0xf] %vm4941_vm7, %v4904_v7 }
 0x2db   : > { %v4906_v9 = vpop.permute.xlu0 %4905 }
 0x2dc   : > { %v4876_v21 = vpop.permute.xlu1 %4875  ;;  %v5796_v10 = vld [vmem:[#allocation3 + $0x30] sm:$0xff]   ;;  %4972 = vst.msk [vmem:[#allocation3 + $0x78] sm:$0xf] %vm4941_vm7, %v4906_v9 }
 0x2dd   : > { %4957 = vst.msk [vmem:[#allocation3 + $0x3c] sm:$0xf] %vm4941_vm7, %v4876_v21  ;;  %5688 = vmatprep.mubr.msk.bf16.mxu0 %vm5113_vm8, %v5796_v10 }
 0x2e0   : > { %v4908_v4 = vpop.permute.xlu1 %4907  ;;  %v5797_v61 = vld [vmem:[#allocation3 + $0x70] sm:$0xff]  }
 0x2e1   : > { %4973 = vst.msk [vmem:[#allocation3 + $0x7c] sm:$0xf] %vm4941_vm7, %v4908_v4  ;;  %5704 = vmatprep.mubr.msk.bf16.mxu1 %vm5113_vm8, %v5797_v61 }
 0x2e4   : > { %v5798_v11 = vld [vmem:[#allocation3 + $0x38] sm:$0xff]  }
 0x2e5   : > { %5689 = vmatmul.mubr.msk.bf16.gmra.mxu0 %vm5113_vm8, %v5798_v11 }
 0x2e8   : > { %v5799_v12 = vld [vmem:[#allocation3 + $0x78] sm:$0xff]  }
 0x2e9   : > { %5705 = vmatmul.mubr.msk.bf16.gmra.mxu1 %vm5113_vm8, %v5799_v12 }
 0x309   : > { %v5682_v0 = vpop.f32.mrf.mxu0 }
 0x30a   : > { %v5225_v15 = vadd.f32 %v5682_v0, %v7361_v44 }
 0x30b   : > { %v5216_v16 = vpop.f32.mrf.mxu0 }
 0x30c   : > { %5333 = vst [vmem:[%s7367_s6 + $0x30] sm:$0xff] %v5225_v15  ;;  %v5217_v14 = vadd.f32 %v7361_v44, %v5216_v16 }
 0x30d   : > { %v5683_v18 = vpop.f32.mrf.mxu0  ;;  %v5698_v20 = vpop.f32.mrf.mxu1 }
 0x30e   : > { %5331 = vst [vmem:[%s7367_s6 + $0x20] sm:$0xff] %v5217_v14  ;;  %v5228_v19 = vadd.f32 %v5683_v18, %v7361_v44  ;;  %v5289_v32 = vadd.f32 %v5698_v20, %v7361_v44 }
 0x30f   : > { %v5219_v17 = vpop.f32.mrf.mxu0  ;;  %v5280_v23 = vpop.f32.mrf.mxu1 }
 0x310   : > { %5334 = vst [vmem:[%s7367_s6 + $0x38] sm:$0xff] %v5228_v19  ;;  %5349 = vst [vmem:[%s7367_s6 + $0xb0] sm:$0xff] %v5289_v32  ;;  %v5220_v24 = vadd.f32 %v7361_v44, %v5219_v17  ;;  %v5281_v26 = vadd.f32 %v7361_v44, %v5280_v23 }
 0x311   : > { %v5699_v38 = vpop.f32.mrf.mxu1 }
 0x312   : > { %5332 = vst [vmem:[%s7367_s6 + $0x28] sm:$0xff] %v5220_v24  ;;  %5347 = vst [vmem:[%s7367_s6 + $0xa0] sm:$0xff] %v5281_v26  ;;  %v5292_v57 = vadd.f32 %v5699_v38, %v7361_v44 }
 0x313   : > { %v5283_v41 = vpop.f32.mrf.mxu1 }
 0x314   : > { %5350 = vst [vmem:[%s7367_s6 + $0xb8] sm:$0xff] %v5292_v57  ;;  %v5284_v30 = vadd.f32 %v7361_v44, %v5283_v41 }
 0x316   : > { %5348 = vst [vmem:[%s7367_s6 + $0xa8] sm:$0xff] %v5284_v30 }
 0x355   : > { %v5686_v33 = vpop.f32.mrf.mxu0 }
 0x356   : > { %v5241_v29 = vadd.f32 %v5686_v33, %v7361_v44 }
 0x357   : > { %v5232_v35 = vpop.f32.mrf.mxu0 }
 0x358   : > { %5337 = vst [vmem:[%s7367_s6 + $0x50] sm:$0xff] %v5241_v29  ;;  %v5233_v28 = vadd.f32 %v7361_v44, %v5232_v35 }
 0x359   : > { %v5687_v36 = vpop.f32.mrf.mxu0  ;;  %v5702_v27 = vpop.f32.mrf.mxu1 }
 0x35a   : > { %5335 = vst [vmem:[%s7367_s6 + $0x40] sm:$0xff] %v5233_v28  ;;  %v5244_v22 = vadd.f32 %v5687_v36, %v7361_v44  ;;  %v5305_v39 = vadd.f32 %v5702_v27, %v7361_v44 }
 0x35b   : > { %v5235_v40 = vpop.f32.mrf.mxu0  ;;  %v5296_v43 = vpop.f32.mrf.mxu1 }
 0x35c   : > { %5338 = vst [vmem:[%s7367_s6 + $0x58] sm:$0xff] %v5244_v22  ;;  %5353 = vst [vmem:[%s7367_s6 + $0xd0] sm:$0xff] %v5305_v39  ;;  %v5236_v25 = vadd.f32 %v7361_v44, %v5235_v40  ;;  %v5297_v34 = vadd.f32 %v7361_v44, %v5296_v43 }
 0x35d   : > { %v5703_v47 = vpop.f32.mrf.mxu1 }
 0x35e   : > { %5336 = vst [vmem:[%s7367_s6 + $0x48] sm:$0xff] %v5236_v25  ;;  %5351 = vst [vmem:[%s7367_s6 + $0xc0] sm:$0xff] %v5297_v34  ;;  %v5308_v48 = vadd.f32 %v5703_v47, %v7361_v44 }
 0x35f   : > { %v5299_v2 = vpop.f32.mrf.mxu1 }
 0x360   : > { %5354 = vst [vmem:[%s7367_s6 + $0xd8] sm:$0xff] %v5308_v48  ;;  %v5300_v49 = vadd.f32 %v7361_v44, %v5299_v2 }
 0x362   : > { %5352 = vst [vmem:[%s7367_s6 + $0xc8] sm:$0xff] %v5300_v49 }
 0x3a5   : > { %v5690_v45 = vpop.f32.mrf.mxu0 }
 0x3a6   : > { %v5257_v50 = vadd.f32 %v5690_v45, %v7361_v44 }
 0x3a7   : > { %v5248_v31 = vpop.f32.mrf.mxu0 }
 0x3a8   : > { %5341 = vst [vmem:[%s7367_s6 + $0x70] sm:$0xff] %v5257_v50  ;;  %v5249_v51 = vadd.f32 %v7361_v44, %v5248_v31 }
 0x3a9   : > { %v5691_v13 = vpop.f32.mrf.mxu0  ;;  %v5706_v46 = vpop.f32.mrf.mxu1 }
 0x3aa   : > { %5339 = vst [vmem:[%s7367_s6 + $0x60] sm:$0xff] %v5249_v51  ;;  %v5260_v53 = vadd.f32 %v5691_v13, %v7361_v44  ;;  %v5321_v37 = vadd.f32 %v5706_v46, %v7361_v44 }
 0x3ab   : > { %v5251_v42 = vpop.f32.mrf.mxu0  ;;  %v5312_v54 = vpop.f32.mrf.mxu1 }
 0x3ac   : > { %5342 = vst [vmem:[%s7367_s6 + $0x78] sm:$0xff] %v5260_v53  ;;  %5357 = vst [vmem:[%s7367_s6 + $0xf0] sm:$0xff] %v5321_v37  ;;  %v5252_v55 = vadd.f32 %v7361_v44, %v5251_v42  ;;  %v5313_v56 = vadd.f32 %v7361_v44, %v5312_v54 }
 0x3ad   : > { %v5707_v58 = vpop.f32.mrf.mxu1 }
 0x3ae   : > { %5340 = vst [vmem:[%s7367_s6 + $0x68] sm:$0xff] %v5252_v55  ;;  %5355 = vst [vmem:[%s7367_s6 + $0xe0] sm:$0xff] %v5313_v56  ;;  %v5324_v8 = vadd.f32 %v5707_v58, %v7361_v44 }
 0x3af   : > { %v5315_v62 = vpop.f32.mrf.mxu1 }
 0x3b0   : > { %5358 = vst [vmem:[%s7367_s6 + $0xf8] sm:$0xff] %v5324_v8  ;;  %v5316_v63 = vadd.f32 %v7361_v44, %v5315_v62 }
 0x3b2   : > { %5356 = vst [vmem:[%s7367_s6 + $0xe8] sm:$0xff] %v5316_v63 }
 0x3b3   : > { %5814 = shalt.err (!%p5811_p5)
}
 0x3b4   : > { %s5815_s26 = scalar_lea.hbm %s7452_s11, 4096  ;;  %s5819_s29 = scalar_lea.hbm %s7510_s3, 8192 }
 0x3b5   : > { %p5816_p6 = scmp.ne.s32.totalorder %s7452_s11, %s5815_s26  ;;  %p5820_p10 = scmp.lt.s32.totalorder %s7452_s11, %s7510_s3 }
 0x3b6   : > { %p5821_p11 = scmp.lt.s32.totalorder %s5819_s29, %s5815_s26 }
 0x3b7   : > { %p5817_p7 = pnand %p5816_p6, %p5950_p4 }
 0x3b8   : > { %p5822_p12 = por %p5821_p11, %p5820_p10 }
 0x3b9   : > { %p5818_p9 = pneg %p5817_p7 }
 0x3bb   : > { %p5823_p13 = pnand %p5822_p12, %p5818_p9 }
 0x3bd   : > { %5826 = shalt.err (!%p5823_p13)
}
 0x3be   : > { %s5889_s6 = smov 128  }
 0x3bf   : > { %5716 = dma.vmem_to_hbm [thread:$0]  (%p5950_p4), %s7456_s8, 4096, %s7452_s11, %s7461_s15, %s5889_s6, %s5889_s6, %s5881_s5  }
 0x3c0 PF: > { %p5722_p0 = scmp.ge.s32.totalorder %s5877_s17, 2  ;;  %s5390_s7 = sand.u32 1, %s5857_s12  }
 0x3c1   : > { %s5391_s9 = scalar_lea.sflag [#allocation5], %s5390_s7 }
 0x3c2   : > { %p5719_p1 = pnand %p5722_p0, %p5957_p8 }
 0x3c4   : > { %p5720_p2 = pneg %p5719_p1 }
 0x3c6   : > { %5852 = dma.done.wait (%p5720_p2), %s5391_s9, 4096  }
 0x3c7   : > { %5854 = vsyncadd (%p5720_p2), %s5391_s9, 4294963200  ;;  %s16_s17 = sadd.s32 1, %s5877_s17   ;;  %s7525_s12 = smov %s5861_s13 }
 0x3c8   : > { %p13_p3 = scmp.ge.s32.totalorder %s16_s17, 4   ;;  %s7526_s13 = smov %s5865_s14 }
 0x3c9   : > { %s7527_s14 = smov %s5963_s25  ;;  %s7528_s15 = smov %s5873_s16 }
 0x3ca   : > { %s7529_s16 = smov %s7531_s20  ;;  %15 = sbr.rel (!%p13_p3) target bundleno = 4 (0x4), region = 275 }
 0x3cf   :  { %5396 = vsyncpa [#allocation5], 1 }
 0x3d0   :  { %5398 = vsyncpa [#allocation5 + $0x1], 1 }

</bundles_post_ra>
